<compile_context>
chip_gen: v7x
topology: tpu7x:2x2x1
jax: 0.10.0
libtpu: 0.0.40
codegen_flags: <defaults>
</compile_context>

<pallas_src>
import functools
import math

import jax
import jax.numpy as jnp
from jax.experimental import pallas as pl
from jax.experimental.pallas import tpu as pltpu


def _round_up(x, m):
    return (x + m - 1) // m * m


# ----------------------------------------------------------------------------
# Fused encoder kernel (single pallas_call, everything VMEM-resident)
# ----------------------------------------------------------------------------
def encoder_kernel(*refs, num_layer, kernel_size, batch, batch_pad, seq_len):
    """Fused TurboAE CNN encoder forward.

    Layout: activations are a time-major 2-D slab (L*B_pad, C) with
    row = t*B_pad + b and B_pad = round_up(B, 8), so conv taps / interleave
    copies are sublane-aligned.

    refs (in order):
      perm   : SMEM int32 (L,)            interleaver permutation
      x      : VMEM f32 (L*B_pad, 1)      message bits (padded batch rows = 0)
      vmask  : VMEM f32 (L*B_pad, 1)      1.0 on real batch rows, else 0.0
      cnn1   : num_layer x [w (K, Cin, H), b (1, H)]
      lin1   : w (H, 10), b (1, 10)
      cnn2   : num_layer x [w (K, Cin, H), b (1, H)]
      lin2   : w (H, 2),  b (1, 2)
      out    : VMEM f32 (L*B_pad, 2)
      pad    : scratch (L*B_pad + 2*(K//2)*B_pad, Cmax)   conv staging buffer
      xsys   : scratch (L*B_pad, 10)                      pre-interleave acts
    """
    it = iter(refs)
    perm_ref = next(it)
    x_ref = next(it)
    mask_ref = next(it)
    cnn1 = [(next(it), next(it)) for _ in range(num_layer)]
    l1w_ref, l1b_ref = next(it), next(it)
    cnn2 = [(next(it), next(it)) for _ in range(num_layer)]
    l2w_ref, l2b_ref = next(it), next(it)
    o_ref = next(it)
    pad_ref = next(it)
    xsys_ref = next(it)

    K = kernel_size
    BP = batch_pad
    N = seq_len * BP                   # padded row count of the slab
    PB = (K // 2) * BP                 # conv halo rows per side
    cmax = pad_ref.shape[1]

    def elu(v):
        # F.elu (alpha=1).  exp(x)-1 kept (not expm1) for guaranteed Mosaic
        # lowering coverage; the precision loss near 0 is negligible here.
        return jnp.where(v > 0.0, v, jnp.exp(jnp.minimum(v, 0.0)) - 1.0)

    # Zero ONLY the halo rows (never written afterwards): they provide the
    # zero "same"-padding for every conv layer of both stacks for free.
    halo = jnp.zeros((PB, cmax), jnp.float32)
    pad_ref[pl.ds(0, PB), :] = halo
    pad_ref[pl.ds(PB + N, PB), :] = halo

    def conv1d_same(w_ref, b_ref, cin, h=None):
        """One 'same' Conv1d.  If h is given it is staged into pad_ref first;
        otherwise pad_ref[:, 0:cin] interior is assumed already staged (used
        right after the in-place interleave).
        NOTE: pad_ref columns >= cin hold stale data from earlier layers;
        every read below is restricted to 0:cin, which keeps this correct."""
        cout = w_ref.shape[2]
        if h is not None:
            pad_ref[pl.ds(PB, N), 0:cin] = h
        # Bias broadcast hoisted out of the tap loop.
        acc = jnp.zeros((N, cout), jnp.float32) + b_ref[...]
        # K temporal taps = K sublane-aligned row windows of the padded slab.
        # No im2col lane-concat: each tap is consumed directly (VPU FMA for
        # cin == 1, one MXU matmul per tap otherwise).
        for k in range(K):
            tap = pad_ref[pl.ds(k * BP, N), 0:cin]
            if cin == 1:
                acc = acc + tap * w_ref[k]          # (N,1)*(1,H) broadcast FMA
            else:
                acc = acc + jnp.dot(tap, w_ref[k],
                                    preferred_element_type=jnp.float32)
        return acc

    # inputs.unsqueeze(2); 2*x - 1
    h = 2.0 * x_ref[...] - 1.0                      # (N, 1)

    # enc_cnn_1 (Conv1d + ELU, num_layer times)
    cin = 1
    for (w_ref, b_ref) in cnn1:
        h = elu(conv1d_same(w_ref, b_ref, cin, h))
        cin = w_ref.shape[2]

    # enc_linear_1 -> ELU -> SaturatedSTE forward (clamp to [-1, 1])
    s = elu(jnp.dot(h, l1w_ref[...], preferred_element_type=jnp.float32)
            + l1b_ref[...])
    xsys_ref[...] = jnp.clip(s, -1.0, 1.0)          # (N, 10)

    # Interleave along the block dimension: L sublane-aligned block copies
    # (B_pad rows each) driven by the SMEM permutation, written straight into
    # the conv staging buffer.  No O(N^2) permutation matrix, no gather.
    def interleave_body(t, carry):
        src = pl.multiple_of(perm_ref[t] * BP, BP)
        dst = pl.multiple_of(PB + t * BP, BP)
        pad_ref[pl.ds(dst, BP), 0:10] = xsys_ref[pl.ds(src, BP), :]
        return carry
    jax.lax.fori_loop(0, seq_len, interleave_body, 0)

    # enc_cnn_2 (Conv1d + ELU); layer 0 reads the interleaved activations
    # already staged in pad_ref.
    h = None
    cin = 10
    for (w_ref, b_ref) in cnn2:
        h = elu(conv1d_same(w_ref, b_ref, cin, h))
        cin = w_ref.shape[2]

    # enc_linear_2 -> ELU
    out = elu(jnp.dot(h, l2w_ref[...], preferred_element_type=jnp.float32)
              + l2b_ref[...])                       # (N, 2)

    # power_constraint: (x - mean) / std over the REAL elements only (padding
    # batch rows masked out).  torch.std default = unbiased (n-1).
    m = mask_ref[...]                               # (N, 1)
    n_el = float(seq_len * batch * out.shape[1])
    om = out * m
    tot = jnp.sum(jnp.sum(om, axis=1, keepdims=True), axis=0, keepdims=True)
    mean = tot / n_el
    cen = out - mean
    cm = cen * m
    ssq = jnp.sum(jnp.sum(cm * cm, axis=1, keepdims=True),
                  axis=0, keepdims=True)
    inv_std = jax.lax.rsqrt(ssq / (n_el - 1.0))     # EUP rsqrt, no sqrt+div
    o_ref[...] = cen * inv_std


# ----------------------------------------------------------------------------
# Wrapper: one layout conversion at the boundary, one pallas_call total.
# ----------------------------------------------------------------------------
@functools.partial(jax.jit,
                   static_argnames=("num_layer", "kernel_size", "num_unit"))
def enc_forward(x_bits, perm, params, *, num_layer, kernel_size, num_unit):
    """x_bits: (B, L) message bits -> codes (B, L, 2)."""
    B, L = x_bits.shape
    BP = _round_up(B, 8)              # sublane-aligned batch stride
    N = L * BP
    K = kernel_size
    PB = (K // 2) * BP
    cmax = max(num_unit, 10, 1)

    # time-major slab with padded batch stride: row = t*BP + b
    xt = jnp.zeros((L, BP), jnp.float32)
    xt = xt.at[:, :B].set(jnp.transpose(x_bits).astype(jnp.float32))
    xt = xt.reshape(N, 1)
    # validity mask for the power constraint (1.0 on real batch rows)
    vmask = jnp.zeros((L, BP), jnp.float32).at[:, :B].set(1.0).reshape(N, 1)

    flat = [perm.astype(jnp.int32), xt, vmask]
    for (w, b) in params["cnn1"]:
        flat += [w, b]
    flat += list(params["lin1"])
    for (w, b) in params["cnn2"]:
        flat += [w, b]
    flat += list(params["lin2"])

    in_specs = ([pl.BlockSpec(memory_space=pltpu.MemorySpace.SMEM)]
                + [pl.BlockSpec(memory_space=pltpu.MemorySpace.VMEM)]
                * (len(flat) - 1))

    # Scoped-VMEM budget sized to the working set (scratch + lane-padded live
    # activations + params), with headroom; clamped well under v7x's 64 MiB.
    lane = 128
    work_bytes = 4 * lane * ((N + 2 * PB) + 9 * N)
    work_bytes += 4 * sum(int(a.size) for a in flat)
    vmem_limit = int(min(96 * 2 ** 20, max(32 * 2 ** 20, 2 * work_bytes)))

    # rough advisory cost for the XLA scheduler
    flops = 0
    cin = 1
    for (w, _) in params["cnn1"]:
        flops += 2 * N * K * cin * w.shape[2]
        cin = w.shape[2]
    flops += 2 * N * num_unit * 10
    cin = 10
    for (w, _) in params["cnn2"]:
        flops += 2 * N * K * cin * w.shape[2]
        cin = w.shape[2]
    flops += 2 * N * num_unit * 2
    cost = pl.CostEstimate(
        flops=int(flops),
        transcendentals=int(N * (2 * num_layer * num_unit + 12)),
        bytes_accessed=int(4 * (sum(int(a.size) for a in flat) + N * 2)),
    )

    out = pl.pallas_call(
        functools.partial(encoder_kernel, num_layer=num_layer,
                          kernel_size=kernel_size, batch=B, batch_pad=BP,
                          seq_len=L),
        out_shape=jax.ShapeDtypeStruct((N, 2), jnp.float32),
        in_specs=in_specs,
        out_specs=pl.BlockSpec(memory_space=pltpu.MemorySpace.VMEM),
        scratch_shapes=[pltpu.VMEM((N + 2 * PB, cmax), jnp.float32),
                        pltpu.VMEM((N, 10), jnp.float32)],
        compiler_params=pltpu.CompilerParams(vmem_limit_bytes=vmem_limit),
        cost_estimate=cost,
    )(*flat)

    # drop padded batch rows; time-major -> (B, L, 2)
    return jnp.transpose(out.reshape(L, BP, 2)[:, :B, :], (1, 0, 2))


# ----------------------------------------------------------------------------
# Pure-JAX reference of the torch module (numerics check only).
# ----------------------------------------------------------------------------
def _elu_ref(v):
    return jnp.where(v > 0.0, v, jnp.exp(jnp.minimum(v, 0.0)) - 1.0)


def ref_forward(x_bits, perm, params, *, kernel_size):
    K = kernel_size
    P = K // 2

    def conv_stack(h, layers):                    # h: (B, L, Cin)
        for (w, b) in layers:                     # w: (K, Cin, Cout)
            hp = jnp.pad(h, ((0, 0), (P, P), (0, 0)))
            out = jnp.zeros(h.shape[:2] + (w.shape[2],), jnp.float32) + b
            for k in range(K):
                out = out + jnp.einsum("blc,cd->bld",
                                       hp[:, k:k + h.shape[1], :], w[k])
            h = _elu_ref(out)
        return h

    x = 2.0 * x_bits[..., None].astype(jnp.float32) - 1.0
    h = conv_stack(x, params["cnn1"])
    s = _elu_ref(h @ params["lin1"][0] + params["lin1"][1])
    s = jnp.clip(s, -1.0, 1.0)
    s = s[:, perm, :]
    h = conv_stack(s, params["cnn2"])
    out = _elu_ref(h @ params["lin2"][0] + params["lin2"][1])
    mean = jnp.mean(out)
    std = jnp.std(out, ddof=1)
    return (out - mean) / std


# ----------------------------------------------------------------------------
# Deterministic PyTorch-style parameter init (uniform +-1/sqrt(fan_in)).
# ----------------------------------------------------------------------------
def _uniform(key, shape, fan_in):
    k = 1.0 / math.sqrt(fan_in)
    return jax.random.uniform(key, shape, jnp.float32, -k, k)


def init_conv_stack(key, num_layer, cin, cout, kernel_size):
    layers = []
    for i in range(num_layer):
        c = cin if i == 0 else cout
        key, kw, kb = jax.random.split(key, 3)
        fan_in = c * kernel_size
        w = _uniform(kw, (kernel_size, c, cout), fan_in)   # per-tap layout
        b = _uniform(kb, (1, cout), fan_in)
        layers.append((w, b))
    return layers


def init_linear(key, fin, fout):
    kw, kb = jax.random.split(key)
    return (_uniform(kw, (fin, fout), fin), _uniform(kb, (1, fout), fin))


# ----------------------------------------------------------------------------
if __name__ == "__main__":
    # small config consistent with the module
    batch = 2
    block_len = 16        # config.block_len
    code_rate_k = 1       # config.code_rate_k
    enc_num_layer = 2     # config.enc_num_layer
    enc_num_unit = 32     # config.enc_num_unit
    enc_kernel_size = 5   # config.enc_kernel_size

    key = jax.random.PRNGKey(0)
    k_in, k_perm, k_c1, k_c2, k_l1, k_l2 = jax.random.split(key, 6)

    # binary message bits (B, L) and fixed interleaver permutation
    x_bits = jax.random.bernoulli(
        k_in, 0.5, (batch, block_len)).astype(jnp.float32)
    perm = jax.random.permutation(k_perm, block_len)

    params = {
        "cnn1": init_conv_stack(k_c1, enc_num_layer, code_rate_k,
                                enc_num_unit, enc_kernel_size),
        "cnn2": init_conv_stack(k_c2, enc_num_layer, code_rate_k * 10,
                                enc_num_unit, enc_kernel_size),
        "lin1": init_linear(k_l1, enc_num_unit, 10),
        "lin2": init_linear(k_l2, enc_num_unit, 2),
    }

    codes = enc_forward(x_bits, perm, params,
                        num_layer=enc_num_layer,
                        kernel_size=enc_kernel_size,
                        num_unit=enc_num_unit)
    codes = jax.block_until_ready(codes)
    assert codes.shape == (batch, block_len, 2), codes.shape
    assert bool(jnp.all(jnp.isfinite(codes)))

    ref = ref_forward(x_bits, perm, params, kernel_size=enc_kernel_size)
    max_err = float(jnp.max(jnp.abs(codes - ref)))
    assert max_err < 1e-3, f"max |kernel - reference| = {max_err}"
    print("KERNEL_OK")
</pallas_src>

<mosaic_0001>
module attributes {stable_mosaic.version = 11 : i64} {
  func.func @encoder_kernel(%arg0: memref<16xi32, #tpu.memory_space<smem>>, %arg1: memref<128x1xf32, #tpu.memory_space<vmem>>, %arg2: memref<128x1xf32, #tpu.memory_space<vmem>>, %arg3: memref<5x1x32xf32, #tpu.memory_space<vmem>>, %arg4: memref<1x32xf32, #tpu.memory_space<vmem>>, %arg5: memref<5x32x32xf32, #tpu.memory_space<vmem>>, %arg6: memref<1x32xf32, #tpu.memory_space<vmem>>, %arg7: memref<32x10xf32, #tpu.memory_space<vmem>>, %arg8: memref<1x10xf32, #tpu.memory_space<vmem>>, %arg9: memref<5x10x32xf32, #tpu.memory_space<vmem>>, %arg10: memref<1x32xf32, #tpu.memory_space<vmem>>, %arg11: memref<5x32x32xf32, #tpu.memory_space<vmem>>, %arg12: memref<1x32xf32, #tpu.memory_space<vmem>>, %arg13: memref<32x2xf32, #tpu.memory_space<vmem>>, %arg14: memref<1x2xf32, #tpu.memory_space<vmem>>, %arg15: memref<128x2xf32, #tpu.memory_space<vmem>>, %arg16: memref<160x32xf32, #tpu.memory_space<vmem>>, %arg17: memref<128x10xf32, #tpu.memory_space<vmem>>) attributes {dimension_semantics = [], scalar_prefetch = 0 : i64, scratch_operands = 2 : i64, tpu.core_type = #tpu.core_type<tc>} {
    %cst = arith.constant 0.000000e+00 : f32
    %0 = vector.broadcast %cst : f32 to vector<16x32xf32>
    %c0 = arith.constant 0 : index
    %c0_0 = arith.constant 0 : index
    %1 = vector.load %arg16[%c0, %c0_0] : memref<160x32xf32, #tpu.memory_space<vmem>>, vector<16x32xf32>
    tpu.vector_store %arg16[%c0, %c0_0], %0 {strides = array<i32>} : memref<160x32xf32, #tpu.memory_space<vmem>>, vector<16x32xf32>,
    %c144 = arith.constant 144 : index
    %c0_1 = arith.constant 0 : index
    %2 = vector.load %arg16[%c144, %c0_1] : memref<160x32xf32, #tpu.memory_space<vmem>>, vector<16x32xf32>
    tpu.vector_store %arg16[%c144, %c0_1], %0 {strides = array<i32>} : memref<160x32xf32, #tpu.memory_space<vmem>>, vector<16x32xf32>,
    %c0_2 = arith.constant 0 : index
    %c0_3 = arith.constant 0 : index
    %3 = vector.load %arg1[%c0_2, %c0_3] : memref<128x1xf32, #tpu.memory_space<vmem>>, vector<128x1xf32>
    %cst_4 = arith.constant 2.000000e+00 : f32
    %4 = vector.broadcast %cst_4 : f32 to vector<128x1xf32>
    %5 = arith.mulf %4, %3 : vector<128x1xf32>
    %cst_5 = arith.constant 1.000000e+00 : f32
    %6 = vector.broadcast %cst_5 : f32 to vector<128x1xf32>
    %7 = arith.subf %5, %6 : vector<128x1xf32>
    %c16 = arith.constant 16 : index
    %c0_6 = arith.constant 0 : index
    %8 = vector.load %arg16[%c16, %c0_6] : memref<160x32xf32, #tpu.memory_space<vmem>>, vector<128x1xf32>
    tpu.vector_store %arg16[%c16, %c0_6], %7 {strides = array<i32>} : memref<160x32xf32, #tpu.memory_space<vmem>>, vector<128x1xf32>,
    %cst_7 = arith.constant 0.000000e+00 : f32
    %9 = vector.broadcast %cst_7 : f32 to vector<128x32xf32>
    %c0_8 = arith.constant 0 : index
    %c0_9 = arith.constant 0 : index
    %10 = vector.load %arg4[%c0_8, %c0_9] : memref<1x32xf32, #tpu.memory_space<vmem>>, vector<1x32xf32>
    %11 = vector.broadcast %10 : vector<1x32xf32> to vector<128x32xf32>
    %12 = arith.addf %9, %11 : vector<128x32xf32>
    %c0_10 = arith.constant 0 : index
    %c0_11 = arith.constant 0 : index
    %13 = vector.load %arg16[%c0_10, %c0_11] : memref<160x32xf32, #tpu.memory_space<vmem>>, vector<128x1xf32>
    %c0_12 = arith.constant 0 : index
    %c0_13 = arith.constant 0 : index
    %c0_14 = arith.constant 0 : index
    %14 = vector.load %arg3[%c0_12, %c0_13, %c0_14] : memref<5x1x32xf32, #tpu.memory_space<vmem>>, vector<1x1x32xf32>
    %15 = vector.shape_cast %14 : vector<1x1x32xf32> to vector<1x32xf32>
    %16 = vector.broadcast %13 : vector<128x1xf32> to vector<128x32xf32>
    %17 = vector.broadcast %15 : vector<1x32xf32> to vector<128x32xf32>
    %18 = arith.mulf %16, %17 : vector<128x32xf32>
    %19 = arith.addf %12, %18 : vector<128x32xf32>
    %c8 = arith.constant 8 : index
    %c0_15 = arith.constant 0 : index
    %20 = vector.load %arg16[%c8, %c0_15] : memref<160x32xf32, #tpu.memory_space<vmem>>, vector<128x1xf32>
    %c1 = arith.constant 1 : index
    %c0_16 = arith.constant 0 : index
    %c0_17 = arith.constant 0 : index
    %21 = vector.load %arg3[%c1, %c0_16, %c0_17] : memref<5x1x32xf32, #tpu.memory_space<vmem>>, vector<1x1x32xf32>
    %22 = vector.shape_cast %21 : vector<1x1x32xf32> to vector<1x32xf32>
    %23 = vector.broadcast %20 : vector<128x1xf32> to vector<128x32xf32>
    %24 = vector.broadcast %22 : vector<1x32xf32> to vector<128x32xf32>
    %25 = arith.mulf %23, %24 : vector<128x32xf32>
    %26 = arith.addf %19, %25 : vector<128x32xf32>
    %c16_18 = arith.constant 16 : index
    %c0_19 = arith.constant 0 : index
    %27 = vector.load %arg16[%c16_18, %c0_19] : memref<160x32xf32, #tpu.memory_space<vmem>>, vector<128x1xf32>
    %c2 = arith.constant 2 : index
    %c0_20 = arith.constant 0 : index
    %c0_21 = arith.constant 0 : index
    %28 = vector.load %arg3[%c2, %c0_20, %c0_21] : memref<5x1x32xf32, #tpu.memory_space<vmem>>, vector<1x1x32xf32>
    %29 = vector.shape_cast %28 : vector<1x1x32xf32> to vector<1x32xf32>
    %30 = vector.broadcast %27 : vector<128x1xf32> to vector<128x32xf32>
    %31 = vector.broadcast %29 : vector<1x32xf32> to vector<128x32xf32>
    %32 = arith.mulf %30, %31 : vector<128x32xf32>
    %33 = arith.addf %26, %32 : vector<128x32xf32>
    %c24 = arith.constant 24 : index
    %c0_22 = arith.constant 0 : index
    %34 = vector.load %arg16[%c24, %c0_22] : memref<160x32xf32, #tpu.memory_space<vmem>>, vector<128x1xf32>
    %c3 = arith.constant 3 : index
    %c0_23 = arith.constant 0 : index
    %c0_24 = arith.constant 0 : index
    %35 = vector.load %arg3[%c3, %c0_23, %c0_24] : memref<5x1x32xf32, #tpu.memory_space<vmem>>, vector<1x1x32xf32>
    %36 = vector.shape_cast %35 : vector<1x1x32xf32> to vector<1x32xf32>
    %37 = vector.broadcast %34 : vector<128x1xf32> to vector<128x32xf32>
    %38 = vector.broadcast %36 : vector<1x32xf32> to vector<128x32xf32>
    %39 = arith.mulf %37, %38 : vector<128x32xf32>
    %40 = arith.addf %33, %39 : vector<128x32xf32>
    %c32 = arith.constant 32 : index
    %c0_25 = arith.constant 0 : index
    %41 = vector.load %arg16[%c32, %c0_25] : memref<160x32xf32, #tpu.memory_space<vmem>>, vector<128x1xf32>
    %c4 = arith.constant 4 : index
    %c0_26 = arith.constant 0 : index
    %c0_27 = arith.constant 0 : index
    %42 = vector.load %arg3[%c4, %c0_26, %c0_27] : memref<5x1x32xf32, #tpu.memory_space<vmem>>, vector<1x1x32xf32>
    %43 = vector.shape_cast %42 : vector<1x1x32xf32> to vector<1x32xf32>
    %44 = vector.broadcast %41 : vector<128x1xf32> to vector<128x32xf32>
    %45 = vector.broadcast %43 : vector<1x32xf32> to vector<128x32xf32>
    %46 = arith.mulf %44, %45 : vector<128x32xf32>
    %47 = arith.addf %40, %46 : vector<128x32xf32>
    %cst_28 = arith.constant 0.000000e+00 : f32
    %48 = vector.broadcast %cst_28 : f32 to vector<128x32xf32>
    %49 = arith.cmpf ogt, %47, %48 : vector<128x32xf32>
    %cst_29 = arith.constant 0.000000e+00 : f32
    %50 = vector.broadcast %cst_29 : f32 to vector<128x32xf32>
    %51 = arith.minimumf %47, %50 : vector<128x32xf32>
    %52 = math.exp %51 : vector<128x32xf32>
    %cst_30 = arith.constant 1.000000e+00 : f32
    %53 = vector.broadcast %cst_30 : f32 to vector<128x32xf32>
    %54 = arith.subf %52, %53 : vector<128x32xf32>
    %55 = arith.select %49, %47, %54 : vector<128x32xi1>, vector<128x32xf32>
    %c16_31 = arith.constant 16 : index
    %c0_32 = arith.constant 0 : index
    %56 = vector.load %arg16[%c16_31, %c0_32] : memref<160x32xf32, #tpu.memory_space<vmem>>, vector<128x32xf32>
    tpu.vector_store %arg16[%c16_31, %c0_32], %55 {strides = array<i32>} : memref<160x32xf32, #tpu.memory_space<vmem>>, vector<128x32xf32>,
    %cst_33 = arith.constant 0.000000e+00 : f32
    %57 = vector.broadcast %cst_33 : f32 to vector<128x32xf32>
    %c0_34 = arith.constant 0 : index
    %c0_35 = arith.constant 0 : index
    %58 = vector.load %arg6[%c0_34, %c0_35] : memref<1x32xf32, #tpu.memory_space<vmem>>, vector<1x32xf32>
    %59 = vector.broadcast %58 : vector<1x32xf32> to vector<128x32xf32>
    %60 = arith.addf %57, %59 : vector<128x32xf32>
    %c0_36 = arith.constant 0 : index
    %c0_37 = arith.constant 0 : index
    %61 = vector.load %arg16[%c0_36, %c0_37] : memref<160x32xf32, #tpu.memory_space<vmem>>, vector<128x32xf32>
    %c0_38 = arith.constant 0 : index
    %c0_39 = arith.constant 0 : index
    %c0_40 = arith.constant 0 : index
    %62 = vector.load %arg5[%c0_38, %c0_39, %c0_40] : memref<5x32x32xf32, #tpu.memory_space<vmem>>, vector<1x32x32xf32>
    %63 = vector.shape_cast %62 : vector<1x32x32xf32> to vector<32x32xf32>
    %cst_41 = arith.constant dense<0.000000e+00> : vector<128x32xf32>
    %64 = tpu.matmul %61, %63, %cst_41 {dimension_numbers = #tpu.dot_dimension_numbers<[1], [0], [0], [1], [0, 0, 1, 1], [], []>} : vector<128x32xf32>, vector<32x32xf32>, vector<128x32xf32> -> vector<128x32xf32>
    %65 = arith.addf %60, %64 : vector<128x32xf32>
    %c8_42 = arith.constant 8 : index
    %c0_43 = arith.constant 0 : index
    %66 = vector.load %arg16[%c8_42, %c0_43] : memref<160x32xf32, #tpu.memory_space<vmem>>, vector<128x32xf32>
    %c1_44 = arith.constant 1 : index
    %c0_45 = arith.constant 0 : index
    %c0_46 = arith.constant 0 : index
    %67 = vector.load %arg5[%c1_44, %c0_45, %c0_46] : memref<5x32x32xf32, #tpu.memory_space<vmem>>, vector<1x32x32xf32>
    %68 = vector.shape_cast %67 : vector<1x32x32xf32> to vector<32x32xf32>
    %cst_47 = arith.constant dense<0.000000e+00> : vector<128x32xf32>
    %69 = tpu.matmul %66, %68, %cst_47 {dimension_numbers = #tpu.dot_dimension_numbers<[1], [0], [0], [1], [0, 0, 1, 1], [], []>} : vector<128x32xf32>, vector<32x32xf32>, vector<128x32xf32> -> vector<128x32xf32>
    %70 = arith.addf %65, %69 : vector<128x32xf32>
    %c16_48 = arith.constant 16 : index
    %c0_49 = arith.constant 0 : index
    %71 = vector.load %arg16[%c16_48, %c0_49] : memref<160x32xf32, #tpu.memory_space<vmem>>, vector<128x32xf32>
    %c2_50 = arith.constant 2 : index
    %c0_51 = arith.constant 0 : index
    %c0_52 = arith.constant 0 : index
    %72 = vector.load %arg5[%c2_50, %c0_51, %c0_52] : memref<5x32x32xf32, #tpu.memory_space<vmem>>, vector<1x32x32xf32>
    %73 = vector.shape_cast %72 : vector<1x32x32xf32> to vector<32x32xf32>
    %cst_53 = arith.constant dense<0.000000e+00> : vector<128x32xf32>
    %74 = tpu.matmul %71, %73, %cst_53 {dimension_numbers = #tpu.dot_dimension_numbers<[1], [0], [0], [1], [0, 0, 1, 1], [], []>} : vector<128x32xf32>, vector<32x32xf32>, vector<128x32xf32> -> vector<128x32xf32>
    %75 = arith.addf %70, %74 : vector<128x32xf32>
    %c24_54 = arith.constant 24 : index
    %c0_55 = arith.constant 0 : index
    %76 = vector.load %arg16[%c24_54, %c0_55] : memref<160x32xf32, #tpu.memory_space<vmem>>, vector<128x32xf32>
    %c3_56 = arith.constant 3 : index
    %c0_57 = arith.constant 0 : index
    %c0_58 = arith.constant 0 : index
    %77 = vector.load %arg5[%c3_56, %c0_57, %c0_58] : memref<5x32x32xf32, #tpu.memory_space<vmem>>, vector<1x32x32xf32>
    %78 = vector.shape_cast %77 : vector<1x32x32xf32> to vector<32x32xf32>
    %cst_59 = arith.constant dense<0.000000e+00> : vector<128x32xf32>
    %79 = tpu.matmul %76, %78, %cst_59 {dimension_numbers = #tpu.dot_dimension_numbers<[1], [0], [0], [1], [0, 0, 1, 1], [], []>} : vector<128x32xf32>, vector<32x32xf32>, vector<128x32xf32> -> vector<128x32xf32>
    %80 = arith.addf %75, %79 : vector<128x32xf32>
    %c32_60 = arith.constant 32 : index
    %c0_61 = arith.constant 0 : index
    %81 = vector.load %arg16[%c32_60, %c0_61] : memref<160x32xf32, #tpu.memory_space<vmem>>, vector<128x32xf32>
    %c4_62 = arith.constant 4 : index
    %c0_63 = arith.constant 0 : index
    %c0_64 = arith.constant 0 : index
    %82 = vector.load %arg5[%c4_62, %c0_63, %c0_64] : memref<5x32x32xf32, #tpu.memory_space<vmem>>, vector<1x32x32xf32>
    %83 = vector.shape_cast %82 : vector<1x32x32xf32> to vector<32x32xf32>
    %cst_65 = arith.constant dense<0.000000e+00> : vector<128x32xf32>
    %84 = tpu.matmul %81, %83, %cst_65 {dimension_numbers = #tpu.dot_dimension_numbers<[1], [0], [0], [1], [0, 0, 1, 1], [], []>} : vector<128x32xf32>, vector<32x32xf32>, vector<128x32xf32> -> vector<128x32xf32>
    %85 = arith.addf %80, %84 : vector<128x32xf32>
    %cst_66 = arith.constant 0.000000e+00 : f32
    %86 = vector.broadcast %cst_66 : f32 to vector<128x32xf32>
    %87 = arith.cmpf ogt, %85, %86 : vector<128x32xf32>
    %cst_67 = arith.constant 0.000000e+00 : f32
    %88 = vector.broadcast %cst_67 : f32 to vector<128x32xf32>
    %89 = arith.minimumf %85, %88 : vector<128x32xf32>
    %90 = math.exp %89 : vector<128x32xf32>
    %cst_68 = arith.constant 1.000000e+00 : f32
    %91 = vector.broadcast %cst_68 : f32 to vector<128x32xf32>
    %92 = arith.subf %90, %91 : vector<128x32xf32>
    %93 = arith.select %87, %85, %92 : vector<128x32xi1>, vector<128x32xf32>
    %c0_69 = arith.constant 0 : index
    %c0_70 = arith.constant 0 : index
    %94 = vector.load %arg7[%c0_69, %c0_70] : memref<32x10xf32, #tpu.memory_space<vmem>>, vector<32x10xf32>
    %cst_71 = arith.constant dense<0.000000e+00> : vector<128x10xf32>
    %95 = tpu.matmul %93, %94, %cst_71 {dimension_numbers = #tpu.dot_dimension_numbers<[1], [0], [0], [1], [0, 0, 1, 1], [], []>} : vector<128x32xf32>, vector<32x10xf32>, vector<128x10xf32> -> vector<128x10xf32>
    %c0_72 = arith.constant 0 : index
    %c0_73 = arith.constant 0 : index
    %96 = vector.load %arg8[%c0_72, %c0_73] : memref<1x10xf32, #tpu.memory_space<vmem>>, vector<1x10xf32>
    %97 = vector.broadcast %96 : vector<1x10xf32> to vector<128x10xf32>
    %98 = arith.addf %95, %97 : vector<128x10xf32>
    %cst_74 = arith.constant 0.000000e+00 : f32
    %99 = vector.broadcast %cst_74 : f32 to vector<128x10xf32>
    %100 = arith.cmpf ogt, %98, %99 : vector<128x10xf32>
    %cst_75 = arith.constant 0.000000e+00 : f32
    %101 = vector.broadcast %cst_75 : f32 to vector<128x10xf32>
    %102 = arith.minimumf %98, %101 : vector<128x10xf32>
    %103 = math.exp %102 : vector<128x10xf32>
    %cst_76 = arith.constant 1.000000e+00 : f32
    %104 = vector.broadcast %cst_76 : f32 to vector<128x10xf32>
    %105 = arith.subf %103, %104 : vector<128x10xf32>
    %106 = arith.select %100, %98, %105 : vector<128x10xi1>, vector<128x10xf32>
    %cst_77 = arith.constant -1.000000e+00 : f32
    %cst_78 = arith.constant 1.000000e+00 : f32
    %107 = vector.broadcast %cst_77 : f32 to vector<128x10xf32>
    %108 = arith.maximumf %107, %106 : vector<128x10xf32>
    %109 = vector.broadcast %cst_78 : f32 to vector<128x10xf32>
    %110 = arith.minimumf %109, %108 : vector<128x10xf32>
    %c0_79 = arith.constant 0 : index
    %c0_80 = arith.constant 0 : index
    %111 = vector.load %arg17[%c0_79, %c0_80] : memref<128x10xf32, #tpu.memory_space<vmem>>, vector<128x10xf32>
    tpu.vector_store %arg17[%c0_79, %c0_80], %110 {strides = array<i32>} : memref<128x10xf32, #tpu.memory_space<vmem>>, vector<128x10xf32>,
    %c0_i32 = arith.constant 0 : i32
    %c16_i32 = arith.constant 16 : i32
    %112 = arith.addi %c0_i32, %c16_i32 : i32
    %c1_i32 = arith.constant 1 : i32
    scf.for %arg18 = %c0_i32 to %112 step %c1_i32  : i32 {
      %225 = arith.index_cast %arg18 : i32 to index
      %226 = memref.load %arg0[%225] : memref<16xi32, #tpu.memory_space<smem>>
      %c8_i32 = arith.constant 8 : i32
      %227 = arith.muli %226, %c8_i32 : i32
      %228 = tpu.assume_multiple %227, 8 : i32
      %c8_i32_174 = arith.constant 8 : i32
      %229 = arith.muli %arg18, %c8_i32_174 : i32
      %c16_i32_175 = arith.constant 16 : i32
      %230 = arith.addi %c16_i32_175, %229 : i32
      %231 = tpu.assume_multiple %230, 8 : i32
      %232 = arith.index_cast %228 : i32 to index
      %c0_176 = arith.constant 0 : index
      %233 = vector.load %arg17[%232, %c0_176] : memref<128x10xf32, #tpu.memory_space<vmem>>, vector<8x10xf32>
      %234 = arith.index_cast %231 : i32 to index
      %c0_177 = arith.constant 0 : index
      %235 = vector.load %arg16[%234, %c0_177] : memref<160x32xf32, #tpu.memory_space<vmem>>, vector<8x10xf32>
      tpu.vector_store %arg16[%234, %c0_177], %233 {strides = array<i32>} : memref<160x32xf32, #tpu.memory_space<vmem>>, vector<8x10xf32>,
    }
    %c16_i32_81 = arith.constant 16 : i32
    %cst_82 = arith.constant 0.000000e+00 : f32
    %113 = vector.broadcast %cst_82 : f32 to vector<128x32xf32>
    %c0_83 = arith.constant 0 : index
    %c0_84 = arith.constant 0 : index
    %114 = vector.load %arg10[%c0_83, %c0_84] : memref<1x32xf32, #tpu.memory_space<vmem>>, vector<1x32xf32>
    %115 = vector.broadcast %114 : vector<1x32xf32> to vector<128x32xf32>
    %116 = arith.addf %113, %115 : vector<128x32xf32>
    %c0_85 = arith.constant 0 : index
    %c0_86 = arith.constant 0 : index
    %117 = vector.load %arg16[%c0_85, %c0_86] : memref<160x32xf32, #tpu.memory_space<vmem>>, vector<128x10xf32>
    %c0_87 = arith.constant 0 : index
    %c0_88 = arith.constant 0 : index
    %c0_89 = arith.constant 0 : index
    %118 = vector.load %arg9[%c0_87, %c0_88, %c0_89] : memref<5x10x32xf32, #tpu.memory_space<vmem>>, vector<1x10x32xf32>
    %119 = vector.shape_cast %118 : vector<1x10x32xf32> to vector<10x32xf32>
    %cst_90 = arith.constant dense<0.000000e+00> : vector<128x32xf32>
    %120 = tpu.matmul %117, %119, %cst_90 {dimension_numbers = #tpu.dot_dimension_numbers<[1], [0], [0], [1], [0, 0, 1, 1], [], []>} : vector<128x10xf32>, vector<10x32xf32>, vector<128x32xf32> -> vector<128x32xf32>
    %121 = arith.addf %116, %120 : vector<128x32xf32>
    %c8_91 = arith.constant 8 : index
    %c0_92 = arith.constant 0 : index
    %122 = vector.load %arg16[%c8_91, %c0_92] : memref<160x32xf32, #tpu.memory_space<vmem>>, vector<128x10xf32>
    %c1_93 = arith.constant 1 : index
    %c0_94 = arith.constant 0 : index
    %c0_95 = arith.constant 0 : index
    %123 = vector.load %arg9[%c1_93, %c0_94, %c0_95] : memref<5x10x32xf32, #tpu.memory_space<vmem>>, vector<1x10x32xf32>
    %124 = vector.shape_cast %123 : vector<1x10x32xf32> to vector<10x32xf32>
    %cst_96 = arith.constant dense<0.000000e+00> : vector<128x32xf32>
    %125 = tpu.matmul %122, %124, %cst_96 {dimension_numbers = #tpu.dot_dimension_numbers<[1], [0], [0], [1], [0, 0, 1, 1], [], []>} : vector<128x10xf32>, vector<10x32xf32>, vector<128x32xf32> -> vector<128x32xf32>
    %126 = arith.addf %121, %125 : vector<128x32xf32>
    %c16_97 = arith.constant 16 : index
    %c0_98 = arith.constant 0 : index
    %127 = vector.load %arg16[%c16_97, %c0_98] : memref<160x32xf32, #tpu.memory_space<vmem>>, vector<128x10xf32>
    %c2_99 = arith.constant 2 : index
    %c0_100 = arith.constant 0 : index
    %c0_101 = arith.constant 0 : index
    %128 = vector.load %arg9[%c2_99, %c0_100, %c0_101] : memref<5x10x32xf32, #tpu.memory_space<vmem>>, vector<1x10x32xf32>
    %129 = vector.shape_cast %128 : vector<1x10x32xf32> to vector<10x32xf32>
    %cst_102 = arith.constant dense<0.000000e+00> : vector<128x32xf32>
    %130 = tpu.matmul %127, %129, %cst_102 {dimension_numbers = #tpu.dot_dimension_numbers<[1], [0], [0], [1], [0, 0, 1, 1], [], []>} : vector<128x10xf32>, vector<10x32xf32>, vector<128x32xf32> -> vector<128x32xf32>
    %131 = arith.addf %126, %130 : vector<128x32xf32>
    %c24_103 = arith.constant 24 : index
    %c0_104 = arith.constant 0 : index
    %132 = vector.load %arg16[%c24_103, %c0_104] : memref<160x32xf32, #tpu.memory_space<vmem>>, vector<128x10xf32>
    %c3_105 = arith.constant 3 : index
    %c0_106 = arith.constant 0 : index
    %c0_107 = arith.constant 0 : index
    %133 = vector.load %arg9[%c3_105, %c0_106, %c0_107] : memref<5x10x32xf32, #tpu.memory_space<vmem>>, vector<1x10x32xf32>
    %134 = vector.shape_cast %133 : vector<1x10x32xf32> to vector<10x32xf32>
    %cst_108 = arith.constant dense<0.000000e+00> : vector<128x32xf32>
    %135 = tpu.matmul %132, %134, %cst_108 {dimension_numbers = #tpu.dot_dimension_numbers<[1], [0], [0], [1], [0, 0, 1, 1], [], []>} : vector<128x10xf32>, vector<10x32xf32>, vector<128x32xf32> -> vector<128x32xf32>
    %136 = arith.addf %131, %135 : vector<128x32xf32>
    %c32_109 = arith.constant 32 : index
    %c0_110 = arith.constant 0 : index
    %137 = vector.load %arg16[%c32_109, %c0_110] : memref<160x32xf32, #tpu.memory_space<vmem>>, vector<128x10xf32>
    %c4_111 = arith.constant 4 : index
    %c0_112 = arith.constant 0 : index
    %c0_113 = arith.constant 0 : index
    %138 = vector.load %arg9[%c4_111, %c0_112, %c0_113] : memref<5x10x32xf32, #tpu.memory_space<vmem>>, vector<1x10x32xf32>
    %139 = vector.shape_cast %138 : vector<1x10x32xf32> to vector<10x32xf32>
    %cst_114 = arith.constant dense<0.000000e+00> : vector<128x32xf32>
    %140 = tpu.matmul %137, %139, %cst_114 {dimension_numbers = #tpu.dot_dimension_numbers<[1], [0], [0], [1], [0, 0, 1, 1], [], []>} : vector<128x10xf32>, vector<10x32xf32>, vector<128x32xf32> -> vector<128x32xf32>
    %141 = arith.addf %136, %140 : vector<128x32xf32>
    %cst_115 = arith.constant 0.000000e+00 : f32
    %142 = vector.broadcast %cst_115 : f32 to vector<128x32xf32>
    %143 = arith.cmpf ogt, %141, %142 : vector<128x32xf32>
    %cst_116 = arith.constant 0.000000e+00 : f32
    %144 = vector.broadcast %cst_116 : f32 to vector<128x32xf32>
    %145 = arith.minimumf %141, %144 : vector<128x32xf32>
    %146 = math.exp %145 : vector<128x32xf32>
    %cst_117 = arith.constant 1.000000e+00 : f32
    %147 = vector.broadcast %cst_117 : f32 to vector<128x32xf32>
    %148 = arith.subf %146, %147 : vector<128x32xf32>
    %149 = arith.select %143, %141, %148 : vector<128x32xi1>, vector<128x32xf32>
    %c16_118 = arith.constant 16 : index
    %c0_119 = arith.constant 0 : index
    %150 = vector.load %arg16[%c16_118, %c0_119] : memref<160x32xf32, #tpu.memory_space<vmem>>, vector<128x32xf32>
    tpu.vector_store %arg16[%c16_118, %c0_119], %149 {strides = array<i32>} : memref<160x32xf32, #tpu.memory_space<vmem>>, vector<128x32xf32>,
    %cst_120 = arith.constant 0.000000e+00 : f32
    %151 = vector.broadcast %cst_120 : f32 to vector<128x32xf32>
    %c0_121 = arith.constant 0 : index
    %c0_122 = arith.constant 0 : index
    %152 = vector.load %arg12[%c0_121, %c0_122] : memref<1x32xf32, #tpu.memory_space<vmem>>, vector<1x32xf32>
    %153 = vector.broadcast %152 : vector<1x32xf32> to vector<128x32xf32>
    %154 = arith.addf %151, %153 : vector<128x32xf32>
    %c0_123 = arith.constant 0 : index
    %c0_124 = arith.constant 0 : index
    %155 = vector.load %arg16[%c0_123, %c0_124] : memref<160x32xf32, #tpu.memory_space<vmem>>, vector<128x32xf32>
    %c0_125 = arith.constant 0 : index
    %c0_126 = arith.constant 0 : index
    %c0_127 = arith.constant 0 : index
    %156 = vector.load %arg11[%c0_125, %c0_126, %c0_127] : memref<5x32x32xf32, #tpu.memory_space<vmem>>, vector<1x32x32xf32>
    %157 = vector.shape_cast %156 : vector<1x32x32xf32> to vector<32x32xf32>
    %cst_128 = arith.constant dense<0.000000e+00> : vector<128x32xf32>
    %158 = tpu.matmul %155, %157, %cst_128 {dimension_numbers = #tpu.dot_dimension_numbers<[1], [0], [0], [1], [0, 0, 1, 1], [], []>} : vector<128x32xf32>, vector<32x32xf32>, vector<128x32xf32> -> vector<128x32xf32>
    %159 = arith.addf %154, %158 : vector<128x32xf32>
    %c8_129 = arith.constant 8 : index
    %c0_130 = arith.constant 0 : index
    %160 = vector.load %arg16[%c8_129, %c0_130] : memref<160x32xf32, #tpu.memory_space<vmem>>, vector<128x32xf32>
    %c1_131 = arith.constant 1 : index
    %c0_132 = arith.constant 0 : index
    %c0_133 = arith.constant 0 : index
    %161 = vector.load %arg11[%c1_131, %c0_132, %c0_133] : memref<5x32x32xf32, #tpu.memory_space<vmem>>, vector<1x32x32xf32>
    %162 = vector.shape_cast %161 : vector<1x32x32xf32> to vector<32x32xf32>
    %cst_134 = arith.constant dense<0.000000e+00> : vector<128x32xf32>
    %163 = tpu.matmul %160, %162, %cst_134 {dimension_numbers = #tpu.dot_dimension_numbers<[1], [0], [0], [1], [0, 0, 1, 1], [], []>} : vector<128x32xf32>, vector<32x32xf32>, vector<128x32xf32> -> vector<128x32xf32>
    %164 = arith.addf %159, %163 : vector<128x32xf32>
    %c16_135 = arith.constant 16 : index
    %c0_136 = arith.constant 0 : index
    %165 = vector.load %arg16[%c16_135, %c0_136] : memref<160x32xf32, #tpu.memory_space<vmem>>, vector<128x32xf32>
    %c2_137 = arith.constant 2 : index
    %c0_138 = arith.constant 0 : index
    %c0_139 = arith.constant 0 : index
    %166 = vector.load %arg11[%c2_137, %c0_138, %c0_139] : memref<5x32x32xf32, #tpu.memory_space<vmem>>, vector<1x32x32xf32>
    %167 = vector.shape_cast %166 : vector<1x32x32xf32> to vector<32x32xf32>
    %cst_140 = arith.constant dense<0.000000e+00> : vector<128x32xf32>
    %168 = tpu.matmul %165, %167, %cst_140 {dimension_numbers = #tpu.dot_dimension_numbers<[1], [0], [0], [1], [0, 0, 1, 1], [], []>} : vector<128x32xf32>, vector<32x32xf32>, vector<128x32xf32> -> vector<128x32xf32>
    %169 = arith.addf %164, %168 : vector<128x32xf32>
    %c24_141 = arith.constant 24 : index
    %c0_142 = arith.constant 0 : index
    %170 = vector.load %arg16[%c24_141, %c0_142] : memref<160x32xf32, #tpu.memory_space<vmem>>, vector<128x32xf32>
    %c3_143 = arith.constant 3 : index
    %c0_144 = arith.constant 0 : index
    %c0_145 = arith.constant 0 : index
    %171 = vector.load %arg11[%c3_143, %c0_144, %c0_145] : memref<5x32x32xf32, #tpu.memory_space<vmem>>, vector<1x32x32xf32>
    %172 = vector.shape_cast %171 : vector<1x32x32xf32> to vector<32x32xf32>
    %cst_146 = arith.constant dense<0.000000e+00> : vector<128x32xf32>
    %173 = tpu.matmul %170, %172, %cst_146 {dimension_numbers = #tpu.dot_dimension_numbers<[1], [0], [0], [1], [0, 0, 1, 1], [], []>} : vector<128x32xf32>, vector<32x32xf32>, vector<128x32xf32> -> vector<128x32xf32>
    %174 = arith.addf %169, %173 : vector<128x32xf32>
    %c32_147 = arith.constant 32 : index
    %c0_148 = arith.constant 0 : index
    %175 = vector.load %arg16[%c32_147, %c0_148] : memref<160x32xf32, #tpu.memory_space<vmem>>, vector<128x32xf32>
    %c4_149 = arith.constant 4 : index
    %c0_150 = arith.constant 0 : index
    %c0_151 = arith.constant 0 : index
    %176 = vector.load %arg11[%c4_149, %c0_150, %c0_151] : memref<5x32x32xf32, #tpu.memory_space<vmem>>, vector<1x32x32xf32>
    %177 = vector.shape_cast %176 : vector<1x32x32xf32> to vector<32x32xf32>
    %cst_152 = arith.constant dense<0.000000e+00> : vector<128x32xf32>
    %178 = tpu.matmul %175, %177, %cst_152 {dimension_numbers = #tpu.dot_dimension_numbers<[1], [0], [0], [1], [0, 0, 1, 1], [], []>} : vector<128x32xf32>, vector<32x32xf32>, vector<128x32xf32> -> vector<128x32xf32>
    %179 = arith.addf %174, %178 : vector<128x32xf32>
    %cst_153 = arith.constant 0.000000e+00 : f32
    %180 = vector.broadcast %cst_153 : f32 to vector<128x32xf32>
    %181 = arith.cmpf ogt, %179, %180 : vector<128x32xf32>
    %cst_154 = arith.constant 0.000000e+00 : f32
    %182 = vector.broadcast %cst_154 : f32 to vector<128x32xf32>
    %183 = arith.minimumf %179, %182 : vector<128x32xf32>
    %184 = math.exp %183 : vector<128x32xf32>
    %cst_155 = arith.constant 1.000000e+00 : f32
    %185 = vector.broadcast %cst_155 : f32 to vector<128x32xf32>
    %186 = arith.subf %184, %185 : vector<128x32xf32>
    %187 = arith.select %181, %179, %186 : vector<128x32xi1>, vector<128x32xf32>
    %c0_156 = arith.constant 0 : index
    %c0_157 = arith.constant 0 : index
    %188 = vector.load %arg13[%c0_156, %c0_157] : memref<32x2xf32, #tpu.memory_space<vmem>>, vector<32x2xf32>
    %cst_158 = arith.constant dense<0.000000e+00> : vector<128x2xf32>
    %189 = tpu.matmul %187, %188, %cst_158 {dimension_numbers = #tpu.dot_dimension_numbers<[1], [0], [0], [1], [0, 0, 1, 1], [], []>} : vector<128x32xf32>, vector<32x2xf32>, vector<128x2xf32> -> vector<128x2xf32>
    %c0_159 = arith.constant 0 : index
    %c0_160 = arith.constant 0 : index
    %190 = vector.load %arg14[%c0_159, %c0_160] : memref<1x2xf32, #tpu.memory_space<vmem>>, vector<1x2xf32>
    %191 = vector.broadcast %190 : vector<1x2xf32> to vector<128x2xf32>
    %192 = arith.addf %189, %191 : vector<128x2xf32>
    %cst_161 = arith.constant 0.000000e+00 : f32
    %193 = vector.broadcast %cst_161 : f32 to vector<128x2xf32>
    %194 = arith.cmpf ogt, %192, %193 : vector<128x2xf32>
    %cst_162 = arith.constant 0.000000e+00 : f32
    %195 = vector.broadcast %cst_162 : f32 to vector<128x2xf32>
    %196 = arith.minimumf %192, %195 : vector<128x2xf32>
    %197 = math.exp %196 : vector<128x2xf32>
    %cst_163 = arith.constant 1.000000e+00 : f32
    %198 = vector.broadcast %cst_163 : f32 to vector<128x2xf32>
    %199 = arith.subf %197, %198 : vector<128x2xf32>
    %200 = arith.select %194, %192, %199 : vector<128x2xi1>, vector<128x2xf32>
    %c0_164 = arith.constant 0 : index
    %c0_165 = arith.constant 0 : index
    %201 = vector.load %arg2[%c0_164, %c0_165] : memref<128x1xf32, #tpu.memory_space<vmem>>, vector<128x1xf32>
    %202 = vector.broadcast %201 : vector<128x1xf32> to vector<128x2xf32>
    %203 = arith.mulf %200, %202 : vector<128x2xf32>
    %cst_166 = arith.constant dense<0.000000e+00> : vector<128xf32>
    %204 = vector.multi_reduction <add>, %203, %cst_166 [1] : vector<128x2xf32> to vector<128xf32>
    %205 = vector.shape_cast %204 : vector<128xf32> to vector<128x1xf32>
    %cst_167 = arith.constant dense<0.000000e+00> : vector<1xf32>
    %206 = vector.multi_reduction <add>, %205, %cst_167 [0] : vector<128x1xf32> to vector<1xf32>
    %207 = vector.shape_cast %206 : vector<1xf32> to vector<1x1xf32>
    %cst_168 = arith.constant 6.400000e+01 : f32
    %208 = vector.broadcast %cst_168 : f32 to vector<1x1xf32>
    %209 = arith.divf %207, %208 : vector<1x1xf32>
    %210 = vector.broadcast %209 : vector<1x1xf32> to vector<128x2xf32>
    %211 = arith.subf %200, %210 : vector<128x2xf32>
    %212 = vector.broadcast %201 : vector<128x1xf32> to vector<128x2xf32>
    %213 = arith.mulf %211, %212 : vector<128x2xf32>
    %214 = arith.mulf %213, %213 : vector<128x2xf32>
    %cst_169 = arith.constant dense<0.000000e+00> : vector<128xf32>
    %215 = vector.multi_reduction <add>, %214, %cst_169 [1] : vector<128x2xf32> to vector<128xf32>
    %216 = vector.shape_cast %215 : vector<128xf32> to vector<128x1xf32>
    %cst_170 = arith.constant dense<0.000000e+00> : vector<1xf32>
    %217 = vector.multi_reduction <add>, %216, %cst_170 [0] : vector<128x1xf32> to vector<1xf32>
    %218 = vector.shape_cast %217 : vector<1xf32> to vector<1x1xf32>
    %cst_171 = arith.constant 6.300000e+01 : f32
    %219 = vector.broadcast %cst_171 : f32 to vector<1x1xf32>
    %220 = arith.divf %218, %219 : vector<1x1xf32>
    %221 = math.rsqrt %220 : vector<1x1xf32>
    %222 = vector.broadcast %221 : vector<1x1xf32> to vector<128x2xf32>
    %223 = arith.mulf %211, %222 : vector<128x2xf32>
    %c0_172 = arith.constant 0 : index
    %c0_173 = arith.constant 0 : index
    %224 = vector.load %arg15[%c0_172, %c0_173] : memref<128x2xf32, #tpu.memory_space<vmem>>, vector<128x2xf32>
    tpu.vector_store %arg15[%c0_172, %c0_173], %223 {strides = array<i32>} : memref<128x2xf32, #tpu.memory_space<vmem>>, vector<128x2xf32>,
    return
  }
}

</mosaic_0001>

<bundles_post_ra>
// kernel: enc_forward.1
= control target key start
LH: loop header
LB: loop body
LE: loop exit
PB: predicated region body
PF: predicated region fallthrough
CT: control target
= control target key end

     0   :  { %20 = vsyncpa [#allocation5], 0  ;;  %s9621_s0 = inlined_call_operand.vmem [shape: s32[16], index: 0, kind: input, shape index: {}]   ;;  %s9622_s1 = inlined_call_operand.vmem [shape: f32[128,1], index: 1, kind: input, shape index: {}]   ;;  %s9623_s2 = inlined_call_operand.vmem [shape: f32[128,1], index: 2, kind: input, shape index: {}]   ;;  %s9624_s3 = inlined_call_operand.vmem [shape: f32[5,1,32], index: 3, kind: input, shape index: {}]   ;;  %s9625_s4 = inlined_call_operand.vmem [shape: f32[1,32], index: 4, kind: input, shape index: {}]   ;;  %s9626_s5 = inlined_call_operand.vmem [shape: f32[5,32,32], index: 5, kind: input, shape index: {}]   ;;  %s9627_s6 = inlined_call_operand.vmem [shape: f32[1,32], index: 6, kind: input, shape index: {}]   ;;  %s9628_s7 = inlined_call_operand.vmem [shape: f32[32,10], index: 7, kind: input, shape index: {}]   ;;  %s9629_s8 = inlined_call_operand.vmem [shape: f32[1,10], index: 8, kind: input, shape index: {}]   ;;  %s9630_s9 = inlined_call_operand.vmem [shape: f32[5,10,32], index: 9, kind: input, shape index: {}]   ;;  %s9631_s10 = inlined_call_operand.vmem [shape: f32[1,32], index: 10, kind: input, shape index: {}]   ;;  %s9632_s11 = inlined_call_operand.vmem [shape: f32[5,32,32], index: 11, kind: input, shape index: {}]   ;;  %s9633_s12 = inlined_call_operand.vmem [shape: f32[1,32], index: 12, kind: input, shape index: {}]   ;;  %s9634_s13 = inlined_call_operand.vmem [shape: f32[32,2], index: 13, kind: input, shape index: {}]   ;;  %s9635_s14 = inlined_call_operand.vmem [shape: f32[1,2], index: 14, kind: input, shape index: {}]   ;;  %s9636_s15 = inlined_call_operand.vmem [shape: f32[128,2], index: 15, kind: output, shape index: {}]  }
   0x1   :  { %s27_s20 = sshll.u32 %s9621_s0, 4  ;;  %s28_s20 = int_to_ptr.vmem [resolvable:$true] %s27_s20 }
   0x2   :  { %s7624_s21 = scalar_lea.vmem %s28_s20, 16  ;;  %p7629_p1 = scmp.lt.s32.totalorder %s28_s20, %s28_s20 }
   0x3   :  { %p7625_p0 = scmp.ne.s32.totalorder %s28_s20, %s7624_s21  ;;  %p7630_p2 = scmp.lt.s32.totalorder %s7624_s21, %s7624_s21 }
   0x5   :  { %p7631_p3 = por %p7630_p2, %p7629_p1 }
   0x7   :  { %p7632_p4 = pnand %p7631_p3, %p7625_p0 }
   0x9   :  { %7635 = shalt.err (!%p7632_p4)
}
   0xa   :  { %s7646_s22 = smov [#allocation4]  }
   0xb   :  { %30 = dma.vmem_to_smem %s28_s20, 16, %s7646_s22, [#allocation5]  }
   0xc   :  { %7640 = dma.done.wait [#allocation5], 16  }
   0xd   :  { %7641 = vsyncadd [#allocation5], 4294967280 }
   0xe   :  { %62 = sfence }
   0xf   :  { %vm63_vm0 = vcmask 261120   ;;  %v68_v0 = vld [vmem:[%s9622_s1] sm:$0xff]  ;;  %v69_v1 = vld [vmem:[%s9622_s1 + $0x8] sm:$0xff]  ;;  %v7647_v2 = vmov 0   ;;  %v7648_v3 = vmov 0.0   ;;  %vm116_vm1 = vcmask 7168  }
  0x10   :  { %7427 = vset.pattern.permute.xlu1 %v7647_v2  ;;  %7426 = vset.pattern.permute.xlu0 %v7647_v2  ;;  %65 = vst.msk [vmem:[#allocation2 + $0x8] sm:$0xff] %vm63_vm0, %v7648_v3  ;;  %64 = vst.msk [vmem:[#allocation2] sm:$0xff] %vm63_vm0, %v7648_v3  ;;  %v84_v4 = vmul.f32 2.0, %v68_v0  ;;  %v85_v5 = vmul.f32 2.0, %v69_v1  ;;  %v70_v6 = vld [vmem:[%s9622_s1 + $0x10] sm:$0xff]  ;;  %v71_v7 = vld [vmem:[%s9622_s1 + $0x18] sm:$0xff] }
  0x11   :  { %66 = vst.msk [vmem:[#allocation2 + $0x90] sm:$0xff] %vm63_vm0, %v7648_v3  ;;  %67 = vst.msk [vmem:[#allocation2 + $0x98] sm:$0xff] %vm63_vm0, %v7648_v3  ;;  %v72_v8 = vld [vmem:[%s9622_s1 + $0x20] sm:$0xff]  ;;  %v86_v9 = vmul.f32 2.0, %v70_v6  ;;  %v87_v10 = vmul.f32 2.0, %v71_v7  ;;  %v73_v12 = vld [vmem:[%s9622_s1 + $0x28] sm:$0xff] }
  0x12   :  { %v88_v11 = vmul.f32 2.0, %v72_v8  ;;  %v74_v13 = vld [vmem:[%s9622_s1 + $0x30] sm:$0xff]  ;;  %v75_v14 = vld [vmem:[%s9622_s1 + $0x38] sm:$0xff]  ;;  %v5727_v15 = vadd.f32 -1.0, %v84_v4  ;;  %v5728_v16 = vadd.f32 -1.0, %v85_v5  ;;  %v89_v17 = vmul.f32 2.0, %v73_v12 }
  0x13   :  { %v90_v18 = vmul.f32 2.0, %v74_v13  ;;  %v76_v19 = vld [vmem:[%s9622_s1 + $0x40] sm:$0xff]  ;;  %v77_v20 = vld [vmem:[%s9622_s1 + $0x48] sm:$0xff]  ;;  %v5729_v21 = vadd.f32 -1.0, %v86_v9  ;;  %v5730_v22 = vadd.f32 -1.0, %v87_v10  ;;  %v91_v24 = vmul.f32 2.0, %v75_v14 }
  0x14   :  { %v5731_v23 = vadd.f32 -1.0, %v88_v11  ;;  %v78_v25 = vld [vmem:[%s9622_s1 + $0x50] sm:$0xff]  ;;  %v79_v26 = vld [vmem:[%s9622_s1 + $0x58] sm:$0xff]  ;;  %117 = vst.msk [vmem:[#allocation2 + $0x10] sm:$0xff] %vm116_vm1, %v5727_v15  ;;  %118 = vst.msk [vmem:[#allocation2 + $0x18] sm:$0xff] %vm116_vm1, %v5728_v16  ;;  %v5732_v27 = vadd.f32 -1.0, %v89_v17 }
  0x15   :  { %v5733_v28 = vadd.f32 -1.0, %v90_v18  ;;  %v92_v29 = vmul.f32 2.0, %v76_v19  ;;  %v93_v30 = vmul.f32 2.0, %v77_v20  ;;  %v80_v31 = vld [vmem:[%s9622_s1 + $0x60] sm:$0xff]  ;;  %v81_v32 = vld [vmem:[%s9622_s1 + $0x68] sm:$0xff]  ;;  %119 = vst.msk [vmem:[#allocation2 + $0x20] sm:$0xff] %vm116_vm1, %v5729_v21 }
  0x16   :  { %120 = vst.msk [vmem:[#allocation2 + $0x28] sm:$0xff] %vm116_vm1, %v5730_v22  ;;  %121 = vst.msk [vmem:[#allocation2 + $0x30] sm:$0xff] %vm116_vm1, %v5731_v23  ;;  %v5734_v33 = vadd.f32 -1.0, %v91_v24  ;;  %v94_v34 = vmul.f32 2.0, %v78_v25  ;;  %v95_v35 = vmul.f32 2.0, %v79_v26  ;;  %v96_v36 = vmul.f32 2.0, %v80_v31 }
  0x17   :  { %122 = vst.msk [vmem:[#allocation2 + $0x38] sm:$0xff] %vm116_vm1, %v5732_v27  ;;  %123 = vst.msk [vmem:[#allocation2 + $0x40] sm:$0xff] %vm116_vm1, %v5733_v28  ;;  %v5735_v37 = vadd.f32 -1.0, %v92_v29  ;;  %v5736_v38 = vadd.f32 -1.0, %v93_v30  ;;  %v97_v39 = vmul.f32 2.0, %v81_v32  ;;  %v7788_v40 = vld [vmem:[#allocation2 + $0x8] sm:$0xff] }
  0x18   :  { %v141_v41 = vld [vmem:[#allocation2] sm:$0xff]  ;;  %124 = vst.msk [vmem:[#allocation2 + $0x48] sm:$0xff] %vm116_vm1, %v5734_v33  ;;  %v5737_v42 = vadd.f32 -1.0, %v94_v34  ;;  %v5738_v43 = vadd.f32 -1.0, %v95_v35  ;;  %v5739_v44 = vadd.f32 -1.0, %v96_v36  ;;  %v82_v45 = vld [vmem:[%s9622_s1 + $0x70] sm:$0xff]  ;;  %165 = vperm.xlu1 %7427, %v7788_v40   ;;  %6560 = vmatprep.mubr.msk.f32.mxu0 %vm63_vm0, %v7788_v40 }
  0x19   :  { %160 = vperm.xlu0 %7426, %v141_v41   ;;  %125 = vst.msk [vmem:[#allocation2 + $0x50] sm:$0xff] %vm116_vm1, %v5735_v37  ;;  %126 = vst.msk [vmem:[#allocation2 + $0x58] sm:$0xff] %vm116_vm1, %v5736_v38  ;;  %v5740_v46 = vadd.f32 -1.0, %v97_v39  ;;  %v98_v47 = vmul.f32 2.0, %v82_v45  ;;  %6528 = vmatprep.mubr.msk.f32.mxu1 %vm63_vm0, %v141_v41  ;;  %v83_v51 = vld [vmem:[%s9622_s1 + $0x78] sm:$0xff]  ;;  %v956_v57 = vld [vmem:[%s9626_s5] sm:$0xff] }
  0x1a   :  { %127 = vst.msk [vmem:[#allocation2 + $0x60] sm:$0xff] %vm116_vm1, %v5737_v42  ;;  %128 = vst.msk [vmem:[#allocation2 + $0x68] sm:$0xff] %vm116_vm1, %v5738_v43  ;;  %v99_v52 = vmul.f32 2.0, %v83_v51  ;;  %v957_v58 = vld [vmem:[%s9626_s5 + $0x8] sm:$0xff]  ;;  %v5786_v60 = vld [vmem:[%s9626_s5 + $0x20] sm:$0xff] }
  0x1b   :  { %129 = vst.msk [vmem:[#allocation2 + $0x70] sm:$0xff] %vm116_vm1, %v5739_v44  ;;  %130 = vst.msk [vmem:[#allocation2 + $0x78] sm:$0xff] %vm116_vm1, %v5740_v46  ;;  %v5741_v48 = vadd.f32 -1.0, %v98_v47  ;;  %v143_v49 = vld [vmem:[#allocation2 + $0x10] sm:$0xff]  ;;  %v548_v50 = vld [vmem:[#allocation2 + $0x18] sm:$0xff]  ;;  %v7044_v59 = vpack.c.bf16 %v957_v58, %v956_v57 }
  0x1c   :  { %170 = vperm.xlu1 %7427, %v143_v49   ;;  %v5742_v53 = vadd.f32 -1.0, %v99_v52  ;;  %v414_v54 = vld [vmem:[#allocation2 + $0x20] sm:$0xff]  ;;  %v5787_v61 = vld [vmem:[%s9626_s5 + $0x28] sm:$0xff]  ;;  %v958_v0 = vld [vmem:[%s9626_s5 + $0x10] sm:$0xff] }
  0x1d   :  { %296 = vperm.xlu0 %7426, %v7788_v40   ;;  %131 = vst.msk [vmem:[#allocation2 + $0x80] sm:$0xff] %vm116_vm1, %v5741_v48  ;;  %v280_v55 = vld [vmem:[#allocation2 + $0x28] sm:$0xff]  ;;  %v416_v56 = vld [vmem:[#allocation2 + $0x30] sm:$0xff]  ;;  %v7052_v62 = vpack.c.bf16 %v5787_v61, %v5786_v60  ;;  %7045 = vmatprep.subr.bf16.mxu1 %v7044_v59  ;;  %v959_v1 = vld [vmem:[%s9626_s5 + $0x18] sm:$0xff] }
  0x1e   :  { %132 = vst.msk [vmem:[#allocation2 + $0x88] sm:$0xff] %vm116_vm1, %v5742_v53  ;;  %v282_v63 = vld [vmem:[#allocation2 + $0x38] sm:$0xff]  ;;  %7047 = vmatpush3.bf16.msra.mxu1 %v7044_v59  ;;  %v7048_v3 = vpack.c.bf16 %v959_v1, %v958_v0  ;;  %v5788_v4 = vld [vmem:[%s9626_s5 + $0x30] sm:$0xff]  ;;  %v418_v7 = vld [vmem:[#allocation2 + $0x40] sm:$0xff] }
  0x1f   :  { %7053 = vmatprep.subr.bf16.mxu0 %v7052_v62  ;;  %v5789_v5 = vld [vmem:[%s9626_s5 + $0x38] sm:$0xff]  ;;  %v689_v8 = vld [vmem:[#allocation2 + $0x48] sm:$0xff]  ;;  %v5806_v11 = vld [vmem:[%s9626_s5 + $0x40] sm:$0xff] }
  0x20   :  { %301 = vperm.xlu1 %7427, %v143_v49   ;;  %7055 = vmatpush3.bf16.msra.mxu0 %v7052_v62  ;;  %v7056_v6 = vpack.c.bf16 %v5789_v5, %v5788_v4  ;;  %v690_v9 = vld [vmem:[#allocation2 + $0x50] sm:$0xff]  ;;  %v152_v10 = vld [vmem:[#allocation2 + $0x58] sm:$0xff]  ;;  %v5807_v12 = vld [vmem:[%s9626_s5 + $0x48] sm:$0xff] }
  0x21   :  { %432 = vperm.xlu0 %7426, %v143_v49   ;;  %7049 = vmatprep.subr.bf16.mxu1 %v7048_v3  ;;  %v7842_v13 = vpack.c.bf16 %v5807_v12, %v5806_v11  ;;  %v557_v14 = vld [vmem:[#allocation2 + $0x60] sm:$0xff]  ;;  %v154_v15 = vld [vmem:[#allocation2 + $0x68] sm:$0xff]  ;;  %v7884_v44 = vld [vmem:[#allocation2 + $0x90] sm:$0xff] }
  0x22   :  { %7051 = vmatpush3.bf16.msra.mxu1 %v7048_v3  ;;  %7057 = vmatprep.subr.bf16.mxu0 %v7056_v6  ;;  %v559_v16 = vld [vmem:[#allocation2 + $0x70] sm:$0xff]  ;;  %v156_v17 = vld [vmem:[#allocation2 + $0x78] sm:$0xff]  ;;  %v7848_v25 = vld [vmem:[%s9624_s3] ss:$0 sm:$0xff] }
  0x23   :  { %7170 = vmatprep.subr.bf16.mxu1 %v7052_v62  ;;  %v7853_v28 = vld [vmem:[%s9624_s3 + $0x1] ss:$0 sm:$0xff]  ;;  %v7859_v30 = vld [vmem:[%s9625_s4] ss:$0 sm:$0xff]  ;;  %v7864_v31 = vld [vmem:[%s9624_s3 + $0x2] ss:$0 sm:$0xff] }
  0x24   :  { %568 = vperm.xlu1 %7427, %v548_v50   ;;  %7059 = vmatpush3.bf16.msra.mxu0 %v7056_v6  ;;  %v561_v24 = vld [vmem:[#allocation2 + $0x80] sm:$0xff] }
  0x25   :  { %306 = vperm.xlu0 %7426, %v548_v50   ;;  %6529 = vmatmul.mubr.msk.f32.vlgmr.msra.gmra.mrb[0].mxu1 %vm63_vm0, %v7788_v40  ;;  %v7872_v35 = vld [vmem:[%s9624_s3 + $0x3] ss:$0 sm:$0xff]  ;;  %v697_v36 = vld [vmem:[#allocation2 + $0x88] sm:$0xff]  ;;  %v7882_v43 = vld [vmem:[%s9624_s3 + $0x4] ss:$0 sm:$0xff] }
  0x26   :  { %7172 = vmatpush3.bf16.msra.mxu1 %v7052_v62  ;;  %7061 = vmatprep.subr.bf16.mxu0 %v7842_v13 }
  0x27   :  { %7171 = vmatprep.subr.bf16.mxu1 %v7056_v6 }
  0x28   :  { %437 = vperm.xlu1 %7427, %v548_v50  }
  0x29   :  { %175 = vperm.xlu0 %7426, %v548_v50   ;;  %v699_v50 = vld [vmem:[#allocation2 + $0x98] sm:$0xff] }
  0x2a   :  { %7173 = vmatpush3.bf16.msra.mxu1 %v7056_v6 }
  0x2c   :  { %442 = vperm.xlu1 %7427, %v414_v54  }
  0x2d   :  { %180 = vperm.xlu0 %7426, %v414_v54  }
  0x30   :  { %311 = vperm.xlu1 %7427, %v414_v54  }
  0x31   :  { %704 = vperm.xlu0 %7426, %v414_v54  }
  0x34   :  { %316 = vperm.xlu1 %7427, %v280_v55  }
  0x35   :  { %573 = vperm.xlu0 %7426, %v414_v54  }
  0x38   :  { %185 = vperm.xlu1 %7427, %v280_v55  }
  0x39   :  { %578 = vperm.xlu0 %7426, %v280_v55  }
  0x3c   :  { %709 = vperm.xlu1 %7427, %v280_v55  }
  0x3d   :  { %447 = vperm.xlu0 %7426, %v280_v55  }
  0x40   :  { %452 = vperm.xlu1 %7427, %v416_v56  }
  0x41   :  { %190 = vperm.xlu0 %7426, %v416_v56  }
  0x44   :  { %321 = vperm.xlu1 %7427, %v416_v56  }
  0x45   :  { %714 = vperm.xlu0 %7426, %v416_v56  }
  0x48   :  { %326 = vperm.xlu1 %7427, %v282_v63  }
  0x49   :  { %583 = vperm.xlu0 %7426, %v416_v56  }
  0x4c   :  { %457 = vperm.xlu1 %7427, %v282_v63  }
  0x4d   :  { %588 = vperm.xlu0 %7426, %v282_v63  }
  0x50   :  { %462 = vperm.xlu1 %7427, %v418_v7  }
  0x51   :  { %719 = vperm.xlu0 %7426, %v282_v63  }
  0x54   :  { %593 = vperm.xlu1 %7427, %v418_v7  }
  0x55   :  { %724 = vperm.xlu0 %7426, %v418_v7  }
  0x58   :  { %729 = vperm.xlu1 %7427, %v689_v8  }
  0x59   :  { %598 = vperm.xlu0 %7426, %v689_v8  }
  0x5c   :  { %195 = vperm.xlu1 %7427, %v282_v63  }
  0x5d   :  { %734 = vperm.xlu0 %7426, %v690_v9  }
  0x60   :  { %200 = vperm.xlu1 %7427, %v418_v7  }
  0x61   :  { %331 = vperm.xlu0 %7426, %v418_v7  }
  0x64   :  { %467 = vperm.xlu1 %7427, %v689_v8  }
  0x65   :  { %205 = vperm.xlu0 %7426, %v689_v8  }
  0x68   :  { %341 = vperm.xlu1 %7427, %v690_v9  }
  0x69   :  { %336 = vperm.xlu0 %7426, %v689_v8  }
  0x6c   :  { %210 = vperm.xlu1 %7427, %v690_v9  }
  0x6d   :  { %603 = vperm.xlu0 %7426, %v690_v9  }
  0x70   :  { %215 = vperm.xlu1 %7427, %v152_v10  }
  0x71   :  { %472 = vperm.xlu0 %7426, %v690_v9  }
  0x74   :  { %739 = vperm.xlu1 %7427, %v152_v10  }
  0x75   :  { %477 = vperm.xlu0 %7426, %v152_v10  }
  0x78   :  { %608 = vperm.xlu1 %7427, %v152_v10  }
  0x79   :  { %346 = vperm.xlu0 %7426, %v152_v10  }
  0x7c   :  { %613 = vperm.xlu1 %7427, %v557_v14  }
  0x7d   :  { %351 = vperm.xlu0 %7426, %v557_v14  }
  0x80   :  { %482 = vperm.xlu1 %7427, %v557_v14  }
  0x81   :  { %220 = vperm.xlu0 %7426, %v557_v14  }
  0x84   :  { %225 = vperm.xlu1 %7427, %v154_v15  }
  0x85   :  { %744 = vperm.xlu0 %7426, %v557_v14  }
  0x88   :  { %749 = vperm.xlu1 %7427, %v154_v15  }
  0x89   :  { %487 = vperm.xlu0 %7426, %v154_v15  }
  0x8c   :  { %618 = vperm.xlu1 %7427, %v154_v15  }
  0x8d   :  { %356 = vperm.xlu0 %7426, %v154_v15  }
  0x90   :  { %623 = vperm.xlu1 %7427, %v559_v16  }
  0x91   :  { %361 = vperm.xlu0 %7426, %v559_v16  }
  0x94   :  { %492 = vperm.xlu1 %7427, %v559_v16  }
  0x95   :  { %230 = vperm.xlu0 %7426, %v559_v16  }
  0x97   :  { %v166_v18 = vpop.permute.xlu1 %165 }
  0x98   :  { %v161_v19 = vpop.permute.xlu0 %160  ;;  %235 = vperm.xlu1 %7427, %v156_v17   ;;  %v245_v51 = vmul.f32 %v7848_v25, %v166_v18 }
  0x99   :  { %754 = vperm.xlu0 %7426, %v559_v16   ;;  %v244_v29 = vmul.f32 %v7848_v25, %v161_v19 }
  0x9a   :  { %v261_v57 = vadd.f32 %v7859_v30, %v245_v51 }
  0x9b   :  { %v171_v20 = vpop.permute.xlu1 %170  ;;  %v260_v37 = vadd.f32 %v7859_v30, %v244_v29 }
  0x9c   :  { %v297_v21 = vpop.permute.xlu0 %296  ;;  %759 = vperm.xlu1 %7427, %v156_v17   ;;  %v246_v0 = vmul.f32 %v7848_v25, %v171_v20 }
  0x9d   :  { %497 = vperm.xlu0 %7426, %v156_v17   ;;  %v380_v34 = vmul.f32 %v7853_v28, %v297_v21 }
  0x9e   :  { %v262_v8 = vadd.f32 %v7859_v30, %v246_v0 }
  0x9f   :  { %v302_v22 = vpop.permute.xlu1 %301  ;;  %v396_v41 = vadd.f32 %v380_v34, %v260_v37 }
  0xa0   :  { %v433_v23 = vpop.permute.xlu0 %432  ;;  %628 = vperm.xlu1 %7427, %v156_v17   ;;  %v381_v55 = vmul.f32 %v7853_v28, %v302_v22 }
  0xa1   :  { %366 = vperm.xlu0 %7426, %v156_v17   ;;  %v516_v38 = vmul.f32 %v7864_v31, %v433_v23 }
  0xa2   :  { %v397_v62 = vadd.f32 %v381_v55, %v261_v57  ;;  %v5826_v55 = vld [vmem:[%s9626_s5 + $0x60] sm:$0xff] }
  0xa3   :  { %v569_v26 = vpop.permute.xlu1 %568  ;;  %v532_v45 = vadd.f32 %v516_v38, %v396_v41 }
  0xa4   :  { %v307_v27 = vpop.permute.xlu0 %306  ;;  %633 = vperm.xlu1 %7427, %v561_v24   ;;  %v652_v42 = vmul.f32 %v7872_v35, %v569_v26 }
  0xa5   :  { %371 = vperm.xlu0 %7426, %v561_v24   ;;  %v382_v5 = vmul.f32 %v7853_v28, %v307_v27 }
  0xa6   :  { %v668_v48 = vadd.f32 %v652_v42, %v532_v45 }
  0xa7   :  { %v438_v32 = vpop.permute.xlu1 %437  ;;  %v398_v14 = vadd.f32 %v382_v5, %v262_v8 }
  0xa8   :  { %v7866_v33 = vpop.permute.xlu0 %175  ;;  %764 = vperm.xlu1 %7427, %v561_v24   ;;  %v517_v58 = vmul.f32 %v7864_v31, %v438_v32 }
  0xa9   :  { %502 = vperm.xlu0 %7426, %v561_v24   ;;  %v247_v27 = vmul.f32 %v7848_v25, %v7866_v33  ;;  %v5809_v33 = vld [vmem:[%s9626_s5 + $0x58] sm:$0xff] }
  0xaa   :  { %v533_v1 = vadd.f32 %v517_v58, %v397_v62 }
  0xab   :  { %v443_v39 = vpop.permute.xlu1 %442  ;;  %v263_v41 = vadd.f32 %v7859_v30, %v247_v27 }
  0xac   :  { %v7876_v40 = vpop.permute.xlu0 %180  ;;  %769 = vperm.xlu1 %7427, %v697_v36   ;;  %v518_v9 = vmul.f32 %v7864_v31, %v443_v39  ;;  %v5808_v39 = vld [vmem:[%s9626_s5 + $0x50] sm:$0xff] }
  0xad   :  { %507 = vperm.xlu0 %7426, %v697_v36   ;;  %v248_v38 = vmul.f32 %v7848_v25, %v7876_v40 }
  0xae   :  { %v534_v18 = vadd.f32 %v518_v9, %v398_v14 }
  0xaf   :  { %v312_v46 = vpop.permute.xlu1 %311  ;;  %v264_v51 = vadd.f32 %v7859_v30, %v248_v38 }
  0xb0   :  { %v705_v47 = vpop.permute.xlu0 %704  ;;  %643 = vperm.xlu1 %7427, %v7884_v44  }
  0xb1   :  { %v788_v49 = vmul.f32 %v7882_v43, %v705_v47  ;;  %638 = vperm.xlu0 %7426, %v697_v36   ;;  %v383_v36 = vmul.f32 %v7853_v28, %v312_v46 }
  0xb3   :  { %v804_v52 = vadd.f32 %v788_v49, %v668_v48  ;;  %v317_v53 = vpop.permute.xlu1 %316  ;;  %v399_v49 = vadd.f32 %v383_v36, %v263_v41 }
  0xb4   :  { %v574_v54 = vpop.permute.xlu0 %573  ;;  %779 = vperm.xlu1 %7427, %v699_v50   ;;  %v384_v46 = vmul.f32 %v7853_v28, %v317_v53  ;;  %v7064_v50 = vpack.c.bf16 %v5809_v33, %v5808_v39  ;;  %v5827_v53 = vld [vmem:[%s9626_s5 + $0x68] sm:$0xff] }
  0xb5   :  { %v836_v56 = vmin.f32 %v804_v52, 0.0  ;;  %774 = vperm.xlu0 %7426, %v7884_v44   ;;  %v653_v63 = vmul.f32 %v7872_v35, %v574_v54  ;;  %vm820_vm2 = vcmp.gt.f32.partialorder %v804_v52, 0.0 }
  0xb7   :  { %v852_v59 = vmul.f32 1.442695, %v836_v56  ;;  %v186_v60 = vpop.permute.xlu1 %185  ;;  %v669_v6 = vadd.f32 %v653_v63, %v533_v1 }
  0xb8   :  { %v579_v61 = vpop.permute.xlu0 %578 }
  0xb9   :  { %7428 = vpow2.f32 %v852_v59  ;;  %v654_v15 = vmul.f32 %v7872_v35, %v579_v61  ;;  %v400_v59 = vadd.f32 %v384_v46, %v264_v51 }
  0xbb   :  { %v710_v3 = vpop.permute.xlu1 %709  ;;  %v670_v23 = vadd.f32 %v654_v15, %v534_v18 }
  0xbc   :  { %v448_v4 = vpop.permute.xlu0 %447  ;;  %v789_v7 = vmul.f32 %v7882_v43, %v710_v3 }
  0xbd   :  { %v519_v42 = vmul.f32 %v7864_v31, %v448_v4  ;;  %v7941_v4 = vpack.c.bf16 %v5827_v53, %v5826_v55 }
  0xbe   :  { %v805_v10 = vadd.f32 %v789_v7, %v669_v6 }
  0xbf   :  { %v453_v11 = vpop.permute.xlu1 %452  ;;  %v535_v57 = vadd.f32 %v519_v42, %v399_v49 }
  0xc0   :  { %v7899_v12 = vpop.permute.xlu0 %190  ;;  %v837_v16 = vmin.f32 %v805_v10, 0.0  ;;  %v520_v58 = vmul.f32 %v7864_v31, %v453_v11  ;;  %vm821_vm3 = vcmp.gt.f32.partialorder %v805_v10, 0.0 }
  0xc2   :  { %v854_v19 = vmul.f32 1.442695, %v837_v16  ;;  %v536_v7 = vadd.f32 %v520_v58, %v400_v59 }
  0xc3   :  { %v7429_v17 = vpop.eup %7428  ;;  %v322_v21 = vpop.permute.xlu1 %321 }
  0xc4   :  { %v5753_v20 = vadd.f32 -1.0, %v7429_v17  ;;  %v715_v22 = vpop.permute.xlu0 %714  ;;  %7430 = vpow2.f32 %v854_v19  ;;  %v385_v61 = vmul.f32 %v7853_v28, %v322_v21 }
  0xc5   :  { %v790_v24 = vmul.f32 %v7882_v43, %v715_v22 }
  0xc6   :  { %v900_v26 = vsel %vm820_vm2, %v804_v52, %v5753_v20  ;;  %v249_v52 = vmul.f32 %v7848_v25, %v186_v60 }
  0xc7   :  { %916 = vst.msk [vmem:[#allocation2 + $0x10] sm:$0xff] %vm63_vm0, %v900_v26  ;;  %v7906_v29 = vadd.f32 %v790_v24, %v670_v23  ;;  %v327_v32 = vpop.permute.xlu1 %326 }
  0xc8   :  { %v584_v34 = vpop.permute.xlu0 %583  ;;  %v265_v5 = vadd.f32 %v7859_v30, %v249_v52 }
  0xc9   :  { %v838_v37 = vmin.f32 %v7906_v29, 0.0  ;;  %v655_v40 = vmul.f32 %v7872_v35, %v584_v34  ;;  %vm822_vm4 = vcmp.gt.f32.partialorder %v7906_v29, 0.0 }
  0xca   :  { %v401_v11 = vadd.f32 %v385_v61, %v265_v5 }
  0xcb   :  { %v856_v45 = vmul.f32 1.442695, %v838_v37  ;;  %v458_v47 = vpop.permute.xlu1 %457  ;;  %v671_v0 = vadd.f32 %v655_v40, %v535_v57 }
  0xcc   :  { %v589_v48 = vpop.permute.xlu0 %588  ;;  %v521_v8 = vmul.f32 %v7864_v31, %v458_v47 }
  0xcd   :  { %7432 = vpow2.f32 %v856_v45  ;;  %v656_v1 = vmul.f32 %v7872_v35, %v589_v48 }
  0xce   :  { %v7924_v54 = vld [vmem:[#allocation2 + $0x10] sm:$0xff]  ;;  %v7431_v56 = vpop.eup %7430  ;;  %v537_v21 = vadd.f32 %v521_v8, %v401_v11 }
  0xcf   :  { %6531 = vmatprep.mubr.msk.f32.mxu1 %vm63_vm0, %v7924_v54  ;;  %6561 = vmatmul.mubr.msk.f32.vlgmr.msra.gmra.mrb[0].mxu0 %vm63_vm0, %v7924_v54  ;;  %v5754_v60 = vadd.f32 -1.0, %v7431_v56  ;;  %v463_v62 = vpop.permute.xlu1 %462  ;;  %v672_v16 = vadd.f32 %v656_v1, %v536_v7 }
  0xd0   :  { %v720_v63 = vpop.permute.xlu0 %719  ;;  %7063 = vmatpush3.bf16.msra.mxu0 %v7842_v13  ;;  %v250_v13 = vmul.f32 %v7848_v25, %v7899_v12  ;;  %v522_v26 = vmul.f32 %v7864_v31, %v463_v62 }
  0xd1   :  { %v791_v3 = vmul.f32 %v7882_v43, %v720_v63  ;;  %7065 = vmatprep.subr.bf16.mxu0 %v7064_v50  ;;  %v901_v6 = vsel %vm821_vm3, %v805_v10, %v5754_v60  ;;  %v386_v10 = vmul.f32 %v7853_v28, %v327_v32 }
  0xd2   :  { %917 = vst.msk [vmem:[#allocation2 + $0x18] sm:$0xff] %vm63_vm0, %v901_v6  ;;  %v266_v12 = vadd.f32 %v7859_v30, %v250_v13 }
  0xd3   :  { %v807_v9 = vadd.f32 %v791_v3, %v671_v0  ;;  %v594_v14 = vpop.permute.xlu1 %593 }
  0xd4   :  { %v725_v15 = vpop.permute.xlu0 %724  ;;  %7067 = vmatpush3.bf16.msra.mxu0 %v7064_v50  ;;  %v657_v18 = vmul.f32 %v7872_v35, %v594_v14  ;;  %v402_v39 = vadd.f32 %v386_v10, %v266_v12 }
  0xd5   :  { %v839_v17 = vmin.f32 %v807_v9, 0.0  ;;  %v792_v19 = vmul.f32 %v7882_v43, %v725_v15  ;;  %7069 = vmatprep.subr.bf16.mxu0 %v7941_v4  ;;  %vm823_vm5 = vcmp.gt.f32.partialorder %v807_v9, 0.0 }
  0xd6   :  { %v673_v36 = vadd.f32 %v657_v18, %v537_v21  ;;  %v538_v46 = vadd.f32 %v522_v26, %v402_v39 }
  0xd7   :  { %v7433_v20 = vpop.eup %7432  ;;  %v858_v22 = vmul.f32 1.442695, %v839_v17  ;;  %v808_v23 = vadd.f32 %v792_v19, %v672_v16  ;;  %v730_v27 = vpop.permute.xlu1 %729 }
  0xd8   :  { %v5755_v24 = vadd.f32 -1.0, %v7433_v20  ;;  %v599_v34 = vpop.permute.xlu0 %598  ;;  %v793_v38 = vmul.f32 %v7882_v43, %v730_v27 }
  0xd9   :  { %7434 = vpow2.f32 %v858_v22  ;;  %v840_v37 = vmin.f32 %v808_v23, 0.0  ;;  %v658_v33 = vmul.f32 %v7872_v35, %v599_v34  ;;  %v7958_v41 = vld [vmem:[#allocation2 + $0x18] sm:$0xff]  ;;  %vm824_vm6 = vcmp.gt.f32.partialorder %v808_v23, 0.0 }
  0xda   :  { %v902_v32 = vsel %vm822_vm4, %v7906_v29, %v5755_v24  ;;  %v809_v45 = vadd.f32 %v793_v38, %v673_v36  ;;  %6532 = vmatmul.mubr.msk.f32.gmra.mrb[2].mxu1 %vm63_vm0, %v7958_v41  ;;  %6563 = vmatprep.mubr.msk.f32.mxu0 %vm63_vm0, %v7958_v41 }
  0xdb   :  { %918 = vst.msk [vmem:[#allocation2 + $0x20] sm:$0xff] %vm63_vm0, %v902_v32  ;;  %v860_v42 = vmul.f32 1.442695, %v840_v37  ;;  %v196_v47 = vpop.permute.xlu1 %195  ;;  %v674_v49 = vadd.f32 %v658_v33, %v538_v46 }
  0xdc   :  { %v735_v48 = vpop.permute.xlu0 %734  ;;  %v841_v29 = vmin.f32 %v809_v45, 0.0  ;;  %v251_v7 = vmul.f32 %v7848_v25, %v196_v47  ;;  %vm825_vm7 = vcmp.gt.f32.partialorder %v809_v45, 0.0  ;;  %v5828_v47 = vld [vmem:[%s9626_s5 + $0x70] sm:$0xff] }
  0xdd   :  { %7436 = vpow2.f32 %v860_v42  ;;  %v794_v40 = vmul.f32 %v7882_v43, %v735_v48  ;;  %v5829_v48 = vld [vmem:[%s9626_s5 + $0x78] sm:$0xff] }
  0xde   :  { %v862_v50 = vmul.f32 1.442695, %v841_v29  ;;  %v267_v16 = vadd.f32 %v7859_v30, %v251_v7 }
  0xdf   :  { %v810_v51 = vadd.f32 %v794_v40, %v674_v49  ;;  %v201_v52 = vpop.permute.xlu1 %200 }
  0xe0   :  { %v332_v55 = vpop.permute.xlu0 %331  ;;  %7438 = vpow2.f32 %v862_v50  ;;  %v252_v42 = vmul.f32 %v7848_v25, %v201_v52 }
  0xe1   :  { %v842_v53 = vmin.f32 %v810_v51, 0.0  ;;  %vm826_vm8 = vcmp.gt.f32.partialorder %v810_v51, 0.0 }
  0xe2   :  { %v7966_v56 = vld [vmem:[#allocation2 + $0x20] sm:$0xff]  ;;  %v268_v52 = vadd.f32 %v7859_v30, %v252_v42 }
  0xe3   :  { %v7435_v57 = vpop.eup %7434  ;;  %6534 = vmatprep.mubr.msk.f32.mxu1 %vm63_vm0, %v7966_v56  ;;  %6564 = vmatmul.mubr.msk.f32.gmra.mrb[2].mxu0 %vm63_vm0, %v7966_v56  ;;  %v864_v59 = vmul.f32 1.442695, %v842_v53  ;;  %v468_v60 = vpop.permute.xlu1 %467  ;;  %v5846_v53 = vld [vmem:[%s9626_s5 + $0x80] sm:$0xff] }
  0xe4   :  { %v5756_v58 = vadd.f32 -1.0, %v7435_v57  ;;  %v206_v61 = vpop.permute.xlu0 %205  ;;  %v523_v17 = vmul.f32 %v7864_v31, %v468_v60  ;;  %v5847_v57 = vld [vmem:[%s9626_s5 + $0x88] sm:$0xff] }
  0xe5   :  { %7440 = vpow2.f32 %v864_v59  ;;  %v253_v50 = vmul.f32 %v7848_v25, %v206_v61 }
  0xe6   :  { %v903_v62 = vsel %vm823_vm5, %v807_v9, %v5756_v58  ;;  %v387_v9 = vmul.f32 %v7853_v28, %v332_v55 }
  0xe7   :  { %v7437_v63 = vpop.eup %7436  ;;  %919 = vst.msk [vmem:[#allocation2 + $0x28] sm:$0xff] %vm63_vm0, %v903_v62  ;;  %v342_v1 = vpop.permute.xlu1 %341  ;;  %v269_v62 = vadd.f32 %v7859_v30, %v253_v50 }
  0xe8   :  { %v5757_v0 = vadd.f32 -1.0, %v7437_v63  ;;  %v337_v3 = vpop.permute.xlu0 %336  ;;  %v403_v21 = vadd.f32 %v387_v9, %v267_v16  ;;  %v389_v58 = vmul.f32 %v7853_v28, %v342_v1  ;;  %v8043_v63 = vpack.c.bf16 %v5847_v57, %v5846_v53 }
  0xe9   :  { %v388_v40 = vmul.f32 %v7853_v28, %v337_v3 }
  0xea   :  { %v904_v5 = vsel %vm824_vm6, %v808_v23, %v5757_v0  ;;  %v7439_v6 = vpop.eup %7438  ;;  %v539_v24 = vadd.f32 %v523_v17, %v403_v21  ;;  %v405_v3 = vadd.f32 %v389_v58, %v269_v62 }
  0xeb   :  { %920 = vst.msk [vmem:[#allocation2 + $0x30] sm:$0xff] %vm63_vm0, %v904_v5  ;;  %v5758_v8 = vadd.f32 -1.0, %v7439_v6  ;;  %v7975_v13 = vpop.permute.xlu1 %210  ;;  %v404_v60 = vadd.f32 %v388_v40, %v268_v52 }
  0xec   :  { %v604_v11 = vpop.permute.xlu0 %603 }
  0xed   :  { %v905_v14 = vsel %vm825_vm7, %v809_v45, %v5758_v8  ;;  %v659_v22 = vmul.f32 %v7872_v35, %v604_v11 }
  0xee   :  { %v7978_v15 = vld [vmem:[#allocation2 + $0x28] sm:$0xff]  ;;  %921 = vst.msk [vmem:[#allocation2 + $0x38] sm:$0xff] %vm63_vm0, %v905_v14 }
  0xef   :  { %6535 = vmatmul.mubr.msk.f32.gmra.mrb[4].mxu1 %vm63_vm0, %v7978_v15  ;;  %6566 = vmatprep.mubr.msk.f32.mxu0 %vm63_vm0, %v7978_v15  ;;  %v7441_v18 = vpop.eup %7440  ;;  %v7987_v19 = vpop.permute.xlu1 %215  ;;  %v675_v34 = vadd.f32 %v659_v22, %v539_v24 }
  0xf0   :  { %v473_v10 = vpop.permute.xlu0 %472  ;;  %v5759_v20 = vadd.f32 -1.0, %v7441_v18 }
  0xf1   :  { %v524_v55 = vmul.f32 %v7864_v31, %v473_v10 }
  0xf2   :  { %v7990_v23 = vld [vmem:[#allocation2 + $0x30] sm:$0xff]  ;;  %v906_v12 = vsel %vm826_vm8, %v810_v51, %v5759_v20  ;;  %v7072_v51 = vpack.c.bf16 %v5829_v48, %v5828_v47 }
  0xf3   :  { %6537 = vmatprep.mubr.msk.f32.mxu1 %vm63_vm0, %v7990_v23  ;;  %6567 = vmatmul.mubr.msk.f32.gmra.mrb[4].mxu0 %vm63_vm0, %v7990_v23  ;;  %922 = vst.msk [vmem:[#allocation2 + $0x40] sm:$0xff] %vm63_vm0, %v906_v12  ;;  %v740_v26 = vpop.permute.xlu1 %739  ;;  %v540_v0 = vadd.f32 %v524_v55, %v404_v60 }
  0xf4   :  { %v478_v27 = vpop.permute.xlu0 %477  ;;  %v795_v36 = vmul.f32 %v7882_v43, %v740_v26 }
  0xf5   :  { %v7998_v37 = vld [vmem:[#allocation2 + $0x38] sm:$0xff]  ;;  %v525_v1 = vmul.f32 %v7864_v31, %v478_v27 }
  0xf6   :  { %v811_v38 = vadd.f32 %v795_v36, %v675_v34  ;;  %6538 = vmatmul.mubr.msk.f32.gmra.mrb[6].mxu1 %vm63_vm0, %v7998_v37  ;;  %6569 = vmatprep.mubr.msk.f32.mxu0 %vm63_vm0, %v7998_v37  ;;  %v254_v36 = vmul.f32 %v7848_v25, %v7975_v13 }
  0xf7   :  { %v609_v32 = vpop.permute.xlu1 %608  ;;  %v541_v9 = vadd.f32 %v525_v1, %v405_v3 }
  0xf8   :  { %v8004_v39 = vpop.permute.xlu0 %346  ;;  %v843_v33 = vmin.f32 %v811_v38, 0.0  ;;  %v660_v61 = vmul.f32 %v7872_v35, %v609_v32  ;;  %vm827_vm9 = vcmp.gt.f32.partialorder %v811_v38, 0.0  ;;  %v270_v48 = vadd.f32 %v7859_v30, %v254_v36 }
  0xfa   :  { %v866_v45 = vmul.f32 1.442695, %v843_v33  ;;  %v8007_v46 = vld [vmem:[#allocation2 + $0x40] sm:$0xff]  ;;  %v676_v7 = vadd.f32 %v660_v61, %v540_v0 }
  0xfb   :  { %6540 = vmatprep.mubr.msk.f32.mxu1 %vm63_vm0, %v8007_v46  ;;  %6570 = vmatmul.mubr.msk.f32.gmra.mrb[6].mxu0 %vm63_vm0, %v8007_v46  ;;  %v614_v29 = vpop.permute.xlu1 %613 }
  0xfc   :  { %v8019_v49 = vpop.permute.xlu0 %351  ;;  %7442 = vpow2.f32 %v866_v45  ;;  %6592 = vmatprep.mubr.msk.f32.mxu0 %vm63_vm0, %v7924_v54  ;;  %v661_v8 = vmul.f32 %v7872_v35, %v614_v29  ;;  %v390_v45 = vmul.f32 %v7853_v28, %v8004_v39 }
  0xfd   :  { %v391_v13 = vmul.f32 %v7853_v28, %v8019_v49 }
  0xfe   :  { %v677_v10 = vadd.f32 %v661_v8, %v541_v9  ;;  %v406_v50 = vadd.f32 %v390_v45, %v270_v48 }
  0xff   :  { %6593 = vmatmul.mubr.msk.f32.vlgmr.msra.gmra.mrb[0].mxu0 %vm63_vm0, %v7958_v41  ;;  %v483_v54 = vpop.permute.xlu1 %482 }
 0x100   :  { %v8036_v59 = vpop.permute.xlu0 %220  ;;  %6595 = vmatprep.mubr.msk.f32.mxu0 %vm63_vm0, %v7966_v56  ;;  %7071 = vmatpush3.bf16.msra.mxu0 %v7941_v4  ;;  %v526_v29 = vmul.f32 %v7864_v31, %v483_v54 }
 0x101   :  { %7073 = vmatprep.subr.bf16.mxu0 %v7072_v51 }
 0x102   :  { %v542_v55 = vadd.f32 %v526_v29, %v406_v50 }
 0x103   :  { %6596 = vmatmul.mubr.msk.f32.gmra.mrb[2].mxu0 %vm63_vm0, %v7978_v15  ;;  %v8048_v5 = vpop.permute.xlu1 %225 }
 0x104   :  { %v745_v6 = vpop.permute.xlu0 %744  ;;  %6598 = vmatprep.mubr.msk.f32.mxu0 %vm63_vm0, %v7990_v23  ;;  %7075 = vmatpush3.bf16.msra.mxu0 %v7072_v51  ;;  %v257_v36 = vmul.f32 %v7848_v25, %v8048_v5 }
 0x105   :  { %v796_v4 = vmul.f32 %v7882_v43, %v745_v6  ;;  %7077 = vmatprep.subr.bf16.mxu0 %v8043_v63 }
 0x106   :  { %v7443_v11 = vpop.eup %7442  ;;  %v273_v5 = vadd.f32 %v7859_v30, %v257_v36 }
 0x107   :  { %v812_v14 = vadd.f32 %v796_v4, %v676_v7  ;;  %v5760_v16 = vadd.f32 -1.0, %v7443_v11  ;;  %6599 = vmatmul.mubr.msk.f32.gmra.mrb[4].mxu0 %vm63_vm0, %v7998_v37  ;;  %v750_v17 = vpop.permute.xlu1 %749 }
 0x108   :  { %v488_v18 = vpop.permute.xlu0 %487  ;;  %v797_v21 = vmul.f32 %v7882_v43, %v750_v17  ;;  %6601 = vmatprep.mubr.msk.f32.mxu0 %vm63_vm0, %v8007_v46 }
 0x109   :  { %v844_v20 = vmin.f32 %v812_v14, 0.0  ;;  %v907_v22 = vsel %vm827_vm9, %v811_v38, %v5760_v16  ;;  %v255_v38 = vmul.f32 %v7848_v25, %v7987_v19  ;;  %v527_v53 = vmul.f32 %v7864_v31, %v488_v18 }
 0x10a   :  { %923 = vst.msk [vmem:[#allocation2 + $0x48] sm:$0xff] %vm63_vm0, %v907_v22  ;;  %v813_v24 = vadd.f32 %v797_v21, %v677_v10  ;;  %vm828_vm10 = vcmp.gt.f32.partialorder %v812_v14, 0.0  ;;  %v256_v18 = vmul.f32 %v7848_v25, %v8036_v59 }
 0x10b   :  { %v868_v12 = vmul.f32 1.442695, %v844_v20  ;;  %v619_v26 = vpop.permute.xlu1 %618  ;;  %v271_v51 = vadd.f32 %v7859_v30, %v255_v38 }
 0x10c   :  { %v357_v27 = vpop.permute.xlu0 %356  ;;  %v845_v34 = vmin.f32 %v813_v24, 0.0  ;;  %v662_v19 = vmul.f32 %v7872_v35, %v619_v26  ;;  %vm829_vm11 = vcmp.gt.f32.partialorder %v813_v24, 0.0  ;;  %v8093_v26 = vpop.f32.mrb[0].mxu1  ;;  %v272_v59 = vadd.f32 %v7859_v30, %v256_v18 }
 0x10d   :  { %7444 = vpow2.f32 %v868_v12  ;;  %v407_v57 = vadd.f32 %v391_v13, %v271_v51  ;;  %v392_v22 = vmul.f32 %v7853_v28, %v357_v27 }
 0x10e   :  { %v870_v32 = vmul.f32 1.442695, %v845_v34  ;;  %v678_v61 = vadd.f32 %v662_v19, %v542_v55 }
 0x10f   :  { %v624_v33 = vpop.permute.xlu1 %623  ;;  %v543_v3 = vadd.f32 %v527_v53, %v407_v57  ;;  %v408_v38 = vadd.f32 %v392_v22, %v272_v59 }
 0x110   :  { %v362_v42 = vpop.permute.xlu0 %361  ;;  %7446 = vpow2.f32 %v870_v32  ;;  %v663_v49 = vmul.f32 %v7872_v35, %v624_v33 }
 0x111   :  { %v8067_v47 = vld [vmem:[#allocation2 + $0x48] sm:$0xff]  ;;  %v393_v48 = vmul.f32 %v7853_v28, %v362_v42 }
 0x112   :  { %6541 = vmatmul.mubr.msk.f32.gmra.mrb[8].mxu1 %vm63_vm0, %v8067_v47  ;;  %6602 = vmatmul.mubr.msk.f32.gmra.mrb[6].mxu0 %vm63_vm0, %v8067_v47  ;;  %v679_v11 = vadd.f32 %v663_v49, %v543_v3 }
 0x113   :  { %v493_v39 = vpop.permute.xlu1 %492 }
 0x114   :  { %v8077_v40 = vpop.permute.xlu0 %230  ;;  %v528_v32 = vmul.f32 %v7864_v31, %v493_v39 }
 0x116   :  { %v544_v39 = vadd.f32 %v528_v32, %v408_v38 }
 0x117   :  { %v7445_v52 = vpop.eup %7444  ;;  %v236_v54 = vpop.permute.xlu1 %235 }
 0x118   :  { %v5761_v58 = vadd.f32 -1.0, %v7445_v52  ;;  %v755_v60 = vpop.permute.xlu0 %754  ;;  %v409_v52 = vadd.f32 %v393_v48, %v273_v5  ;;  %v259_v57 = vmul.f32 %v7848_v25, %v236_v54 }
 0x119   :  { %v798_v62 = vmul.f32 %v7882_v43, %v755_v60  ;;  %v258_v60 = vmul.f32 %v7848_v25, %v8077_v40 }
 0x11a   :  { %v908_v0 = vsel %vm828_vm10, %v812_v14, %v5761_v58  ;;  %v7447_v1 = vpop.eup %7446  ;;  %v275_v54 = vadd.f32 %v7859_v30, %v259_v57 }
 0x11b   :  { %924 = vst.msk [vmem:[#allocation2 + $0x50] sm:$0xff] %vm63_vm0, %v908_v0  ;;  %v814_v6 = vadd.f32 %v798_v62, %v678_v61  ;;  %v5762_v7 = vadd.f32 -1.0, %v7447_v1  ;;  %v760_v8 = vpop.permute.xlu1 %759  ;;  %v274_v40 = vadd.f32 %v7859_v30, %v258_v60 }
 0x11c   :  { %v498_v4 = vpop.permute.xlu0 %497  ;;  %v799_v16 = vmul.f32 %v7882_v43, %v760_v8 }
 0x11d   :  { %v846_v9 = vmin.f32 %v814_v6, 0.0  ;;  %v909_v17 = vsel %vm829_vm11, %v813_v24, %v5762_v7  ;;  %v8097_v24 = vpop.f32.mrb[1].mxu1  ;;  %v529_v50 = vmul.f32 %v7864_v31, %v498_v4  ;;  %vm830_vm12 = vcmp.gt.f32.partialorder %v814_v6, 0.0 }
 0x11e   :  { %925 = vst.msk [vmem:[#allocation2 + $0x58] sm:$0xff] %vm63_vm0, %v909_v17  ;;  %v8089_v10 = vadd.f32 %v799_v16, %v679_v11 }
 0x11f   :  { %v872_v14 = vmul.f32 1.442695, %v846_v9  ;;  %v629_v20 = vpop.permute.xlu1 %628  ;;  %v545_v61 = vadd.f32 %v529_v50, %v409_v52 }
 0x120   :  { %v367_v21 = vpop.permute.xlu0 %366  ;;  %v847_v12 = vmin.f32 %v8089_v10, 0.0  ;;  %v664_v29 = vmul.f32 %v7872_v35, %v629_v20  ;;  %vm831_vm13 = vcmp.gt.f32.partialorder %v8089_v10, 0.0 }
 0x121   :  { %7448 = vpow2.f32 %v872_v14  ;;  %v394_v7 = vmul.f32 %v7853_v28, %v367_v21 }
 0x122   :  { %v8095_v34 = vld [vmem:[#allocation2 + $0x50] sm:$0xff]  ;;  %v874_v33 = vmul.f32 1.442695, %v847_v12  ;;  %v680_v42 = vadd.f32 %v664_v29, %v544_v39 }
 0x123   :  { %6543 = vmatprep.mubr.msk.f32.mxu1 %vm63_vm0, %v8095_v34  ;;  %6604 = vmatprep.mubr.msk.f32.mxu0 %vm63_vm0, %v8095_v34  ;;  %v634_v27 = vpop.permute.xlu1 %633  ;;  %v410_v12 = vadd.f32 %v394_v7, %v274_v40  ;;  %v2188_v40 = vld [vmem:[%s9628_s7 + $0x18] sm:$0xff] }
 0x124   :  { %v372_v45 = vpop.permute.xlu0 %371  ;;  %7450 = vpow2.f32 %v874_v33  ;;  %v665_v55 = vmul.f32 %v7872_v35, %v634_v27 }
 0x125   :  { %v8109_v13 = vld [vmem:[#allocation2 + $0x58] sm:$0xff]  ;;  %v395_v0 = vmul.f32 %v7853_v28, %v372_v45 }
 0x126   :  { %6544 = vmatmul.mubr.msk.f32.gmra.mrb[10].mxu1 %vm63_vm0, %v8109_v13  ;;  %6605 = vmatmul.mubr.msk.f32.gmra.mrb[8].mxu0 %vm63_vm0, %v8109_v13  ;;  %v681_v8 = vadd.f32 %v665_v55, %v545_v61 }
 0x127   :  { %v765_v19 = vpop.permute.xlu1 %764  ;;  %v411_v20 = vadd.f32 %v395_v0, %v275_v54  ;;  %v5848_v54 = vld [vmem:[%s9626_s5 + $0x90] sm:$0xff] }
 0x128   :  { %v503_v51 = vpop.permute.xlu0 %502  ;;  %v800_v53 = vmul.f32 %v7882_v43, %v765_v19 }
 0x129   :  { %v530_v18 = vmul.f32 %v7864_v31, %v503_v51 }
 0x12a   :  { %v816_v49 = vadd.f32 %v800_v53, %v680_v42 }
 0x12b   :  { %v7449_v58 = vpop.eup %7448  ;;  %v770_v1 = vpop.permute.xlu1 %769 }
 0x12c   :  { %v5763_v62 = vadd.f32 -1.0, %v7449_v58  ;;  %v508_v3 = vpop.permute.xlu0 %507  ;;  %v848_v4 = vmin.f32 %v816_v49, 0.0  ;;  %v801_v11 = vmul.f32 %v7882_v43, %v770_v1  ;;  %vm832_vm14 = vcmp.gt.f32.partialorder %v816_v49, 0.0 }
 0x12d   :  { %v531_v16 = vmul.f32 %v7864_v31, %v508_v3  ;;  %v546_v31 = vadd.f32 %v530_v18, %v410_v12 }
 0x12e   :  { %v910_v9 = vsel %vm830_vm12, %v814_v6, %v5763_v62  ;;  %v7451_v25 = vpop.eup %7450  ;;  %v876_v17 = vmul.f32 1.442695, %v848_v4  ;;  %v817_v14 = vadd.f32 %v801_v11, %v681_v8 }
 0x12f   :  { %926 = vst.msk [vmem:[#allocation2 + $0x60] sm:$0xff] %vm63_vm0, %v910_v9  ;;  %v5764_v28 = vadd.f32 -1.0, %v7451_v25  ;;  %v644_v21 = vpop.permute.xlu1 %643  ;;  %v547_v30 = vadd.f32 %v531_v16, %v411_v20  ;;  %v5849_v9 = vld [vmem:[%s9626_s5 + $0x98] sm:$0xff]  ;;  %v2187_v25 = vld [vmem:[%s9628_s7 + $0x10] sm:$0xff] }
 0x130   :  { %v639_v22 = vpop.permute.xlu0 %638  ;;  %7452 = vpow2.f32 %v876_v17  ;;  %v849_v6 = vmin.f32 %v817_v14, 0.0  ;;  %v667_v59 = vmul.f32 %v7872_v35, %v644_v21  ;;  %vm833_vm15 = vcmp.gt.f32.partialorder %v817_v14, 0.0 }
 0x131   :  { %v911_v36 = vsel %vm831_vm13, %v8089_v10, %v5764_v28  ;;  %v666_v32 = vmul.f32 %v7872_v35, %v639_v22  ;;  %v7080_v16 = vpack.c.bf16 %v5849_v9, %v5848_v54  ;;  %v7088_v17 = vpack.c.bf16 %v2188_v40, %v2187_v25 }
 0x132   :  { %927 = vst.msk [vmem:[#allocation2 + $0x68] sm:$0xff] %vm63_vm0, %v911_v36  ;;  %v878_v33 = vmul.f32 1.442695, %v849_v6  ;;  %v683_v27 = vadd.f32 %v667_v59, %v547_v30  ;;  %v8258_v59 = vld [vmem:[%s9627_s6] ss:$0 sm:$0xff] }
 0x133   :  { %v780_v45 = vpop.permute.xlu1 %779  ;;  %v682_v48 = vadd.f32 %v666_v32, %v546_v31  ;;  %v1154_v36 = vadd.f32 %v8093_v26, %v8258_v59  ;;  %v1153_v30 = vadd.f32 %v8258_v59, %v8097_v24 }
 0x134   :  { %v775_v38 = vpop.permute.xlu0 %774  ;;  %7454 = vpow2.f32 %v878_v33  ;;  %v803_v29 = vmul.f32 %v7882_v43, %v780_v45 }
 0x135   :  { %v802_v5 = vmul.f32 %v7882_v43, %v775_v38 }
 0x136   :  { %v8137_v39 = vld [vmem:[#allocation2 + $0x60] sm:$0xff]  ;;  %v819_v50 = vadd.f32 %v803_v29, %v683_v27 }
 0x137   :  { %v818_v10 = vadd.f32 %v802_v5, %v682_v48  ;;  %6546 = vmatprep.mubr.msk.f32.mxu1 %vm63_vm0, %v8137_v39  ;;  %6607 = vmatprep.mubr.msk.f32.mxu0 %vm63_vm0, %v8137_v39 }
 0x138   :  { %v851_v35 = vmin.f32 %v819_v50, 0.0  ;;  %vm835_vm1 = vcmp.gt.f32.partialorder %v819_v50, 0.0 }
 0x139   :  { %v850_v19 = vmin.f32 %v818_v10, 0.0  ;;  %v8143_v51 = vld [vmem:[#allocation2 + $0x68] sm:$0xff]  ;;  %vm834_vm2 = vcmp.gt.f32.partialorder %v818_v10, 0.0 }
 0x13a   :  { %v7453_v52 = vpop.eup %7452  ;;  %v882_v42 = vmul.f32 1.442695, %v851_v35  ;;  %6547 = vmatmul.mubr.msk.f32.gmra.mrb[12].mxu1 %vm63_vm0, %v8143_v51  ;;  %6608 = vmatmul.mubr.msk.f32.gmra.mrb[10].mxu0 %vm63_vm0, %v8143_v51 }
 0x13b   :  { %v880_v55 = vmul.f32 1.442695, %v850_v19  ;;  %v5765_v43 = vadd.f32 -1.0, %v7453_v52 }
 0x13c   :  { %7456 = vpow2.f32 %v882_v42 }
 0x13d   :  { %v912_v53 = vsel %vm832_vm14, %v816_v49, %v5765_v43  ;;  %7458 = vpow2.f32 %v880_v55 }
 0x13e   :  { %v7455_v57 = vpop.eup %7454  ;;  %928 = vst.msk [vmem:[#allocation2 + $0x70] sm:$0xff] %vm63_vm0, %v912_v53 }
 0x13f   :  { %v5766_v58 = vadd.f32 -1.0, %v7455_v57 }
 0x141   :  { %v913_v60 = vsel %vm833_vm15, %v817_v14, %v5766_v58 }
 0x142   :  { %929 = vst.msk [vmem:[#allocation2 + $0x78] sm:$0xff] %vm63_vm0, %v913_v60 }
 0x145   :  { %v954_v61 = vld [vmem:[#allocation2 + $0x70] sm:$0xff] }
 0x146   :  { %v7457_v62 = vpop.eup %7456  ;;  %6549 = vmatprep.mubr.msk.f32.mxu1 %vm63_vm0, %v954_v61  ;;  %6610 = vmatprep.mubr.msk.f32.mxu0 %vm63_vm0, %v954_v61 }
 0x147   :  { %v7459_v0 = vpop.eup %7458  ;;  %v5768_v1 = vadd.f32 -1.0, %v7457_v62 }
 0x148   :  { %v5767_v3 = vadd.f32 -1.0, %v7459_v0 }
 0x149   :  { %v915_v49 = vsel %vm835_vm1, %v819_v50, %v5768_v1  ;;  %v955_v7 = vld [vmem:[#allocation2 + $0x78] sm:$0xff] }
 0x14a   :  { %931 = vst.msk [vmem:[#allocation2 + $0x88] sm:$0xff] %vm63_vm0, %v915_v49  ;;  %v914_v8 = vsel %vm834_vm2, %v818_v10, %v5767_v3  ;;  %6550 = vmatmul.mubr.msk.f32.gmra.mrb[14].mxu1 %vm63_vm0, %v955_v7  ;;  %6611 = vmatmul.mubr.msk.f32.gmra.mrb[12].mxu0 %vm63_vm0, %v955_v7 }
 0x14b   :  { %930 = vst.msk [vmem:[#allocation2 + $0x80] sm:$0xff] %vm63_vm0, %v914_v8  ;;  %6572 = vmatprep.mubr.msk.f32.mxu1 %vm63_vm0, %v8067_v47 }
 0x14e   :  { %6573 = vmatmul.mubr.msk.f32.vlgmr.msra.gmra.mrb[8].mxu1 %vm63_vm0, %v8095_v34 }
 0x14f   :  { %6575 = vmatprep.mubr.msk.f32.mxu1 %vm63_vm0, %v8109_v13 }
 0x151   :  { %v1414_v4 = vld [vmem:[#allocation2 + $0x88] sm:$0xff] }
 0x152   :  { %6576 = vmatmul.mubr.msk.f32.gmra.mrb[10].mxu1 %vm63_vm0, %v8137_v39  ;;  %v1413_v11 = vld [vmem:[#allocation2 + $0x80] sm:$0xff] }
 0x153   :  { %6613 = vmatprep.mubr.msk.f32.mxu0 %vm63_vm0, %v1413_v11  ;;  %6578 = vmatprep.mubr.msk.f32.mxu1 %vm63_vm0, %v8143_v51 }
 0x154   :  { %6614 = vmatmul.mubr.msk.f32.gmra.mrb[14].mxu0 %vm63_vm0, %v1414_v4 }
 0x155   :  { %6624 = vmatprep.mubr.msk.f32.mxu0 %vm63_vm0, %v7958_v41  ;;  %v1874_v41 = vld [vmem:[#allocation2 + $0x98] sm:$0xff] }
 0x156   :  { %6579 = vmatmul.mubr.msk.f32.gmra.mrb[12].mxu1 %vm63_vm0, %v954_v61 }
 0x157   :  { %6581 = vmatprep.mubr.msk.f32.mxu1 %vm63_vm0, %v955_v7 }
 0x158   :  { %6625 = vmatmul.mubr.msk.f32.vlgmr.msra.gmra.mrb[0].mxu0 %vm63_vm0, %v7966_v56 }
 0x159   :  { %7079 = vmatpush3.bf16.msra.mxu0 %v8043_v63  ;;  %6627 = vmatprep.mubr.msk.f32.mxu0 %vm63_vm0, %v7978_v15 }
 0x15a   :  { %6582 = vmatmul.mubr.msk.f32.gmra.mrb[14].mxu1 %vm63_vm0, %v1413_v11  ;;  %7081 = vmatprep.subr.bf16.mxu0 %v7080_v16 }
 0x15c   :  { %6628 = vmatmul.mubr.msk.f32.gmra.mrb[2].mxu0 %vm63_vm0, %v7990_v23 }
 0x15d   :  { %6630 = vmatprep.mubr.msk.f32.mxu0 %vm63_vm0, %v7998_v37  ;;  %7083 = vmatpush3.bf16.msra.mxu0 %v7080_v16 }
 0x160   :  { %6631 = vmatmul.mubr.msk.f32.gmra.mrb[4].mxu0 %vm63_vm0, %v8007_v46 }
 0x161   :  { %6633 = vmatprep.mubr.msk.f32.mxu0 %vm63_vm0, %v8067_v47 }
 0x164   :  { %6634 = vmatmul.mubr.msk.f32.gmra.mrb[6].mxu0 %vm63_vm0, %v8095_v34 }
 0x165   :  { %6636 = vmatprep.mubr.msk.f32.mxu0 %vm63_vm0, %v8109_v13 }
 0x168   :  { %6637 = vmatmul.mubr.msk.f32.gmra.mrb[8].mxu0 %vm63_vm0, %v8137_v39 }
 0x169   :  { %6639 = vmatprep.mubr.msk.f32.mxu0 %vm63_vm0, %v8143_v51 }
 0x16c   :  { %6640 = vmatmul.mubr.msk.f32.gmra.mrb[10].mxu0 %vm63_vm0, %v954_v61 }
 0x16d   :  { %6642 = vmatprep.mubr.msk.f32.mxu0 %vm63_vm0, %v955_v7 }
 0x170   :  { %6643 = vmatmul.mubr.msk.f32.gmra.mrb[12].mxu0 %vm63_vm0, %v1413_v11 }
 0x171   :  { %6645 = vmatprep.mubr.msk.f32.mxu0 %vm63_vm0, %v1414_v4 }
 0x174   :  { %6646 = vmatmul.mubr.msk.f32.gmra.mrb[14].mxu0 %vm63_vm0, %v7884_v44  ;;  %v1873_v44 = vld [vmem:[#allocation2 + $0x90] sm:$0xff] }
 0x175   :  { %6656 = vmatprep.mubr.msk.f32.mxu0 %vm63_vm0, %v7966_v56 }
 0x178   :  { %6657 = vmatmul.mubr.msk.f32.vlgmr.msra.gmra.mrb[0].mxu0 %vm63_vm0, %v7978_v15 }
 0x179   :  { %6659 = vmatprep.mubr.msk.f32.mxu0 %vm63_vm0, %v7990_v23 }
 0x17c   :  { %6660 = vmatmul.mubr.msk.f32.gmra.mrb[2].mxu0 %vm63_vm0, %v7998_v37 }
 0x17d   :  { %6662 = vmatprep.mubr.msk.f32.mxu0 %vm63_vm0, %v8007_v46 }
 0x180   :  { %6663 = vmatmul.mubr.msk.f32.gmra.mrb[4].mxu0 %vm63_vm0, %v8067_v47  ;;  %v2185_v47 = vld [vmem:[%s9628_s7] sm:$0xff] }
 0x181   :  { %6665 = vmatprep.mubr.msk.f32.mxu0 %vm63_vm0, %v8095_v34  ;;  %v2186_v34 = vld [vmem:[%s9628_s7 + $0x8] sm:$0xff] }
 0x184   :  { %6666 = vmatmul.mubr.msk.f32.gmra.mrb[6].mxu0 %vm63_vm0, %v8109_v13  ;;  %v7084_v13 = vpack.c.bf16 %v2186_v34, %v2185_v47 }
 0x185   :  { %6668 = vmatprep.mubr.msk.f32.mxu0 %vm63_vm0, %v8137_v39 }
 0x186   :  { %7085 = vmatprep.subr.bf16.mxu1 %v7084_v13 }
 0x187   :  { %7087 = vmatpush3.bf16.msra.mxu1 %v7084_v13 }
 0x188   :  { %6669 = vmatmul.mubr.msk.f32.gmra.mrb[8].mxu0 %vm63_vm0, %v8143_v51  ;;  %7089 = vmatprep.subr.bf16.mxu1 %v7088_v17 }
 0x189   :  { %6671 = vmatprep.mubr.msk.f32.mxu0 %vm63_vm0, %v954_v61 }
 0x18b   :  { %7091 = vmatpush3.bf16.msra.mxu1 %v7088_v17 }
 0x18c   :  { %6672 = vmatmul.mubr.msk.f32.gmra.mrb[10].mxu0 %vm63_vm0, %v955_v7 }
 0x18d   :  { %6674 = vmatprep.mubr.msk.f32.mxu0 %vm63_vm0, %v1413_v11 }
 0x190   :  { %6675 = vmatmul.mubr.msk.f32.gmra.mrb[12].mxu0 %vm63_vm0, %v1414_v4 }
 0x191   :  { %6677 = vmatprep.mubr.msk.f32.mxu0 %vm63_vm0, %v1873_v44 }
 0x194   :  { %6678 = vmatmul.mubr.msk.f32.gmra.mrb[14].mxu0 %vm63_vm0, %v1874_v41 }
 0x1ad   :  { %v6533_v56 = vpop.f32.mrb[2].mxu1 }
 0x1ae   :  { %v1084_v15 = vpop.f32.mrb[3].mxu1  ;;  %v1156_v45 = vadd.f32 %v6533_v56, %v8258_v59 }
 0x1af   :  { %v1155_v48 = vadd.f32 %v8258_v59, %v1084_v15 }
 0x1c2   :  { %v6536_v23 = vpop.f32.mrb[4].mxu1 }
 0x1c3   :  { %v1094_v37 = vpop.f32.mrb[5].mxu1  ;;  %v1158_v35 = vadd.f32 %v6536_v23, %v8258_v59 }
 0x1c4   :  { %v1157_v51 = vadd.f32 %v8258_v59, %v1094_v37 }
 0x1c9   :  { %v6539_v46 = vpop.f32.mrb[6].mxu1 }
 0x1ca   :  { %v1104_v63 = vpop.f32.mrb[7].mxu1  ;;  %v1160_v60 = vadd.f32 %v6539_v46, %v8258_v59 }
 0x1cb   :  { %v1159_v62 = vadd.f32 %v8258_v59, %v1104_v63 }
 0x221   :  { %v6574_v18 = vpop.f32.mrb[8].mxu1 }
 0x222   :  { %v1344_v14 = vpop.f32.mrb[9].mxu1  ;;  %v7190_v11 = vadd.f32 %v6574_v18, %v8258_v59 }
 0x223   :  { %v7192_v9 = vadd.f32 %v8258_v59, %v1344_v14 }
 0x225   :  { %v6577_v28 = vpop.f32.mrb[10].mxu1 }
 0x226   :  { %v8245_v20 = vpop.f32.mrb[11].mxu1  ;;  %v7194_v34 = vadd.f32 %v6577_v28, %v8258_v59 }
 0x227   :  { %v7196_v40 = vadd.f32 %v8258_v59, %v8245_v20 }
 0x229   :  { %v8247_v21 = vpop.f32.mrb[12].mxu1 }
 0x22a   :  { %v8249_v22 = vpop.f32.mrb[13].mxu1 }
 0x22d   :  { %v8251_v12 = vpop.f32.mrb[14].mxu1 }
 0x22e   :  { %v8253_v6 = vpop.f32.mrb[15].mxu1 }
 0x24b   :  { %v6658_v32 = vpop.f32.mrb[0].mxu0 }
 0x24c   :  { %v8264_v31 = vadd.f32 %v6658_v32, %v1154_v36  ;;  %v1994_v33 = vpop.f32.mrb[1].mxu0 }
 0x24d   :  { %v8266_v27 = vadd.f32 %v1994_v33, %v1153_v30 }
 0x24e   :  { %v2106_v38 = vmin.f32 %v8264_v31, 0.0  ;;  %vm2090_vm4 = vcmp.gt.f32.partialorder %v8264_v31, 0.0 }
 0x24f   :  { %v2105_v29 = vmin.f32 %v8266_v27, 0.0  ;;  %v6661_v5 = vpop.f32.mrb[2].mxu0  ;;  %vm2089_vm3 = vcmp.gt.f32.partialorder %v8266_v27, 0.0 }
 0x250   :  { %v2123_v39 = vmul.f32 1.442695, %v2106_v38  ;;  %v8272_v26 = vadd.f32 %v6661_v5, %v1156_v45  ;;  %v2004_v50 = vpop.f32.mrb[3].mxu0 }
 0x251   :  { %v2121_v24 = vmul.f32 1.442695, %v2105_v29  ;;  %v8274_v10 = vadd.f32 %v2004_v50, %v1155_v48  ;;  %v7198_v29 = vadd.f32 %v8247_v21, %v8258_v59 }
 0x252   :  { %7460 = vpow2.f32 %v2123_v39  ;;  %v2108_v19 = vmin.f32 %v8272_v26, 0.0  ;;  %vm2092_vm6 = vcmp.gt.f32.partialorder %v8272_v26, 0.0 }
 0x253   :  { %7462 = vpow2.f32 %v2121_v24  ;;  %v2107_v52 = vmin.f32 %v8274_v10, 0.0  ;;  %v6664_v42 = vpop.f32.mrb[4].mxu0  ;;  %vm2091_vm5 = vcmp.gt.f32.partialorder %v8274_v10, 0.0 }
 0x254   :  { %v2127_v55 = vmul.f32 1.442695, %v2108_v19  ;;  %v8280_v43 = vadd.f32 %v6664_v42, %v1158_v35  ;;  %v2014_v53 = vpop.f32.mrb[5].mxu0 }
 0x255   :  { %v2125_v57 = vmul.f32 1.442695, %v2107_v52  ;;  %v8282_v58 = vadd.f32 %v2014_v53, %v1157_v51 }
 0x256   :  { %7464 = vpow2.f32 %v2127_v55  ;;  %v2110_v61 = vmin.f32 %v8280_v43, 0.0  ;;  %vm2094_vm8 = vcmp.gt.f32.partialorder %v8280_v43, 0.0 }
 0x257   :  { %7466 = vpow2.f32 %v2125_v57  ;;  %v2109_v0 = vmin.f32 %v8282_v58, 0.0  ;;  %v6667_v1 = vpop.f32.mrb[6].mxu0  ;;  %v7202_v57 = vadd.f32 %v8251_v12, %v8258_v59  ;;  %vm2093_vm7 = vcmp.gt.f32.partialorder %v8282_v58, 0.0 }
 0x258   :  { %v2131_v3 = vmul.f32 1.442695, %v2110_v61  ;;  %v8288_v49 = vadd.f32 %v6667_v1, %v1160_v60  ;;  %v2024_v7 = vpop.f32.mrb[7].mxu0 }
 0x259   :  { %v2129_v8 = vmul.f32 1.442695, %v2109_v0  ;;  %v8290_v4 = vadd.f32 %v2024_v7, %v1159_v62 }
 0x25a   :  { %7468 = vpow2.f32 %v2131_v3  ;;  %v2112_v54 = vmin.f32 %v8288_v49, 0.0  ;;  %vm2096_vm10 = vcmp.gt.f32.partialorder %v8288_v49, 0.0 }
 0x25b   :  { %7470 = vpow2.f32 %v2129_v8  ;;  %v2111_v16 = vmin.f32 %v8290_v4, 0.0  ;;  %v6670_v44 = vpop.f32.mrb[8].mxu0  ;;  %vm2095_vm9 = vcmp.gt.f32.partialorder %v8290_v4, 0.0 }
 0x25c   :  { %v7461_v41 = vpop.eup %7460  ;;  %v2135_v56 = vmul.f32 1.442695, %v2112_v54  ;;  %v8296_v15 = vadd.f32 %v7190_v11, %v6670_v44  ;;  %v2034_v23 = vpop.f32.mrb[9].mxu0 }
 0x25d   :  { %v7463_v37 = vpop.eup %7462  ;;  %v5867_v46 = vadd.f32 -1.0, %v7461_v41  ;;  %v2133_v63 = vmul.f32 1.442695, %v2111_v16  ;;  %v8298_v47 = vadd.f32 %v7192_v9, %v2034_v23 }
 0x25e   :  { %7472 = vpow2.f32 %v2135_v56  ;;  %v2114_v13 = vmin.f32 %v8296_v15, 0.0  ;;  %v5866_v25 = vadd.f32 -1.0, %v7463_v37  ;;  %vm2098_vm12 = vcmp.gt.f32.partialorder %v8296_v15, 0.0 }
 0x25f   :  { %7474 = vpow2.f32 %v2133_v63  ;;  %v2113_v17 = vmin.f32 %v8298_v47, 0.0  ;;  %v6673_v18 = vpop.f32.mrb[10].mxu0  ;;  %v2170_v45 = vsel %vm2090_vm4, %v8264_v31, %v5867_v46  ;;  %vm2097_vm11 = vcmp.gt.f32.partialorder %v8298_v47, 0.0 }
 0x260   :  { %v7465_v14 = vpop.eup %7464  ;;  %v2139_v36 = vmul.f32 1.442695, %v2114_v13  ;;  %v8307_v30 = vadd.f32 %v7194_v34, %v6673_v18  ;;  %v2044_v28 = vpop.f32.mrb[11].mxu0  ;;  %v2169_v32 = vsel %vm2089_vm3, %v8266_v27, %v5866_v25  ;;  %v7200_v27 = vadd.f32 %v8258_v59, %v8249_v22 }
 0x261   :  { %v7467_v33 = vpop.eup %7466  ;;  %v2137_v38 = vmul.f32 1.442695, %v2113_v17  ;;  %v8311_v20 = vadd.f32 %v7196_v40, %v2044_v28  ;;  %6688 = vmatprep.mubr.msk.f32.mxu1 %vm63_vm0, %v2169_v32  ;;  %v5869_v48 = vadd.f32 -1.0, %v7465_v14  ;;  %vm2517_vm4 = vcmask 80896  }
 0x262   :  { %7476 = vpow2.f32 %v2139_v36  ;;  %v2116_v5 = vmin.f32 %v8307_v30, 0.0  ;;  %6689 = vmatmul.mubr.msk.f32.vlgmr.msra.gmra.mrb[16].mxu1 %vm63_vm0, %v2170_v45  ;;  %v5868_v39 = vadd.f32 -1.0, %v7467_v33  ;;  %vm2100_vm14 = vcmp.gt.f32.partialorder %v8307_v30, 0.0 }
 0x263   :  { %7478 = vpow2.f32 %v2137_v38  ;;  %v2115_v31 = vmin.f32 %v8311_v20, 0.0  ;;  %v6676_v50 = vpop.f32.mrb[12].mxu0  ;;  %v2172_v22 = vsel %vm2092_vm6, %v8272_v26, %v5869_v48  ;;  %vm2099_vm13 = vcmp.gt.f32.partialorder %v8311_v20, 0.0 }
 0x264   :  { %v7469_v24 = vpop.eup %7468  ;;  %v2143_v35 = vmul.f32 1.442695, %v2116_v5  ;;  %v8323_v21 = vadd.f32 %v7198_v29, %v6676_v50  ;;  %v2054_v19 = vpop.f32.mrb[13].mxu0  ;;  %v2171_v51 = vsel %vm2091_vm5, %v8274_v10, %v5868_v39  ;;  %v7204_v10 = vadd.f32 %v8258_v59, %v8253_v6  ;;  %v8377_v29 = vld [vmem:[%s9629_s8] ss:$0 sm:$0xff]  ;;  %s7642_s8 = smov 0  }
 0x265   :  { %v7471_v52 = vpop.eup %7470  ;;  %v2141_v42 = vmul.f32 1.442695, %v2115_v31  ;;  %v8326_v55 = vadd.f32 %v7200_v27, %v2054_v19  ;;  %6691 = vmatprep.mubr.msk.f32.mxu1 %vm63_vm0, %v2171_v51  ;;  %v5871_v53 = vadd.f32 -1.0, %v7469_v24 }
 0x266   :  { %7480 = vpow2.f32 %v2143_v35  ;;  %v2118_v60 = vmin.f32 %v8323_v21, 0.0  ;;  %6692 = vmatmul.mubr.msk.f32.gmra.mrb[18].mxu1 %vm63_vm0, %v2172_v22  ;;  %v5870_v61 = vadd.f32 -1.0, %v7471_v52  ;;  %vm2102_vm1 = vcmp.gt.f32.partialorder %v8323_v21, 0.0 }
 0x267   :  { %7482 = vpow2.f32 %v2141_v42  ;;  %v2117_v62 = vmin.f32 %v8326_v55, 0.0  ;;  %v6679_v0 = vpop.f32.mrb[14].mxu0  ;;  %v2174_v6 = vsel %vm2094_vm8, %v8280_v43, %v5871_v53  ;;  %vm2101_vm15 = vcmp.gt.f32.partialorder %v8326_v55, 0.0 }
 0x268   :  { %v7473_v26 = vpop.eup %7472  ;;  %v2147_v1 = vmul.f32 1.442695, %v2118_v60  ;;  %v8339_v12 = vadd.f32 %v7202_v57, %v6679_v0  ;;  %v2064_v3 = vpop.f32.mrb[15].mxu0  ;;  %v2173_v7 = vsel %vm2093_vm7, %v8282_v58, %v5870_v61 }
 0x269   :  { %v7475_v8 = vpop.eup %7474  ;;  %v2145_v11 = vmul.f32 1.442695, %v2117_v62  ;;  %v7205_v54 = vadd.f32 %v7204_v10, %v2064_v3  ;;  %6694 = vmatprep.mubr.msk.f32.mxu1 %vm63_vm0, %v2173_v7  ;;  %v5873_v59 = vadd.f32 -1.0, %v7473_v26 }
 0x26a   :  { %7484 = vpow2.f32 %v2147_v1  ;;  %v2120_v9 = vmin.f32 %v8339_v12, 0.0  ;;  %6695 = vmatmul.mubr.msk.f32.gmra.mrb[20].mxu1 %vm63_vm0, %v2174_v6  ;;  %v5872_v16 = vadd.f32 -1.0, %v7475_v8  ;;  %vm2104_vm3 = vcmp.gt.f32.partialorder %v8339_v12, 0.0 }
 0x26b   :  { %7486 = vpow2.f32 %v2145_v11  ;;  %v2119_v44 = vmin.f32 %v7205_v54, 0.0  ;;  %v2176_v43 = vsel %vm2096_vm10, %v8288_v49, %v5873_v59  ;;  %vm2103_vm2 = vcmp.gt.f32.partialorder %v7205_v54, 0.0 }
 0x26c   :  { %v7477_v41 = vpop.eup %7476  ;;  %v2151_v58 = vmul.f32 1.442695, %v2120_v9  ;;  %v2175_v56 = vsel %vm2095_vm9, %v8290_v4, %v5872_v16 }
 0x26d   :  { %v7479_v23 = vpop.eup %7478  ;;  %v2149_v37 = vmul.f32 1.442695, %v2119_v44  ;;  %6697 = vmatprep.mubr.msk.f32.mxu1 %vm63_vm0, %v2175_v56  ;;  %v5875_v46 = vadd.f32 -1.0, %v7477_v41 }
 0x26e   :  { %7488 = vpow2.f32 %v2151_v58  ;;  %6698 = vmatmul.mubr.msk.f32.gmra.mrb[22].mxu1 %vm63_vm0, %v2176_v43  ;;  %v5874_v63 = vadd.f32 -1.0, %v7479_v23 }
 0x26f   :  { %7490 = vpow2.f32 %v2149_v37  ;;  %v2178_v25 = vsel %vm2098_vm12, %v8296_v15, %v5875_v46 }
 0x270   :  { %v7481_v34 = vpop.eup %7480  ;;  %v2177_v13 = vsel %vm2097_vm11, %v8298_v47, %v5874_v63 }
 0x271   :  { %v7483_v4 = vpop.eup %7482  ;;  %6700 = vmatprep.mubr.msk.f32.mxu1 %vm63_vm0, %v2177_v13  ;;  %v5877_v40 = vadd.f32 -1.0, %v7481_v34 }
 0x272   :  { %6701 = vmatmul.mubr.msk.f32.gmra.mrb[24].mxu1 %vm63_vm0, %v2178_v25  ;;  %v5876_v49 = vadd.f32 -1.0, %v7483_v4 }
 0x273   :  { %v2180_v47 = vsel %vm2100_vm14, %v8307_v30, %v5877_v40 }
 0x274   :  { %v7485_v17 = vpop.eup %7484  ;;  %v2179_v18 = vsel %vm2099_vm13, %v8311_v20, %v5876_v49 }
 0x275   :  { %v7487_v14 = vpop.eup %7486  ;;  %6703 = vmatprep.mubr.msk.f32.mxu1 %vm63_vm0, %v2179_v18  ;;  %v5879_v36 = vadd.f32 -1.0, %v7485_v17 }
 0x276   :  { %6704 = vmatmul.mubr.msk.f32.gmra.mrb[26].mxu1 %vm63_vm0, %v2180_v47  ;;  %v5878_v15 = vadd.f32 -1.0, %v7487_v14 }
 0x277   :  { %v2182_v45 = vsel %vm2102_vm1, %v8323_v21, %v5879_v36 }
 0x278   :  { %v7489_v28 = vpop.eup %7488  ;;  %v2181_v32 = vsel %vm2101_vm15, %v8326_v55, %v5878_v15 }
 0x279   :  { %v7491_v33 = vpop.eup %7490  ;;  %6706 = vmatprep.mubr.msk.f32.mxu1 %vm63_vm0, %v2181_v32  ;;  %v5881_v38 = vadd.f32 -1.0, %v7489_v28 }
 0x27a   :  { %6707 = vmatmul.mubr.msk.f32.gmra.mrb[28].mxu1 %vm63_vm0, %v2182_v45  ;;  %v5880_v30 = vadd.f32 -1.0, %v7491_v33 }
 0x27b   :  { %v2184_v48 = vsel %vm2104_vm3, %v8339_v12, %v5881_v38 }
 0x27c   :  { %v2183_v20 = vsel %vm2103_vm2, %v7205_v54, %v5880_v30 }
 0x27d   :  { %6709 = vmatprep.mubr.msk.f32.mxu1 %vm63_vm0, %v2183_v20 }
 0x27e   :  { %6710 = vmatmul.mubr.msk.f32.gmra.mrb[30].mxu1 %vm63_vm0, %v2184_v48 }
 0x335   :  { %v6690_v5 = vpop.f32.mrb[16].mxu1 }
 0x336   :  { %v2316_v39 = vadd.f32 %v6690_v5, %v8377_v29  ;;  %v2310_v27 = vpop.f32.mrb[17].mxu1 }
 0x337   :  { %v2311_v31 = vadd.f32 %v8377_v29, %v2310_v27 }
 0x338   :  { %v2406_v50 = vmin.f32 %v2316_v39, 0.0  ;;  %vm2390_vm5 = vcmp.gt.f32.partialorder %v2316_v39, 0.0 }
 0x339   :  { %v2405_v24 = vmin.f32 %v2311_v31, 0.0  ;;  %v6693_v35 = vpop.f32.mrb[18].mxu1  ;;  %vm2389_vm6 = vcmp.gt.f32.partialorder %v2311_v31, 0.0 }
 0x33a   :  { %v2423_v21 = vmul.f32 1.442695, %v2406_v50  ;;  %v8382_v19 = vadd.f32 %v6693_v35, %v8377_v29  ;;  %v2320_v51 = vpop.f32.mrb[19].mxu1 }
 0x33b   :  { %v2421_v52 = vmul.f32 1.442695, %v2405_v24  ;;  %v8385_v42 = vadd.f32 %v8377_v29, %v2320_v51 }
 0x33c   :  { %7492 = vpow2.f32 %v2423_v21  ;;  %v2408_v55 = vmin.f32 %v8382_v19, 0.0  ;;  %vm2392_vm7 = vcmp.gt.f32.partialorder %v8382_v19, 0.0 }
 0x33d   :  { %7494 = vpow2.f32 %v2421_v52  ;;  %v2407_v22 = vmin.f32 %v8385_v42, 0.0  ;;  %v6696_v53 = vpop.f32.mrb[20].mxu1  ;;  %vm2391_vm8 = vcmp.gt.f32.partialorder %v8385_v42, 0.0 }
 0x33e   :  { %v2427_v57 = vmul.f32 1.442695, %v2408_v55  ;;  %v8390_v60 = vadd.f32 %v6696_v53, %v8377_v29  ;;  %v2330_v61 = vpop.f32.mrb[21].mxu1 }
 0x33f   :  { %v2425_v10 = vmul.f32 1.442695, %v2407_v22  ;;  %v8393_v62 = vadd.f32 %v8377_v29, %v2330_v61 }
 0x340   :  { %7496 = vpow2.f32 %v2427_v57  ;;  %v2410_v0 = vmin.f32 %v8390_v60, 0.0  ;;  %vm2394_vm9 = vcmp.gt.f32.partialorder %v8390_v60, 0.0 }
 0x341   :  { %7498 = vpow2.f32 %v2425_v10  ;;  %v2409_v26 = vmin.f32 %v8393_v62, 0.0  ;;  %v6699_v1 = vpop.f32.mrb[22].mxu1  ;;  %vm2393_vm10 = vcmp.gt.f32.partialorder %v8393_v62, 0.0 }
 0x342   :  { %v2431_v12 = vmul.f32 1.442695, %v2410_v0  ;;  %v8398_v3 = vadd.f32 %v6699_v1, %v8377_v29  ;;  %v2340_v7 = vpop.f32.mrb[23].mxu1 }
 0x343   :  { %v2429_v8 = vmul.f32 1.442695, %v2409_v26  ;;  %v8401_v11 = vadd.f32 %v8377_v29, %v2340_v7 }
 0x344   :  { %7500 = vpow2.f32 %v2431_v12  ;;  %v2412_v54 = vmin.f32 %v8398_v3, 0.0  ;;  %vm2396_vm11 = vcmp.gt.f32.partialorder %v8398_v3, 0.0 }
 0x345   :  { %7502 = vpow2.f32 %v2429_v8  ;;  %v2411_v6 = vmin.f32 %v8401_v11, 0.0  ;;  %v6702_v59 = vpop.f32.mrb[24].mxu1  ;;  %vm2395_vm12 = vcmp.gt.f32.partialorder %v8401_v11, 0.0 }
 0x346   :  { %v7493_v9 = vpop.eup %7492  ;;  %v2435_v16 = vmul.f32 1.442695, %v2412_v54  ;;  %v8406_v44 = vadd.f32 %v6702_v59, %v8377_v29  ;;  %v2350_v41 = vpop.f32.mrb[25].mxu1 }
 0x347   :  { %v7495_v58 = vpop.eup %7494  ;;  %v5900_v56 = vadd.f32 -1.0, %v7493_v9  ;;  %v2433_v23 = vmul.f32 1.442695, %v2411_v6  ;;  %v8409_v37 = vadd.f32 %v8377_v29, %v2350_v41 }
 0x348   :  { %v5899_v43 = vadd.f32 -1.0, %v7495_v58  ;;  %7504 = vpow2.f32 %v2435_v16  ;;  %v2414_v46 = vmin.f32 %v8406_v44, 0.0  ;;  %vm2398_vm13 = vcmp.gt.f32.partialorder %v8406_v44, 0.0 }
 0x349   :  { %v2470_v63 = vsel %vm2390_vm5, %v2316_v39, %v5900_v56  ;;  %7506 = vpow2.f32 %v2433_v23  ;;  %v2413_v34 = vmin.f32 %v8409_v37, 0.0  ;;  %v6705_v13 = vpop.f32.mrb[26].mxu1  ;;  %vm2397_vm14 = vcmp.gt.f32.partialorder %v8409_v37, 0.0 }
 0x34a   :  { %v7497_v4 = vpop.eup %7496  ;;  %v5916_v25 = vclamps-f32 %v2470_v63, 1.0  ;;  %v2469_v40 = vsel %vm2389_vm6, %v2311_v31, %v5899_v43  ;;  %v2439_v49 = vmul.f32 1.442695, %v2414_v46  ;;  %v8414_v17 = vadd.f32 %v6705_v13, %v8377_v29  ;;  %v2360_v18 = vpop.f32.mrb[27].mxu1 }
 0x34b   :  { %v7499_v14 = vpop.eup %7498  ;;  %v5915_v47 = vclamps-f32 %v2469_v40, 1.0  ;;  %v5902_v36 = vadd.f32 -1.0, %v7497_v4  ;;  %v2437_v15 = vmul.f32 1.442695, %v2413_v34  ;;  %v8417_v28 = vadd.f32 %v8377_v29, %v2360_v18 }
 0x34c   :  { %2519 = vst.msk [vmem:[#allocation3 + $0x8] sm:$0xff] %vm2517_vm4, %v5916_v25  ;;  %v5901_v32 = vadd.f32 -1.0, %v7499_v14  ;;  %7508 = vpow2.f32 %v2439_v49  ;;  %v2416_v33 = vmin.f32 %v8414_v17, 0.0  ;;  %vm2400_vm15 = vcmp.gt.f32.partialorder %v8414_v17, 0.0 }
 0x34d   :  { %2518 = vst.msk [vmem:[#allocation3] sm:$0xff] %vm2517_vm4, %v5915_v47  ;;  %v2472_v45 = vsel %vm2392_vm7, %v8382_v19, %v5902_v36  ;;  %7510 = vpow2.f32 %v2437_v15  ;;  %v2415_v38 = vmin.f32 %v8417_v28, 0.0  ;;  %v6708_v30 = vpop.f32.mrb[28].mxu1  ;;  %vm2399_vm1 = vcmp.gt.f32.partialorder %v8417_v28, 0.0 }
 0x34e   :  { %v7501_v20 = vpop.eup %7500  ;;  %v5918_v48 = vclamps-f32 %v2472_v45, 1.0  ;;  %v2471_v5 = vsel %vm2391_vm8, %v8385_v42, %v5901_v32  ;;  %v2443_v39 = vmul.f32 1.442695, %v2416_v33  ;;  %v8428_v27 = vadd.f32 %v6708_v30, %v8377_v29  ;;  %v2370_v31 = vpop.f32.mrb[29].mxu1 }
 0x34f   :  { %v7503_v50 = vpop.eup %7502  ;;  %v5917_v24 = vclamps-f32 %v2471_v5, 1.0  ;;  %v5904_v35 = vadd.f32 -1.0, %v7501_v20  ;;  %v2441_v21 = vmul.f32 1.442695, %v2415_v38  ;;  %v8431_v19 = vadd.f32 %v8377_v29, %v2370_v31 }
 0x350   :  { %2521 = vst.msk [vmem:[#allocation3 + $0x18] sm:$0xff] %vm2517_vm4, %v5918_v48  ;;  %v5903_v51 = vadd.f32 -1.0, %v7503_v50  ;;  %7512 = vpow2.f32 %v2443_v39  ;;  %v2418_v52 = vmin.f32 %v8428_v27, 0.0  ;;  %vm2402_vm2 = vcmp.gt.f32.partialorder %v8428_v27, 0.0 }
 0x351   :  { %2520 = vst.msk [vmem:[#allocation3 + $0x10] sm:$0xff] %vm2517_vm4, %v5917_v24  ;;  %v2474_v42 = vsel %vm2394_vm9, %v8390_v60, %v5904_v35  ;;  %7514 = vpow2.f32 %v2441_v21  ;;  %v2417_v55 = vmin.f32 %v8431_v19, 0.0  ;;  %v6711_v22 = vpop.f32.mrb[30].mxu1  ;;  %vm2401_vm3 = vcmp.gt.f32.partialorder %v8431_v19, 0.0 }
 0x352   :  { %v7505_v53 = vpop.eup %7504  ;;  %v5920_v57 = vclamps-f32 %v2474_v42, 1.0  ;;  %v2473_v61 = vsel %vm2393_vm10, %v8393_v62, %v5903_v51  ;;  %v2447_v10 = vmul.f32 1.442695, %v2418_v52  ;;  %v8442_v0 = vadd.f32 %v6711_v22, %v8377_v29  ;;  %v2380_v26 = vpop.f32.mrb[31].mxu1 }
 0x353   :  { %v7507_v1 = vpop.eup %7506  ;;  %v5919_v12 = vclamps-f32 %v2473_v61, 1.0  ;;  %v5906_v7 = vadd.f32 -1.0, %v7505_v53  ;;  %v2445_v8 = vmul.f32 1.442695, %v2417_v55  ;;  %v8445_v60 = vadd.f32 %v8377_v29, %v2380_v26 }
 0x354   :  { %2523 = vst.msk [vmem:[#allocation3 + $0x28] sm:$0xff] %vm2517_vm4, %v5920_v57  ;;  %v5905_v54 = vadd.f32 -1.0, %v7507_v1  ;;  %7516 = vpow2.f32 %v2447_v10  ;;  %v2420_v62 = vmin.f32 %v8442_v0, 0.0  ;;  %vm2404_vm5 = vcmp.gt.f32.partialorder %v8442_v0, 0.0 }
 0x355   :  { %2522 = vst.msk [vmem:[#allocation3 + $0x20] sm:$0xff] %vm2517_vm4, %v5919_v12  ;;  %v2476_v6 = vsel %vm2396_vm11, %v8398_v3, %v5906_v7  ;;  %7518 = vpow2.f32 %v2445_v8  ;;  %v2419_v59 = vmin.f32 %v8445_v60, 0.0  ;;  %vm2403_vm6 = vcmp.gt.f32.partialorder %v8445_v60, 0.0 }
 0x356   :  { %v7509_v9 = vpop.eup %7508  ;;  %v5922_v29 = vclamps-f32 %v2476_v6, 1.0  ;;  %v2475_v16 = vsel %vm2395_vm12, %v8401_v11, %v5905_v54  ;;  %v2451_v41 = vmul.f32 1.442695, %v2420_v62 }
 0x357   :  { %v7511_v58 = vpop.eup %7510  ;;  %v5921_v56 = vclamps-f32 %v2475_v16, 1.0  ;;  %v5908_v23 = vadd.f32 -1.0, %v7509_v9  ;;  %v2449_v43 = vmul.f32 1.442695, %v2419_v59 }
 0x358   :  { %2525 = vst.msk [vmem:[#allocation3 + $0x38] sm:$0xff] %vm2517_vm4, %v5922_v29  ;;  %v5907_v46 = vadd.f32 -1.0, %v7511_v58  ;;  %7520 = vpow2.f32 %v2451_v41 }
 0x359   :  { %2524 = vst.msk [vmem:[#allocation3 + $0x30] sm:$0xff] %vm2517_vm4, %v5921_v56  ;;  %v2478_v3 = vsel %vm2398_vm13, %v8406_v44, %v5908_v23  ;;  %7522 = vpow2.f32 %v2449_v43 }
 0x35a   :  { %v7513_v63 = vpop.eup %7512  ;;  %v5924_v11 = vclamps-f32 %v2478_v3, 1.0  ;;  %v2477_v34 = vsel %vm2397_vm14, %v8409_v37, %v5907_v46 }
 0x35b   :  { %v7515_v13 = vpop.eup %7514  ;;  %v5923_v4 = vclamps-f32 %v2477_v34, 1.0  ;;  %v5910_v25 = vadd.f32 -1.0, %v7513_v63 }
 0x35c   :  { %2527 = vst.msk [vmem:[#allocation3 + $0x48] sm:$0xff] %vm2517_vm4, %v5924_v11  ;;  %v5909_v40 = vadd.f32 -1.0, %v7515_v13 }
 0x35d   :  { %2526 = vst.msk [vmem:[#allocation3 + $0x40] sm:$0xff] %vm2517_vm4, %v5923_v4  ;;  %v2480_v49 = vsel %vm2400_vm15, %v8414_v17, %v5910_v25 }
 0x35e   :  { %v7517_v44 = vpop.eup %7516  ;;  %v5926_v18 = vclamps-f32 %v2480_v49, 1.0  ;;  %v2479_v14 = vsel %vm2399_vm1, %v8417_v28, %v5909_v40 }
 0x35f   :  { %v7519_v47 = vpop.eup %7518  ;;  %v5925_v37 = vclamps-f32 %v2479_v14, 1.0  ;;  %v5912_v36 = vadd.f32 -1.0, %v7517_v44 }
 0x360   :  { %2529 = vst.msk [vmem:[#allocation3 + $0x58] sm:$0xff] %vm2517_vm4, %v5926_v18  ;;  %v5911_v15 = vadd.f32 -1.0, %v7519_v47 }
 0x361   :  { %2528 = vst.msk [vmem:[#allocation3 + $0x50] sm:$0xff] %vm2517_vm4, %v5925_v37  ;;  %v2482_v32 = vsel %vm2402_vm2, %v8428_v27, %v5912_v36 }
 0x362   :  { %v7521_v17 = vpop.eup %7520  ;;  %v5928_v33 = vclamps-f32 %v2482_v32, 1.0  ;;  %v2481_v45 = vsel %vm2401_vm3, %v8431_v19, %v5911_v15 }
 0x363   :  { %v7523_v38 = vpop.eup %7522  ;;  %v5927_v28 = vclamps-f32 %v2481_v45, 1.0  ;;  %v5914_v30 = vadd.f32 -1.0, %v7521_v17 }
 0x364   :  { %2531 = vst.msk [vmem:[#allocation3 + $0x68] sm:$0xff] %vm2517_vm4, %v5928_v33  ;;  %v5913_v20 = vadd.f32 -1.0, %v7523_v38 }
 0x365   :  { %2530 = vst.msk [vmem:[#allocation3 + $0x60] sm:$0xff] %vm2517_vm4, %v5927_v28  ;;  %v2484_v48 = vsel %vm2404_vm5, %v8442_v0, %v5914_v30 }
 0x366   :  { %v5930_v5 = vclamps-f32 %v2484_v48, 1.0  ;;  %v2483_v39 = vsel %vm2403_vm6, %v8445_v60, %v5913_v20 }
 0x367   :  { %v5929_v27 = vclamps-f32 %v2483_v39, 1.0 }
 0x368   :  { %2533 = vst.msk [vmem:[#allocation3 + $0x78] sm:$0xff] %vm2517_vm4, %v5930_v5 }
 0x369   :  { %2532 = vst.msk [vmem:[#allocation3 + $0x70] sm:$0xff] %vm2517_vm4, %v5929_v27 }
 0x36a LB: > { %s2540_s27 = sld [smem:[#allocation4 + %s7644_s8]]  ;;  %s5932_s28 = sshll.u32 %s7644_s8, 3  ;;  %s7644_s8 = sphi %s7642_s8, %s2539_s8  }
 0x36b   : > { %s5720_s16 = scalar_lea.vmem [#allocation2], %s5932_s28  ;;  %s2539_s8 = sadd.s32 1, %s7644_s8  }
 0x36c   : > { %p2536_p5 = scmp.ge.s32.totalorder %s2539_s8, 16  }
 0x36d   :  { %v2572_v50 = vld [vmem:[%s9630_s9] sm:$0xff] (%p2536_p5)  ;;  %v2573_v24 = vld [vmem:[%s9630_s9 + $0x8] sm:$0x3] (%p2536_p5)  ;;  %vm2622_vm7 = vcmask (%p2536_p5), 1041408   ;;  %7524 = vset.pattern.permute.xlu0 (%p2536_p5), %v7647_v2  ;;  %7525 = vset.pattern.permute.xlu1 (%p2536_p5), %v7647_v2  ;;  %vm7649_vm8 = vmmov (%p2536_p5), 1   ;;  %v5952_v51 = vld [vmem:[%s9630_s9 + $0x10] sm:$0xff] (%p2536_p5) }
 0x36e   :  { %2538 = sbr.rel (!%p2536_p5) target bundleno = 874 (0x36a), region = 109  ;;  %v7092_v21 = vpack.c.bf16 (%p2536_p5), %v2573_v24, %v2572_v50  ;;  %vm8490_vm9 = vmpackc.low (%p2536_p5), %vm2622_vm7, %vm7649_vm8  ;;  %v5953_v52 = vld [vmem:[%s9630_s9 + $0x18] sm:$0x3] (%p2536_p5)  ;;  %v5971_v22 = vld [vmem:[%s9630_s9 + $0x20] sm:$0xff] (%p2536_p5) }
 0x36f   :  { %v7098_v2 = vpack.c.bf16 (%p2536_p5), %v5953_v52, %v5952_v51  ;;  %v5972_v53 = vld [vmem:[%s9630_s9 + $0x28] sm:$0x3] (%p2536_p5)  ;;  %v5990_v9 = vld [vmem:[%s9630_s9 + $0x30] sm:$0xff] (%p2536_p5)  ;;  %v5991_v29 = vld [vmem:[%s9630_s9 + $0x38] sm:$0x3] (%p2536_p5) }
 0x370   : > { %s5931_s29 = sshll.u32 %s2540_s27, 3  ;;  %7094 = vmatprep.subr.msk.bf16.mxu1 (%p2536_p5), %vm8490_vm9, %v7092_v21  ;;  %v7104_v61 = vpack.c.bf16 (%p2536_p5), %v5972_v53, %v5971_v22  ;;  %v7110_v16 = vpack.c.bf16 (%p2536_p5), %v5991_v29, %v5990_v9  ;;  %v6009_v58 = vld [vmem:[%s9630_s9 + $0x40] sm:$0xff] (%p2536_p5)  ;;  %v6010_v56 = vld [vmem:[%s9630_s9 + $0x48] sm:$0x3] (%p2536_p5)  ;;  %v3849_v13 = vld [vmem:[%s9632_s11 + $0x10] sm:$0xff] (%p2536_p5) }
 0x371   : > { %s2544_s30 = scalar_lea.vmem [#allocation3], %s5931_s29  ;;  %7097 = vmatpush3.bf16.msk.msra.mxu1 (%p2536_p5), %vm8490_vm9, %v7092_v21  ;;  %v7116_v23 = vpack.c.bf16 (%p2536_p5), %v6010_v56, %v6009_v58  ;;  %v3847_v63 = vld [vmem:[%s9632_s11] sm:$0xff] (%p2536_p5)  ;;  %v3848_v11 = vld [vmem:[%s9632_s11 + $0x8] sm:$0xff] (%p2536_p5)  ;;  %v3850_v4 = vld [vmem:[%s9632_s11 + $0x18] sm:$0xff] (%p2536_p5) }
 0x372   : > { %v2545_v31 = vld [vmem:[%s2544_s30] sm:$0xff]  ;;  %7100 = vmatprep.subr.msk.bf16.mxu1 (%p2536_p5), %vm8490_vm9, %v7098_v2  ;;  %v7122_v34 = vpack.c.bf16 (%p2536_p5), %v3848_v11, %v3847_v63  ;;  %v7126_v25 = vpack.c.bf16 (%p2536_p5), %v3850_v4, %v3849_v13  ;;  %v6062_v49 = vld [vmem:[%s9632_s11 + $0x28] sm:$0xff] (%p2536_p5)  ;;  %v6063_v18 = vld [vmem:[%s9632_s11 + $0x30] sm:$0xff] (%p2536_p5) }
 0x373   : > { %5933 = vst.msk [vmem:[%s5720_s16 + $0x10] sm:$0xff] %vm2517_vm4, %v2545_v31  ;;  %v6061_v40 = vld [vmem:[%s9632_s11 + $0x20] sm:$0xff] (%p2536_p5)  ;;  %v6064_v14 = vld [vmem:[%s9632_s11 + $0x38] sm:$0xff] (%p2536_p5)  ;;  %v6082_v36 = vld [vmem:[%s9632_s11 + $0x48] sm:$0xff] (%p2536_p5) }
 0x374   :  { %7123 = vmatprep.subr.bf16.mxu0 (%p2536_p5), %v7122_v34  ;;  %v7130_v44 = vpack.c.bf16 (%p2536_p5), %v6062_v49, %v6061_v40  ;;  %v7134_v47 = vpack.c.bf16 (%p2536_p5), %v6064_v14, %v6063_v18  ;;  %v6081_v37 = vld [vmem:[%s9632_s11 + $0x40] sm:$0xff] (%p2536_p5) }
 0x375   :  { %7125 = vmatpush3.bf16.msra.mxu0 %v7122_v34  ;;  %v8752_v15 = vpack.c.bf16 %v6082_v36, %v6081_v37  ;;  %v8758_v32 = vld [vmem:[%s9631_s10] ss:$0 sm:$0xff] }
 0x376   :  { %7127 = vmatprep.subr.bf16.mxu0 %v7126_v25 }
 0x379   :  { %7129 = vmatpush3.bf16.msra.mxu0 %v7126_v25 }
 0x37a   :  { %v2556_v35 = vld [vmem:[#allocation2] sm:$0xff]  ;;  %v8506_v42 = vld [vmem:[#allocation2 + $0x8] sm:$0xff]  ;;  %v2558_v55 = vld [vmem:[#allocation2 + $0x10] sm:$0xff]  ;;  %7131 = vmatprep.subr.bf16.mxu0 %v7130_v44 }
 0x37b   :  { %6716 = vmatprep.mubr.msk.f32.mxu1 %vm2517_vm4, %v2556_v35  ;;  %6860 = vmatprep.mubr.msk.f32.mxu0 %vm63_vm0, %v2556_v35  ;;  %v8521_v57 = vld [vmem:[#allocation2 + $0x18] sm:$0xff]  ;;  %v8523_v10 = vld [vmem:[#allocation2 + $0x20] sm:$0xff]  ;;  %v8531_v0 = vld [vmem:[#allocation2 + $0x28] sm:$0xff] }
 0x37c   :  { %6717 = vmatmul.mubr.msk.f32.vlgmr.msra.gmra.mrb[32].mxu1 %vm2517_vm4, %v8506_v42  ;;  %v8533_v26 = vld [vmem:[#allocation2 + $0x30] sm:$0xff]  ;;  %v8539_v1 = vld [vmem:[#allocation2 + $0x38] sm:$0xff]  ;;  %v8541_v12 = vld [vmem:[#allocation2 + $0x40] sm:$0xff]  ;;  %6861 = vmatmul.mubr.msk.f32.vlgmr.msra.gmra.mrb[16].mxu0 %vm63_vm0, %v8506_v42 }
 0x37d   :  { %7103 = vmatpush3.bf16.msk.msra.mxu1 %vm8490_vm9, %v7098_v2  ;;  %6719 = vmatprep.mubr.msk.f32.mxu1 %vm2517_vm4, %v2558_v55  ;;  %v8547_v7 = vld [vmem:[#allocation2 + $0x48] sm:$0xff]  ;;  %v8549_v8 = vld [vmem:[#allocation2 + $0x50] sm:$0xff]  ;;  %v8555_v60 = vld [vmem:[#allocation2 + $0x58] sm:$0xff] }
 0x37e   :  { %7106 = vmatprep.subr.msk.bf16.mxu1 %vm8490_vm9, %v7104_v61  ;;  %v8557_v54 = vld [vmem:[#allocation2 + $0x60] sm:$0xff]  ;;  %v8563_v62 = vld [vmem:[#allocation2 + $0x68] sm:$0xff]  ;;  %v8565_v6 = vld [vmem:[#allocation2 + $0x70] sm:$0xff]  ;;  %7133 = vmatpush3.bf16.msra.mxu0 %v7130_v44 }
 0x37f   :  { %v8571_v59 = vld [vmem:[#allocation2 + $0x78] sm:$0xff]  ;;  %v2802_v41 = vld [vmem:[#allocation2 + $0x80] sm:$0xff]  ;;  %v3033_v43 = vld [vmem:[#allocation2 + $0x88] sm:$0xff]  ;;  %7135 = vmatprep.subr.bf16.mxu0 %v7134_v47 }
 0x380   :  { %6720 = vmatmul.mubr.msk.f32.gmra.mrb[34].mxu1 %vm2517_vm4, %v8521_v57  ;;  %v8684_v46 = vld [vmem:[#allocation2 + $0x90] sm:$0xff]  ;;  %v8716_v3 = vld [vmem:[#allocation2 + $0x98] sm:$0xff] }
 0x381   :  { %6722 = vmatprep.mubr.msk.f32.mxu1 %vm2517_vm4, %v8523_v10 }
 0x382   :  { %7137 = vmatpush3.bf16.msra.mxu0 %v7134_v47 }
 0x383   :  { %7139 = vmatprep.subr.bf16.mxu0 %v8752_v15 }
 0x384   :  { %6723 = vmatmul.mubr.msk.f32.gmra.mrb[36].mxu1 %vm2517_vm4, %v8531_v0 }
 0x385   :  { %6725 = vmatprep.mubr.msk.f32.mxu1 %vm2517_vm4, %v8533_v26 }
 0x388   :  { %6726 = vmatmul.mubr.msk.f32.gmra.mrb[38].mxu1 %vm2517_vm4, %v8539_v1 }
 0x389   :  { %6728 = vmatprep.mubr.msk.f32.mxu1 %vm2517_vm4, %v8541_v12 }
 0x38c   :  { %6729 = vmatmul.mubr.msk.f32.gmra.mrb[40].mxu1 %vm2517_vm4, %v8547_v7 }
 0x38d   :  { %6731 = vmatprep.mubr.msk.f32.mxu1 %vm2517_vm4, %v8549_v8 }
 0x390   :  { %6732 = vmatmul.mubr.msk.f32.gmra.mrb[42].mxu1 %vm2517_vm4, %v8555_v60 }
 0x391   :  { %6734 = vmatprep.mubr.msk.f32.mxu1 %vm2517_vm4, %v8557_v54 }
 0x394   :  { %6735 = vmatmul.mubr.msk.f32.gmra.mrb[44].mxu1 %vm2517_vm4, %v8563_v62 }
 0x395   :  { %6737 = vmatprep.mubr.msk.f32.mxu1 %vm2517_vm4, %v8565_v6 }
 0x398   :  { %6738 = vmatmul.mubr.msk.f32.gmra.mrb[46].mxu1 %vm2517_vm4, %v8571_v59 }
 0x399   :  { %6744 = vmatprep.mubr.msk.f32.mxu1 %vm2517_vm4, %v8506_v42 }
 0x39c   :  { %6745 = vmatmul.mubr.msk.f32.vlgmr.msra.gmra.mrb[32].mxu1 %vm2517_vm4, %v2558_v55 }
 0x39d   :  { %7109 = vmatpush3.bf16.msk.msra.mxu1 %vm8490_vm9, %v7104_v61  ;;  %6747 = vmatprep.mubr.msk.f32.mxu1 %vm2517_vm4, %v8521_v57 }
 0x39e   :  { %7112 = vmatprep.subr.msk.bf16.mxu1 %vm8490_vm9, %v7110_v16 }
 0x3a0   :  { %6748 = vmatmul.mubr.msk.f32.gmra.mrb[34].mxu1 %vm2517_vm4, %v8523_v10 }
 0x3a1   :  { %6750 = vmatprep.mubr.msk.f32.mxu1 %vm2517_vm4, %v8531_v0 }
 0x3a4   :  { %6751 = vmatmul.mubr.msk.f32.gmra.mrb[36].mxu1 %vm2517_vm4, %v8533_v26 }
 0x3a5   :  { %6753 = vmatprep.mubr.msk.f32.mxu1 %vm2517_vm4, %v8539_v1 }
 0x3a8   :  { %6754 = vmatmul.mubr.msk.f32.gmra.mrb[38].mxu1 %vm2517_vm4, %v8541_v12 }
 0x3a9   :  { %6756 = vmatprep.mubr.msk.f32.mxu1 %vm2517_vm4, %v8547_v7 }
 0x3ac   :  { %6757 = vmatmul.mubr.msk.f32.gmra.mrb[40].mxu1 %vm2517_vm4, %v8549_v8 }
 0x3ad   :  { %6759 = vmatprep.mubr.msk.f32.mxu1 %vm2517_vm4, %v8555_v60 }
 0x3b0   :  { %6760 = vmatmul.mubr.msk.f32.gmra.mrb[42].mxu1 %vm2517_vm4, %v8557_v54 }
 0x3b1   :  { %6762 = vmatprep.mubr.msk.f32.mxu1 %vm2517_vm4, %v8563_v62 }
 0x3b4   :  { %6763 = vmatmul.mubr.msk.f32.gmra.mrb[44].mxu1 %vm2517_vm4, %v8565_v6 }
 0x3b5   :  { %6765 = vmatprep.mubr.msk.f32.mxu1 %vm2517_vm4, %v8571_v59 }
 0x3b8   :  { %6766 = vmatmul.mubr.msk.f32.gmra.mrb[46].mxu1 %vm2517_vm4, %v2802_v41 }
 0x3b9   :  { %6772 = vmatprep.mubr.msk.f32.mxu1 %vm2517_vm4, %v2558_v55 }
 0x3bc   :  { %6773 = vmatmul.mubr.msk.f32.vlgmr.msra.gmra.mrb[32].mxu1 %vm2517_vm4, %v8521_v57 }
 0x3bd   :  { %7115 = vmatpush3.bf16.msk.msra.mxu1 %vm8490_vm9, %v7110_v16  ;;  %6775 = vmatprep.mubr.msk.f32.mxu1 %vm2517_vm4, %v8523_v10 }
 0x3be   :  { %7118 = vmatprep.subr.msk.bf16.mxu1 %vm8490_vm9, %v7116_v23 }
 0x3c0   :  { %6776 = vmatmul.mubr.msk.f32.gmra.mrb[34].mxu1 %vm2517_vm4, %v8531_v0 }
 0x3c1   :  { %6778 = vmatprep.mubr.msk.f32.mxu1 %vm2517_vm4, %v8533_v26 }
 0x3c4   :  { %6779 = vmatmul.mubr.msk.f32.gmra.mrb[36].mxu1 %vm2517_vm4, %v8539_v1 }
 0x3c5   :  { %6781 = vmatprep.mubr.msk.f32.mxu1 %vm2517_vm4, %v8541_v12 }
 0x3c8   :  { %6782 = vmatmul.mubr.msk.f32.gmra.mrb[38].mxu1 %vm2517_vm4, %v8547_v7 }
 0x3c9   :  { %6784 = vmatprep.mubr.msk.f32.mxu1 %vm2517_vm4, %v8549_v8 }
 0x3cc   :  { %6785 = vmatmul.mubr.msk.f32.gmra.mrb[40].mxu1 %vm2517_vm4, %v8555_v60 }
 0x3cd   :  { %6787 = vmatprep.mubr.msk.f32.mxu1 %vm2517_vm4, %v8557_v54 }
 0x3d0   :  { %6788 = vmatmul.mubr.msk.f32.gmra.mrb[42].mxu1 %vm2517_vm4, %v8563_v62 }
 0x3d1   :  { %6790 = vmatprep.mubr.msk.f32.mxu1 %vm2517_vm4, %v8565_v6 }
 0x3d4   :  { %6791 = vmatmul.mubr.msk.f32.gmra.mrb[44].mxu1 %vm2517_vm4, %v8571_v59 }
 0x3d5   :  { %6793 = vmatprep.mubr.msk.f32.mxu1 %vm2517_vm4, %v2802_v41 }
 0x3d8   :  { %6794 = vmatmul.mubr.msk.f32.gmra.mrb[46].mxu1 %vm2517_vm4, %v3033_v43 }
 0x3d9   :  { %6800 = vmatprep.mubr.msk.f32.mxu1 %vm2517_vm4, %v8521_v57 }
 0x3dc   :  { %6801 = vmatmul.mubr.msk.f32.vlgmr.msra.gmra.mrb[32].mxu1 %vm2517_vm4, %v8523_v10 }
 0x3dd   :  { %7121 = vmatpush3.bf16.msk.msra.mxu1 %vm8490_vm9, %v7116_v23  ;;  %6803 = vmatprep.mubr.msk.f32.mxu1 %vm2517_vm4, %v8531_v0 }
 0x3e0   :  { %6804 = vmatmul.mubr.msk.f32.gmra.mrb[34].mxu1 %vm2517_vm4, %v8533_v26 }
 0x3e1   :  { %6806 = vmatprep.mubr.msk.f32.mxu1 %vm2517_vm4, %v8539_v1 }
 0x3e4   :  { %6807 = vmatmul.mubr.msk.f32.gmra.mrb[36].mxu1 %vm2517_vm4, %v8541_v12 }
 0x3e5   :  { %6809 = vmatprep.mubr.msk.f32.mxu1 %vm2517_vm4, %v8547_v7 }
 0x3e8   :  { %6810 = vmatmul.mubr.msk.f32.gmra.mrb[38].mxu1 %vm2517_vm4, %v8549_v8 }
 0x3e9   :  { %6812 = vmatprep.mubr.msk.f32.mxu1 %vm2517_vm4, %v8555_v60 }
 0x3ec   :  { %6813 = vmatmul.mubr.msk.f32.gmra.mrb[40].mxu1 %vm2517_vm4, %v8557_v54 }
 0x3ed   :  { %6815 = vmatprep.mubr.msk.f32.mxu1 %vm2517_vm4, %v8563_v62 }
 0x3f0   :  { %6816 = vmatmul.mubr.msk.f32.gmra.mrb[42].mxu1 %vm2517_vm4, %v8565_v6 }
 0x3f1   :  { %6818 = vmatprep.mubr.msk.f32.mxu1 %vm2517_vm4, %v8571_v59 }
 0x3f4   :  { %6819 = vmatmul.mubr.msk.f32.gmra.mrb[44].mxu1 %vm2517_vm4, %v2802_v41 }
 0x3f5   :  { %6821 = vmatprep.mubr.msk.f32.mxu1 %vm2517_vm4, %v3033_v43 }
 0x3f8   :  { %6822 = vmatmul.mubr.msk.f32.gmra.mrb[46].mxu1 %vm2517_vm4, %v8684_v46 }
 0x3f9   :  { %6828 = vmatprep.mubr.msk.f32.mxu1 %vm2517_vm4, %v8523_v10 }
 0x3fc   :  { %6829 = vmatmul.mubr.msk.f32.vlgmr.msra.gmra.mrb[32].mxu1 %vm2517_vm4, %v8531_v0 }
 0x3fd   :  { %6831 = vmatprep.mubr.msk.f32.mxu1 %vm2517_vm4, %v8533_v26 }
 0x400   :  { %6832 = vmatmul.mubr.msk.f32.gmra.mrb[34].mxu1 %vm2517_vm4, %v8539_v1 }
 0x401   :  { %6834 = vmatprep.mubr.msk.f32.mxu1 %vm2517_vm4, %v8541_v12 }
 0x404   :  { %6835 = vmatmul.mubr.msk.f32.gmra.mrb[36].mxu1 %vm2517_vm4, %v8547_v7 }
 0x405   :  { %6837 = vmatprep.mubr.msk.f32.mxu1 %vm2517_vm4, %v8549_v8 }
 0x408   :  { %6838 = vmatmul.mubr.msk.f32.gmra.mrb[38].mxu1 %vm2517_vm4, %v8555_v60 }
 0x409   :  { %6840 = vmatprep.mubr.msk.f32.mxu1 %vm2517_vm4, %v8557_v54 }
 0x40c   :  { %6841 = vmatmul.mubr.msk.f32.gmra.mrb[40].mxu1 %vm2517_vm4, %v8563_v62 }
 0x40d   :  { %6843 = vmatprep.mubr.msk.f32.mxu1 %vm2517_vm4, %v8565_v6 }
 0x410   :  { %6844 = vmatmul.mubr.msk.f32.gmra.mrb[42].mxu1 %vm2517_vm4, %v8571_v59 }
 0x411   :  { %6846 = vmatprep.mubr.msk.f32.mxu1 %vm2517_vm4, %v2802_v41 }
 0x414   :  { %6847 = vmatmul.mubr.msk.f32.gmra.mrb[44].mxu1 %vm2517_vm4, %v3033_v43 }
 0x415   :  { %6849 = vmatprep.mubr.msk.f32.mxu1 %vm2517_vm4, %v8684_v46 }
 0x418   :  { %6850 = vmatmul.mubr.msk.f32.gmra.mrb[46].mxu1 %vm2517_vm4, %v8716_v3 }
 0x4cf   :  { %v6830_v17 = vpop.f32.mrb[32].mxu1 }
 0x4d0   :  { %v7206_v33 = vadd.f32 %v6830_v17, %v8758_v32  ;;  %v3616_v45 = vpop.f32.mrb[33].mxu1 }
 0x4d1   :  { %v7207_v38 = vadd.f32 %v8758_v32, %v3616_v45 }
 0x4d2   :  { %v3728_v28 = vmin.f32 %v7206_v33, 0.0  ;;  %vm3712_vm4 = vcmp.gt.f32.partialorder %v7206_v33, 0.0 }
 0x4d3   :  { %v3727_v30 = vmin.f32 %v7207_v38, 0.0  ;;  %v6833_v20 = vpop.f32.mrb[34].mxu1  ;;  %vm3711_vm10 = vcmp.gt.f32.partialorder %v7207_v38, 0.0 }
 0x4d4   :  { %v3745_v48 = vmul.f32 1.442695, %v3728_v28  ;;  %v7208_v5 = vadd.f32 %v6833_v20, %v8758_v32  ;;  %v3626_v39 = vpop.f32.mrb[35].mxu1 }
 0x4d5   :  { %v3743_v27 = vmul.f32 1.442695, %v3727_v30  ;;  %v8764_v31 = vadd.f32 %v8758_v32, %v3626_v39 }
 0x4d6   :  { %7526 = vpow2.f32 %v3745_v48  ;;  %v3730_v50 = vmin.f32 %v7208_v5, 0.0  ;;  %vm3714_vm11 = vcmp.gt.f32.partialorder %v7208_v5, 0.0 }
 0x4d7   :  { %7528 = vpow2.f32 %v3743_v27  ;;  %v3729_v24 = vmin.f32 %v8764_v31, 0.0  ;;  %v6836_v35 = vpop.f32.mrb[36].mxu1  ;;  %vm3713_vm12 = vcmp.gt.f32.partialorder %v8764_v31, 0.0 }
 0x4d8   :  { %v3749_v21 = vmul.f32 1.442695, %v3730_v50  ;;  %v8768_v19 = vadd.f32 %v6836_v35, %v8758_v32  ;;  %v3636_v51 = vpop.f32.mrb[37].mxu1 }
 0x4d9   :  { %v3747_v52 = vmul.f32 1.442695, %v3729_v24  ;;  %v8771_v2 = vadd.f32 %v8758_v32, %v3636_v51 }
 0x4da   :  { %7530 = vpow2.f32 %v3749_v21  ;;  %v3732_v55 = vmin.f32 %v8768_v19, 0.0  ;;  %vm3716_vm13 = vcmp.gt.f32.partialorder %v8768_v19, 0.0 }
 0x4db   :  { %7532 = vpow2.f32 %v3747_v52  ;;  %v3731_v22 = vmin.f32 %v8771_v2, 0.0  ;;  %v6839_v53 = vpop.f32.mrb[38].mxu1  ;;  %vm3715_vm14 = vcmp.gt.f32.partialorder %v8771_v2, 0.0 }
 0x4dc   :  { %v3753_v57 = vmul.f32 1.442695, %v3732_v55  ;;  %v8776_v61 = vadd.f32 %v6839_v53, %v8758_v32  ;;  %v3646_v10 = vpop.f32.mrb[39].mxu1 }
 0x4dd   :  { %v3751_v0 = vmul.f32 1.442695, %v3731_v22  ;;  %v8779_v26 = vadd.f32 %v8758_v32, %v3646_v10 }
 0x4de   :  { %7534 = vpow2.f32 %v3753_v57  ;;  %v3734_v1 = vmin.f32 %v8776_v61, 0.0  ;;  %vm3718_vm15 = vcmp.gt.f32.partialorder %v8776_v61, 0.0 }
 0x4df   :  { %7536 = vpow2.f32 %v3751_v0  ;;  %v3733_v12 = vmin.f32 %v8779_v26, 0.0  ;;  %v6842_v7 = vpop.f32.mrb[40].mxu1  ;;  %vm3717_vm1 = vcmp.gt.f32.partialorder %v8779_v26, 0.0 }
 0x4e0   :  { %v7527_v8 = vpop.eup %7526  ;;  %v3757_v60 = vmul.f32 1.442695, %v3734_v1  ;;  %v8784_v54 = vadd.f32 %v6842_v7, %v8758_v32  ;;  %v3656_v62 = vpop.f32.mrb[41].mxu1 }
 0x4e1   :  { %v7529_v6 = vpop.eup %7528  ;;  %v6029_v59 = vadd.f32 -1.0, %v7527_v8  ;;  %v3755_v9 = vmul.f32 1.442695, %v3733_v12  ;;  %v8787_v29 = vadd.f32 %v8758_v32, %v3656_v62 }
 0x4e2   :  { %v6028_v16 = vadd.f32 -1.0, %v7529_v6  ;;  %7538 = vpow2.f32 %v3757_v60  ;;  %v3736_v41 = vmin.f32 %v8784_v54, 0.0  ;;  %vm3720_vm2 = vcmp.gt.f32.partialorder %v8784_v54, 0.0 }
 0x4e3   :  { %v3792_v58 = vsel %vm3712_vm4, %v7206_v33, %v6029_v59  ;;  %7540 = vpow2.f32 %v3755_v9  ;;  %v3735_v56 = vmin.f32 %v8787_v29, 0.0  ;;  %v6845_v23 = vpop.f32.mrb[42].mxu1  ;;  %vm3719_vm3 = vcmp.gt.f32.partialorder %v8787_v29, 0.0 }
 0x4e4   :  { %v7531_v43 = vpop.eup %7530  ;;  %3808 = vst.msk [vmem:[#allocation2 + $0x18] sm:$0xff] %vm63_vm0, %v3792_v58  ;;  %v3791_v63 = vsel %vm3711_vm10, %v7207_v38, %v6028_v16  ;;  %v3761_v11 = vmul.f32 1.442695, %v3736_v41  ;;  %v8793_v34 = vadd.f32 %v6845_v23, %v8758_v32  ;;  %v3666_v13 = vpop.f32.mrb[43].mxu1 }
 0x4e5   :  { %v7533_v4 = vpop.eup %7532  ;;  %3807 = vst.msk [vmem:[#allocation2 + $0x10] sm:$0xff] %vm63_vm0, %v3791_v63  ;;  %v6031_v25 = vadd.f32 -1.0, %v7531_v43  ;;  %v3759_v40 = vmul.f32 1.442695, %v3735_v56  ;;  %v8797_v49 = vadd.f32 %v8758_v32, %v3666_v13 }
 0x4e6   :  { %v6030_v44 = vadd.f32 -1.0, %v7533_v4  ;;  %7542 = vpow2.f32 %v3761_v11  ;;  %v3738_v18 = vmin.f32 %v8793_v34, 0.0  ;;  %vm3722_vm5 = vcmp.gt.f32.partialorder %v8793_v34, 0.0 }
 0x4e7   :  { %v3794_v14 = vsel %vm3714_vm11, %v7208_v5, %v6031_v25  ;;  %7544 = vpow2.f32 %v3759_v40  ;;  %v3737_v47 = vmin.f32 %v8797_v49, 0.0  ;;  %v6848_v37 = vpop.f32.mrb[44].mxu1  ;;  %vm3721_vm6 = vcmp.gt.f32.partialorder %v8797_v49, 0.0 }
 0x4e8   :  { %v7535_v36 = vpop.eup %7534  ;;  %3810 = vst.msk [vmem:[#allocation2 + $0x28] sm:$0xff] %vm63_vm0, %v3794_v14  ;;  %v3793_v17 = vsel %vm3713_vm12, %v8764_v31, %v6030_v44  ;;  %v3765_v33 = vmul.f32 1.442695, %v3738_v18  ;;  %v8805_v45 = vadd.f32 %v6848_v37, %v8758_v32  ;;  %v3676_v38 = vpop.f32.mrb[45].mxu1 }
 0x4e9   :  { %v7537_v28 = vpop.eup %7536  ;;  %3809 = vst.msk [vmem:[#allocation2 + $0x20] sm:$0xff] %vm63_vm0, %v3793_v17  ;;  %v6033_v30 = vadd.f32 -1.0, %v7535_v36  ;;  %v3763_v20 = vmul.f32 1.442695, %v3737_v47  ;;  %v8809_v48 = vadd.f32 %v8758_v32, %v3676_v38 }
 0x4ea   :  { %v6032_v5 = vadd.f32 -1.0, %v7537_v28  ;;  %7546 = vpow2.f32 %v3765_v33  ;;  %v3740_v39 = vmin.f32 %v8805_v45, 0.0  ;;  %vm3724_vm7 = vcmp.gt.f32.partialorder %v8805_v45, 0.0 }
 0x4eb   :  { %v3796_v27 = vsel %vm3716_vm13, %v8768_v19, %v6033_v30  ;;  %7548 = vpow2.f32 %v3763_v20  ;;  %v3739_v31 = vmin.f32 %v8809_v48, 0.0  ;;  %v6851_v50 = vpop.f32.mrb[46].mxu1  ;;  %v8829_v10 = vld [vmem:[#allocation2 + $0x18] sm:$0xff]  ;;  %vm3723_vm8 = vcmp.gt.f32.partialorder %v8809_v48, 0.0 }
 0x4ec   :  { %v7539_v24 = vpop.eup %7538  ;;  %3812 = vst.msk [vmem:[#allocation2 + $0x38] sm:$0xff] %vm63_vm0, %v3796_v27  ;;  %v3795_v35 = vsel %vm3715_vm14, %v8771_v2, %v6032_v5  ;;  %v3769_v21 = vmul.f32 1.442695, %v3740_v39  ;;  %v8819_v51 = vadd.f32 %v6851_v50, %v8758_v32  ;;  %v3686_v52 = vpop.f32.mrb[47].mxu1  ;;  %v8821_v55 = vld [vmem:[#allocation2 + $0x10] sm:$0xff]  ;;  %v6084_v5 = vld [vmem:[%s9632_s11 + $0x58] sm:$0xff] }
 0x4ed   :  { %v7541_v22 = vpop.eup %7540  ;;  %3811 = vst.msk [vmem:[#allocation2 + $0x30] sm:$0xff] %vm63_vm0, %v3795_v35  ;;  %v6035_v19 = vadd.f32 -1.0, %v7539_v24  ;;  %v3767_v53 = vmul.f32 1.442695, %v3739_v31  ;;  %v8825_v57 = vadd.f32 %v8758_v32, %v3686_v52  ;;  %6863 = vmatprep.mubr.msk.f32.mxu0 %vm63_vm0, %v8821_v55  ;;  %v5076_v39 = vld [vmem:[%s9634_s13] sm:$0xff]  ;;  %v5077_v27 = vld [vmem:[%s9634_s13 + $0x8] sm:$0xff] }
 0x4ee   :  { %v6034_v2 = vadd.f32 -1.0, %v7541_v22  ;;  %7550 = vpow2.f32 %v3769_v21  ;;  %v3742_v0 = vmin.f32 %v8819_v51, 0.0  ;;  %6864 = vmatmul.mubr.msk.f32.gmra.mrb[18].mxu0 %vm63_vm0, %v8829_v10  ;;  %vm3726_vm9 = vcmp.gt.f32.partialorder %v8819_v51, 0.0  ;;  %v6101_v24 = vld [vmem:[%s9632_s11 + $0x60] sm:$0xff]  ;;  %v6102_v35 = vld [vmem:[%s9632_s11 + $0x68] sm:$0xff]  ;;  %v6103_v21 = vld [vmem:[%s9632_s11 + $0x70] sm:$0xff] }
 0x4ef   :  { %v3798_v1 = vsel %vm3718_vm15, %v8776_v61, %v6035_v19  ;;  %7552 = vpow2.f32 %v3767_v53  ;;  %v3741_v32 = vmin.f32 %v8825_v57, 0.0  ;;  %v8845_v61 = vld [vmem:[#allocation2 + $0x28] sm:$0xff]  ;;  %vm3725_vm4 = vcmp.gt.f32.partialorder %v8825_v57, 0.0  ;;  %v6121_v22 = vld [vmem:[%s9632_s11 + $0x80] sm:$0xff] }
 0x4f0   :  { %v7543_v12 = vpop.eup %7542  ;;  %3814 = vst.msk [vmem:[#allocation2 + $0x48] sm:$0xff] %vm63_vm0, %v3798_v1  ;;  %v3797_v7 = vsel %vm3717_vm1, %v8779_v26, %v6034_v2  ;;  %v3773_v8 = vmul.f32 1.442695, %v3742_v0  ;;  %v8840_v60 = vld [vmem:[#allocation2 + $0x20] sm:$0xff]  ;;  %v7162_v31 = vpack.c.bf16 %v5077_v27, %v5076_v39  ;;  %v6122_v19 = vld [vmem:[%s9632_s11 + $0x88] sm:$0xff]  ;;  %v6124_v2 = vld [vmem:[%s9632_s11 + $0x98] sm:$0xff] }
 0x4f1   :  { %v7545_v62 = vpop.eup %7544  ;;  %3813 = vst.msk [vmem:[#allocation2 + $0x40] sm:$0xff] %vm63_vm0, %v3797_v7  ;;  %v6037_v6 = vadd.f32 -1.0, %v7543_v12  ;;  %v3771_v59 = vmul.f32 1.442695, %v3741_v32  ;;  %6866 = vmatprep.mubr.msk.f32.mxu0 %vm63_vm0, %v8840_v60  ;;  %v7154_v53 = vpack.c.bf16 %v6122_v19, %v6121_v22  ;;  %v5079_v1 = vld [vmem:[%s9634_s13 + $0x18] sm:$0xff]  ;;  %v5376_v12 = vld [vmem:[%s9623_s2] sm:$0xff] }
 0x4f2   :  { %v6036_v9 = vadd.f32 -1.0, %v7545_v62  ;;  %7554 = vpow2.f32 %v3773_v8  ;;  %6867 = vmatmul.mubr.msk.f32.gmra.mrb[20].mxu0 %vm63_vm0, %v8845_v61  ;;  %7163 = vmatprep.subr.bf16.mxu1 %v7162_v31  ;;  %v5379_v7 = vld [vmem:[%s9623_s2 + $0x18] sm:$0xff]  ;;  %v5380_v8 = vld [vmem:[%s9623_s2 + $0x20] sm:$0xff]  ;;  %v5382_v62 = vld [vmem:[%s9623_s2 + $0x30] sm:$0xff] }
 0x4f3   :  { %v3800_v26 = vsel %vm3720_vm2, %v8784_v54, %v6037_v6  ;;  %7556 = vpow2.f32 %v3771_v59  ;;  %v8859_v43 = vld [vmem:[#allocation2 + $0x38] sm:$0xff]  ;;  %7165 = vmatpush3.bf16.msra.mxu1 %v7162_v31  ;;  %5394 = vperm.xlu0 %7524, %v5376_v12   ;;  %v5384_v59 = vld [vmem:[%s9623_s2 + $0x40] sm:$0xff] }
 0x4f4   :  { %v7547_v16 = vpop.eup %7546  ;;  %3816 = vst.msk [vmem:[#allocation2 + $0x58] sm:$0xff] %vm63_vm0, %v3800_v26  ;;  %v3799_v41 = vsel %vm3719_vm3, %v8787_v29, %v6036_v9  ;;  %v8854_v58 = vld [vmem:[#allocation2 + $0x30] sm:$0xff]  ;;  %v5383_v6 = vld [vmem:[%s9623_s2 + $0x38] sm:$0xff] }
 0x4f5   :  { %v7549_v56 = vpop.eup %7548  ;;  %3815 = vst.msk [vmem:[#allocation2 + $0x50] sm:$0xff] %vm63_vm0, %v3799_v41  ;;  %v6039_v23 = vadd.f32 -1.0, %v7547_v16  ;;  %6869 = vmatprep.mubr.msk.f32.mxu0 %vm63_vm0, %v8854_v58  ;;  %v5386_v9 = vld [vmem:[%s9623_s2 + $0x50] sm:$0xff]  ;;  %v5387_v26 = vld [vmem:[%s9623_s2 + $0x58] sm:$0xff]  ;;  %v5388_v16 = vld [vmem:[%s9623_s2 + $0x60] sm:$0xff] }
 0x4f6   :  { %v6038_v54 = vadd.f32 -1.0, %v7549_v56  ;;  %6870 = vmatmul.mubr.msk.f32.gmra.mrb[22].mxu0 %vm63_vm0, %v8859_v43  ;;  %v5389_v41 = vld [vmem:[%s9623_s2 + $0x68] sm:$0xff]  ;;  %v5391_v56 = vld [vmem:[%s9623_s2 + $0x78] sm:$0xff] }
 0x4f7   :  { %v3802_v63 = vsel %vm3722_vm5, %v8793_v34, %v6039_v23  ;;  %v8873_v40 = vld [vmem:[#allocation2 + $0x48] sm:$0xff]  ;;  %v9134_v23 = vld [vmem:[%s9633_s12] ss:$0 sm:$0xff] }
 0x4f8   :  { %v7551_v29 = vpop.eup %7550  ;;  %3818 = vst.msk [vmem:[#allocation2 + $0x68] sm:$0xff] %vm63_vm0, %v3802_v63  ;;  %v3801_v11 = vsel %vm3721_vm6, %v8797_v49, %v6038_v54  ;;  %v8868_v13 = vld [vmem:[#allocation2 + $0x40] sm:$0xff] }
 0x4f9   :  { %v7553_v4 = vpop.eup %7552  ;;  %3817 = vst.msk [vmem:[#allocation2 + $0x60] sm:$0xff] %vm63_vm0, %v3801_v11  ;;  %v6041_v25 = vadd.f32 -1.0, %v7551_v29  ;;  %6872 = vmatprep.mubr.msk.f32.mxu0 %vm63_vm0, %v8868_v13 }
 0x4fa   :  { %v6040_v34 = vadd.f32 -1.0, %v7553_v4  ;;  %6873 = vmatmul.mubr.msk.f32.gmra.mrb[24].mxu0 %vm63_vm0, %v8873_v40 }
 0x4fb   :  { %v3804_v44 = vsel %vm3724_vm7, %v8805_v45, %v6041_v25  ;;  %v8887_v36 = vld [vmem:[#allocation2 + $0x58] sm:$0xff] }
 0x4fc   :  { %v7555_v49 = vpop.eup %7554  ;;  %3820 = vst.msk [vmem:[#allocation2 + $0x78] sm:$0xff] %vm63_vm0, %v3804_v44  ;;  %v3803_v18 = vsel %vm3723_vm8, %v8809_v48, %v6040_v34  ;;  %v8882_v14 = vld [vmem:[#allocation2 + $0x50] sm:$0xff] }
 0x4fd   :  { %v7557_v47 = vpop.eup %7556  ;;  %3819 = vst.msk [vmem:[#allocation2 + $0x70] sm:$0xff] %vm63_vm0, %v3803_v18  ;;  %v6043_v37 = vadd.f32 -1.0, %v7555_v49  ;;  %6875 = vmatprep.mubr.msk.f32.mxu0 %vm63_vm0, %v8882_v14  ;;  %v6083_v48 = vld [vmem:[%s9632_s11 + $0x50] sm:$0xff] }
 0x4fe   :  { %v6042_v17 = vadd.f32 -1.0, %v7557_v47  ;;  %6876 = vmatmul.mubr.msk.f32.gmra.mrb[26].mxu0 %vm63_vm0, %v8887_v36  ;;  %v7142_v50 = vpack.c.bf16 %v6084_v5, %v6083_v48 }
 0x4ff   :  { %v3806_v33 = vsel %vm3726_vm9, %v8819_v51, %v6043_v37  ;;  %v8901_v28 = vld [vmem:[#allocation2 + $0x68] sm:$0xff]  ;;  %v6104_v51 = vld [vmem:[%s9632_s11 + $0x78] sm:$0xff] }
 0x500   :  { %3822 = vst.msk [vmem:[#allocation2 + $0x88] sm:$0xff] %vm63_vm0, %v3806_v33  ;;  %v3805_v45 = vsel %vm3725_vm4, %v8825_v57, %v6042_v17  ;;  %v8896_v38 = vld [vmem:[#allocation2 + $0x60] sm:$0xff]  ;;  %v7150_v52 = vpack.c.bf16 %v6104_v51, %v6103_v21  ;;  %v6123_v57 = vld [vmem:[%s9632_s11 + $0x90] sm:$0xff] }
 0x501   :  { %3821 = vst.msk [vmem:[#allocation2 + $0x80] sm:$0xff] %vm63_vm0, %v3805_v45  ;;  %6878 = vmatprep.mubr.msk.f32.mxu0 %vm63_vm0, %v8896_v38  ;;  %v7158_v0 = vpack.c.bf16 %v6124_v2, %v6123_v57 }
 0x502   :  { %6879 = vmatmul.mubr.msk.f32.gmra.mrb[28].mxu0 %vm63_vm0, %v8901_v28 }
 0x503   :  { %v8909_v20 = vld [vmem:[#allocation2 + $0x78] sm:$0xff] }
 0x504   :  { %v8905_v30 = vld [vmem:[#allocation2 + $0x70] sm:$0xff] }
 0x505   :  { %6881 = vmatprep.mubr.msk.f32.mxu0 %vm63_vm0, %v8905_v30 }
 0x506   :  { %6882 = vmatmul.mubr.msk.f32.gmra.mrb[30].mxu0 %vm63_vm0, %v8909_v20 }
 0x507   :  { %6892 = vmatprep.mubr.msk.f32.mxu0 %vm63_vm0, %v8506_v42  ;;  %v7146_v42 = vpack.c.bf16 %v6102_v35, %v6101_v24 }
 0x50a   :  { %6893 = vmatmul.mubr.msk.f32.vlgmr.msra.gmra.mrb[16].mxu0 %vm63_vm0, %v8821_v55 }
 0x50b   :  { %6895 = vmatprep.mubr.msk.f32.mxu0 %vm63_vm0, %v8829_v10  ;;  %7141 = vmatpush3.bf16.msra.mxu0 %v8752_v15  ;;  %v8962_v15 = vld [vmem:[#allocation2 + $0x80] sm:$0xff] }
 0x50c   :  { %7143 = vmatprep.subr.bf16.mxu0 %v7142_v50 }
 0x50e   :  { %6896 = vmatmul.mubr.msk.f32.gmra.mrb[18].mxu0 %vm63_vm0, %v8840_v60 }
 0x50f   :  { %6898 = vmatprep.mubr.msk.f32.mxu0 %vm63_vm0, %v8845_v61  ;;  %7145 = vmatpush3.bf16.msra.mxu0 %v7142_v50 }
 0x510   :  { %7147 = vmatprep.subr.bf16.mxu0 %v7146_v42 }
 0x512   :  { %6899 = vmatmul.mubr.msk.f32.gmra.mrb[20].mxu0 %vm63_vm0, %v8854_v58 }
 0x513   :  { %6901 = vmatprep.mubr.msk.f32.mxu0 %vm63_vm0, %v8859_v43 }
 0x516   :  { %6902 = vmatmul.mubr.msk.f32.gmra.mrb[22].mxu0 %vm63_vm0, %v8868_v13 }
 0x517   :  { %6904 = vmatprep.mubr.msk.f32.mxu0 %vm63_vm0, %v8873_v40 }
 0x51a   :  { %6905 = vmatmul.mubr.msk.f32.gmra.mrb[24].mxu0 %vm63_vm0, %v8882_v14 }
 0x51b   :  { %6907 = vmatprep.mubr.msk.f32.mxu0 %vm63_vm0, %v8887_v36 }
 0x51e   :  { %6908 = vmatmul.mubr.msk.f32.gmra.mrb[26].mxu0 %vm63_vm0, %v8896_v38 }
 0x51f   :  { %6910 = vmatprep.mubr.msk.f32.mxu0 %vm63_vm0, %v8901_v28 }
 0x522   :  { %6911 = vmatmul.mubr.msk.f32.gmra.mrb[28].mxu0 %vm63_vm0, %v8905_v30 }
 0x523   :  { %6913 = vmatprep.mubr.msk.f32.mxu0 %vm63_vm0, %v8909_v20 }
 0x526   :  { %6914 = vmatmul.mubr.msk.f32.gmra.mrb[30].mxu0 %vm63_vm0, %v8962_v15 }
 0x527   :  { %6924 = vmatprep.mubr.msk.f32.mxu0 %vm63_vm0, %v8821_v55  ;;  %v4305_v55 = vld [vmem:[#allocation2 + $0x88] sm:$0xff] }
 0x52a   :  { %6925 = vmatmul.mubr.msk.f32.vlgmr.msra.gmra.mrb[16].mxu0 %vm63_vm0, %v8829_v10 }
 0x52b   :  { %6927 = vmatprep.mubr.msk.f32.mxu0 %vm63_vm0, %v8840_v60  ;;  %7149 = vmatpush3.bf16.msra.mxu0 %v7146_v42 }
 0x52c   :  { %7151 = vmatprep.subr.bf16.mxu0 %v7150_v52 }
 0x52e   :  { %6928 = vmatmul.mubr.msk.f32.gmra.mrb[18].mxu0 %vm63_vm0, %v8845_v61 }
 0x52f   :  { %6930 = vmatprep.mubr.msk.f32.mxu0 %vm63_vm0, %v8854_v58  ;;  %7153 = vmatpush3.bf16.msra.mxu0 %v7150_v52 }
 0x530   :  { %7155 = vmatprep.subr.bf16.mxu0 %v7154_v53 }
 0x532   :  { %6931 = vmatmul.mubr.msk.f32.gmra.mrb[20].mxu0 %vm63_vm0, %v8859_v43 }
 0x533   :  { %6933 = vmatprep.mubr.msk.f32.mxu0 %vm63_vm0, %v8868_v13 }
 0x536   :  { %6934 = vmatmul.mubr.msk.f32.gmra.mrb[22].mxu0 %vm63_vm0, %v8873_v40 }
 0x537   :  { %6936 = vmatprep.mubr.msk.f32.mxu0 %vm63_vm0, %v8882_v14 }
 0x53a   :  { %6937 = vmatmul.mubr.msk.f32.gmra.mrb[24].mxu0 %vm63_vm0, %v8887_v36 }
 0x53b   :  { %6939 = vmatprep.mubr.msk.f32.mxu0 %vm63_vm0, %v8896_v38 }
 0x53e   :  { %6940 = vmatmul.mubr.msk.f32.gmra.mrb[26].mxu0 %vm63_vm0, %v8901_v28 }
 0x53f   :  { %6942 = vmatprep.mubr.msk.f32.mxu0 %vm63_vm0, %v8905_v30 }
 0x542   :  { %6943 = vmatmul.mubr.msk.f32.gmra.mrb[28].mxu0 %vm63_vm0, %v8909_v20 }
 0x543   :  { %6945 = vmatprep.mubr.msk.f32.mxu0 %vm63_vm0, %v8962_v15 }
 0x546   :  { %6946 = vmatmul.mubr.msk.f32.gmra.mrb[30].mxu0 %vm63_vm0, %v4305_v55 }
 0x547   :  { %6956 = vmatprep.mubr.msk.f32.mxu0 %vm63_vm0, %v8829_v10  ;;  %v5078_v10 = vld [vmem:[%s9634_s13 + $0x10] sm:$0xff] }
 0x548   :  { %v7166_v32 = vpack.c.bf16 %v5079_v1, %v5078_v10 }
 0x54a   :  { %6957 = vmatmul.mubr.msk.f32.vlgmr.msra.gmra.mrb[16].mxu0 %vm63_vm0, %v8840_v60  ;;  %7167 = vmatprep.subr.bf16.mxu1 %v7166_v32 }
 0x54b   :  { %6959 = vmatprep.mubr.msk.f32.mxu0 %vm63_vm0, %v8845_v61  ;;  %7157 = vmatpush3.bf16.msra.mxu0 %v7154_v53 }
 0x54c   :  { %7159 = vmatprep.subr.bf16.mxu0 %v7158_v0  ;;  %7169 = vmatpush3.bf16.msra.mxu1 %v7166_v32 }
 0x54e   :  { %6960 = vmatmul.mubr.msk.f32.gmra.mrb[18].mxu0 %vm63_vm0, %v8854_v58 }
 0x54f   :  { %6962 = vmatprep.mubr.msk.f32.mxu0 %vm63_vm0, %v8859_v43  ;;  %7161 = vmatpush3.bf16.msra.mxu0 %v7158_v0 }
 0x552   :  { %6963 = vmatmul.mubr.msk.f32.gmra.mrb[20].mxu0 %vm63_vm0, %v8868_v13 }
 0x553   :  { %6965 = vmatprep.mubr.msk.f32.mxu0 %vm63_vm0, %v8873_v40 }
 0x556   :  { %6966 = vmatmul.mubr.msk.f32.gmra.mrb[22].mxu0 %vm63_vm0, %v8882_v14 }
 0x557   :  { %6968 = vmatprep.mubr.msk.f32.mxu0 %vm63_vm0, %v8887_v36 }
 0x55a   :  { %6969 = vmatmul.mubr.msk.f32.gmra.mrb[24].mxu0 %vm63_vm0, %v8896_v38 }
 0x55b   :  { %6971 = vmatprep.mubr.msk.f32.mxu0 %vm63_vm0, %v8901_v28 }
 0x55e   :  { %6972 = vmatmul.mubr.msk.f32.gmra.mrb[26].mxu0 %vm63_vm0, %v8905_v30 }
 0x55f   :  { %6974 = vmatprep.mubr.msk.f32.mxu0 %vm63_vm0, %v8909_v20 }
 0x562   :  { %6975 = vmatmul.mubr.msk.f32.gmra.mrb[28].mxu0 %vm63_vm0, %v8962_v15 }
 0x563   :  { %6977 = vmatprep.mubr.msk.f32.mxu0 %vm63_vm0, %v4305_v55 }
 0x566   :  { %6978 = vmatmul.mubr.msk.f32.gmra.mrb[30].mxu0 %vm63_vm0, %v8684_v46 }
 0x567   :  { %6988 = vmatprep.mubr.msk.f32.mxu0 %vm63_vm0, %v8840_v60  ;;  %v5381_v60 = vld [vmem:[%s9623_s2 + $0x28] sm:$0xff] }
 0x56a   :  { %6989 = vmatmul.mubr.msk.f32.vlgmr.msra.gmra.mrb[16].mxu0 %vm63_vm0, %v8845_v61  ;;  %v5385_v61 = vld [vmem:[%s9623_s2 + $0x48] sm:$0xff] }
 0x56b   :  { %6991 = vmatprep.mubr.msk.f32.mxu0 %vm63_vm0, %v8854_v58  ;;  %v5390_v58 = vld [vmem:[%s9623_s2 + $0x70] sm:$0xff] }
 0x56e   :  { %6992 = vmatmul.mubr.msk.f32.gmra.mrb[18].mxu0 %vm63_vm0, %v8859_v43 }
 0x56f   :  { %6994 = vmatprep.mubr.msk.f32.mxu0 %vm63_vm0, %v8868_v13 }
 0x572   :  { %6995 = vmatmul.mubr.msk.f32.gmra.mrb[20].mxu0 %vm63_vm0, %v8873_v40 }
 0x573   :  { %6997 = vmatprep.mubr.msk.f32.mxu0 %vm63_vm0, %v8882_v14 }
 0x576   :  { %6998 = vmatmul.mubr.msk.f32.gmra.mrb[22].mxu0 %vm63_vm0, %v8887_v36 }
 0x577   :  { %7000 = vmatprep.mubr.msk.f32.mxu0 %vm63_vm0, %v8896_v38 }
 0x57a   :  { %7001 = vmatmul.mubr.msk.f32.gmra.mrb[24].mxu0 %vm63_vm0, %v8901_v28 }
 0x57b   :  { %7003 = vmatprep.mubr.msk.f32.mxu0 %vm63_vm0, %v8905_v30 }
 0x57e   :  { %7004 = vmatmul.mubr.msk.f32.gmra.mrb[26].mxu0 %vm63_vm0, %v8909_v20 }
 0x57f   :  { %7006 = vmatprep.mubr.msk.f32.mxu0 %vm63_vm0, %v8962_v15 }
 0x582   :  { %7007 = vmatmul.mubr.msk.f32.gmra.mrb[28].mxu0 %vm63_vm0, %v4305_v55 }
 0x583   :  { %7009 = vmatprep.mubr.msk.f32.mxu0 %vm63_vm0, %v8684_v46  ;;  %v5378_v46 = vld [vmem:[%s9623_s2 + $0x10] sm:$0xff] }
 0x584   :  { %5404 = vperm.xlu1 %7525, %v5378_v46  }
 0x586   :  { %7010 = vmatmul.mubr.msk.f32.gmra.mrb[30].mxu0 %vm63_vm0, %v8716_v3  ;;  %v5377_v3 = vld [vmem:[%s9623_s2 + $0x8] sm:$0xff] }
 0x587   :  { %5399 = vperm.xlu0 %7524, %v5377_v3  }
 0x588   :  { %5409 = vperm.xlu1 %7525, %v5379_v7  }
 0x58b   :  { %5414 = vperm.xlu0 %7524, %v5380_v8  }
 0x58c   :  { %5419 = vperm.xlu1 %7525, %v5381_v60  }
 0x58f   :  { %5424 = vperm.xlu0 %7524, %v5382_v62  }
 0x590   :  { %5429 = vperm.xlu1 %7525, %v5383_v6  }
 0x593   :  { %5434 = vperm.xlu0 %7524, %v5384_v59  }
 0x594   :  { %5439 = vperm.xlu1 %7525, %v5385_v61  }
 0x597   :  { %5444 = vperm.xlu0 %7524, %v5386_v9  }
 0x598   :  { %5449 = vperm.xlu1 %7525, %v5387_v26  }
 0x59b   :  { %5454 = vperm.xlu0 %7524, %v5388_v16  }
 0x59c   :  { %5459 = vperm.xlu1 %7525, %v5389_v41  }
 0x59f   :  { %5464 = vperm.xlu0 %7524, %v5390_v58  }
 0x5a0   :  { %5469 = vperm.xlu1 %7525, %v5391_v56  }
 0x63d   :  { %v6990_v43 = vpop.f32.mrb[16].mxu0 }
 0x63e   :  { %v7222_v54 = vadd.f32 %v6990_v43, %v9134_v23  ;;  %v4885_v63 = vpop.f32.mrb[17].mxu0 }
 0x63f   :  { %v7223_v29 = vadd.f32 %v9134_v23, %v4885_v63 }
 0x640   :  { %v4997_v11 = vmin.f32 %v7222_v54, 0.0  ;;  %vm4981_vm11 = vcmp.gt.f32.partialorder %v7222_v54, 0.0 }
 0x641   :  { %v4996_v13 = vmin.f32 %v7223_v29, 0.0  ;;  %v6993_v4 = vpop.f32.mrb[18].mxu0  ;;  %vm4980_vm10 = vcmp.gt.f32.partialorder %v7223_v29, 0.0 }
 0x642   :  { %v5014_v25 = vmul.f32 1.442695, %v4997_v11  ;;  %v9139_v40 = vadd.f32 %v6993_v4, %v9134_v23  ;;  %v4895_v34 = vpop.f32.mrb[19].mxu0 }
 0x643   :  { %v5012_v44 = vmul.f32 1.442695, %v4996_v13  ;;  %v9142_v49 = vadd.f32 %v9134_v23, %v4895_v34 }
 0x644   :  { %7558 = vpow2.f32 %v5014_v25  ;;  %v4999_v18 = vmin.f32 %v9139_v40, 0.0  ;;  %vm4983_vm13 = vcmp.gt.f32.partialorder %v9139_v40, 0.0 }
 0x645   :  { %7560 = vpow2.f32 %v5012_v44  ;;  %v4998_v14 = vmin.f32 %v9142_v49, 0.0  ;;  %v6996_v47 = vpop.f32.mrb[20].mxu0  ;;  %vm4982_vm12 = vcmp.gt.f32.partialorder %v9142_v49, 0.0 }
 0x646   :  { %v5018_v37 = vmul.f32 1.442695, %v4999_v18  ;;  %v9147_v36 = vadd.f32 %v6996_v47, %v9134_v23  ;;  %v4905_v17 = vpop.f32.mrb[21].mxu0 }
 0x647   :  { %v5016_v33 = vmul.f32 1.442695, %v4998_v14  ;;  %v9150_v45 = vadd.f32 %v9134_v23, %v4905_v17 }
 0x648   :  { %7562 = vpow2.f32 %v5018_v37  ;;  %v5001_v38 = vmin.f32 %v9147_v36, 0.0  ;;  %vm4985_vm15 = vcmp.gt.f32.partialorder %v9147_v36, 0.0 }
 0x649   :  { %7564 = vpow2.f32 %v5016_v33  ;;  %v5000_v28 = vmin.f32 %v9150_v45, 0.0  ;;  %v6999_v30 = vpop.f32.mrb[22].mxu0  ;;  %vm4984_vm14 = vcmp.gt.f32.partialorder %v9150_v45, 0.0 }
 0x64a   :  { %v5022_v20 = vmul.f32 1.442695, %v5001_v38  ;;  %v9155_v48 = vadd.f32 %v6999_v30, %v9134_v23  ;;  %v4915_v5 = vpop.f32.mrb[23].mxu0 }
 0x64b   :  { %v5020_v39 = vmul.f32 1.442695, %v5000_v28  ;;  %v9158_v27 = vadd.f32 %v9134_v23, %v4915_v5 }
 0x64c   :  { %7566 = vpow2.f32 %v5022_v20  ;;  %v5003_v31 = vmin.f32 %v9155_v48, 0.0  ;;  %vm4987_vm2 = vcmp.gt.f32.partialorder %v9155_v48, 0.0 }
 0x64d   :  { %7568 = vpow2.f32 %v5020_v39  ;;  %v5002_v50 = vmin.f32 %v9158_v27, 0.0  ;;  %v7002_v24 = vpop.f32.mrb[24].mxu0  ;;  %vm4986_vm1 = vcmp.gt.f32.partialorder %v9158_v27, 0.0 }
 0x64e   :  { %v7559_v35 = vpop.eup %7558  ;;  %v5026_v42 = vmul.f32 1.442695, %v5003_v31  ;;  %v9163_v15 = vadd.f32 %v7002_v24, %v9134_v23  ;;  %v4925_v21 = vpop.f32.mrb[25].mxu0 }
 0x64f   :  { %v7561_v51 = vpop.eup %7560  ;;  %v6142_v52 = vadd.f32 -1.0, %v7559_v35  ;;  %v5024_v22 = vmul.f32 1.442695, %v5002_v50  ;;  %v9166_v19 = vadd.f32 %v9134_v23, %v4925_v21 }
 0x650   :  { %7570 = vpow2.f32 %v5026_v42  ;;  %v5005_v53 = vmin.f32 %v9163_v15, 0.0  ;;  %v6141_v55 = vadd.f32 -1.0, %v7561_v51  ;;  %vm4989_vm5 = vcmp.gt.f32.partialorder %v9163_v15, 0.0 }
 0x651   :  { %7572 = vpow2.f32 %v5024_v22  ;;  %v5004_v57 = vmin.f32 %v9166_v19, 0.0  ;;  %v7005_v2 = vpop.f32.mrb[26].mxu0  ;;  %v5061_v3 = vsel %vm4981_vm11, %v7222_v54, %v6142_v52  ;;  %vm4988_vm3 = vcmp.gt.f32.partialorder %v9166_v19, 0.0 }
 0x652   :  { %v7563_v0 = vpop.eup %7562  ;;  %v5030_v10 = vmul.f32 1.442695, %v5005_v53  ;;  %v9171_v1 = vadd.f32 %v7005_v2, %v9134_v23  ;;  %v4935_v32 = vpop.f32.mrb[27].mxu0  ;;  %v5060_v12 = vsel %vm4980_vm10, %v7223_v29, %v6141_v55 }
 0x653   :  { %v7565_v46 = vpop.eup %7564  ;;  %v5028_v7 = vmul.f32 1.442695, %v5004_v57  ;;  %v9174_v8 = vadd.f32 %v9134_v23, %v4935_v32  ;;  %7020 = vmatprep.mubr.msk.f32.mxu1 %vm63_vm0, %v5060_v12  ;;  %v6144_v60 = vadd.f32 -1.0, %v7563_v0 }
 0x654   :  { %7574 = vpow2.f32 %v5030_v10  ;;  %v5007_v62 = vmin.f32 %v9171_v1, 0.0  ;;  %7021 = vmatmul.mubr.msk.f32.vlgmr.msra.gmra.mrb[48].mxu1 %vm63_vm0, %v5061_v3  ;;  %v6143_v6 = vadd.f32 -1.0, %v7565_v46  ;;  %vm4991_vm7 = vcmp.gt.f32.partialorder %v9171_v1, 0.0  ;;  %v9236_v46 = vld [vmem:[%s9635_s14] ss:$0 sm:$0xff] }
 0x655   :  { %7576 = vpow2.f32 %v5028_v7  ;;  %v5006_v59 = vmin.f32 %v9174_v8, 0.0  ;;  %v7008_v61 = vpop.f32.mrb[28].mxu0  ;;  %v5063_v63 = vsel %vm4983_vm13, %v9139_v40, %v6144_v60  ;;  %vm4990_vm6 = vcmp.gt.f32.partialorder %v9174_v8, 0.0 }
 0x656   :  { %v7567_v9 = vpop.eup %7566  ;;  %v5034_v26 = vmul.f32 1.442695, %v5007_v62  ;;  %v9182_v16 = vadd.f32 %v7008_v61, %v9134_v23  ;;  %v4945_v41 = vpop.f32.mrb[29].mxu0  ;;  %v5062_v58 = vsel %vm4982_vm12, %v9142_v49, %v6143_v6 }
 0x657   :  { %v7569_v56 = vpop.eup %7568  ;;  %v5032_v43 = vmul.f32 1.442695, %v5006_v59  ;;  %v9187_v54 = vadd.f32 %v9134_v23, %v4945_v41  ;;  %7023 = vmatprep.mubr.msk.f32.mxu1 %vm63_vm0, %v5062_v58  ;;  %v6146_v29 = vadd.f32 -1.0, %v7567_v9  ;;  %v9249_v58 = vpop.permute.xlu0 %5394 }
 0x658   :  { %7578 = vpow2.f32 %v5034_v26  ;;  %v5009_v11 = vmin.f32 %v9182_v16, 0.0  ;;  %7024 = vmatmul.mubr.msk.f32.gmra.mrb[50].mxu1 %vm63_vm0, %v5063_v63  ;;  %v6145_v13 = vadd.f32 -1.0, %v7569_v56  ;;  %vm4993_vm9 = vcmp.gt.f32.partialorder %v9182_v16, 0.0 }
 0x659   :  { %7580 = vpow2.f32 %v5032_v43  ;;  %v5008_v4 = vmin.f32 %v9187_v54, 0.0  ;;  %v7011_v25 = vpop.f32.mrb[30].mxu0  ;;  %v5065_v17 = vsel %vm4985_vm15, %v9147_v36, %v6146_v29  ;;  %vm4992_vm8 = vcmp.gt.f32.partialorder %v9187_v54, 0.0 }
 0x65a   :  { %v7571_v34 = vpop.eup %7570  ;;  %v5038_v44 = vmul.f32 1.442695, %v5009_v11  ;;  %v9196_v49 = vadd.f32 %v7011_v25, %v9134_v23  ;;  %v4955_v18 = vpop.f32.mrb[31].mxu0  ;;  %v5064_v40 = vsel %vm4984_vm14, %v9150_v45, %v6145_v13 }
 0x65b   :  { %v7573_v14 = vpop.eup %7572  ;;  %v5036_v47 = vmul.f32 1.442695, %v5008_v4  ;;  %v7237_v37 = vadd.f32 %v9134_v23, %v4955_v18  ;;  %7026 = vmatprep.mubr.msk.f32.mxu1 %vm63_vm0, %v5064_v40  ;;  %v6148_v33 = vadd.f32 -1.0, %v7571_v34  ;;  %v9259_v25 = vpop.permute.xlu1 %5404 }
 0x65c   :  { %7582 = vpow2.f32 %v5038_v44  ;;  %v5011_v38 = vmin.f32 %v9196_v49, 0.0  ;;  %7027 = vmatmul.mubr.msk.f32.gmra.mrb[52].mxu1 %vm63_vm0, %v5065_v17  ;;  %v6147_v28 = vadd.f32 -1.0, %v7573_v14  ;;  %vm4995_vm10 = vcmp.gt.f32.partialorder %v9196_v49, 0.0  ;;  %v9263_v18 = vpop.permute.xlu0 %5399 }
 0x65d   :  { %7584 = vpow2.f32 %v5036_v47  ;;  %v5010_v30 = vmin.f32 %v7237_v37, 0.0  ;;  %v5067_v36 = vsel %vm4987_vm2, %v9155_v48, %v6148_v33  ;;  %vm4994_vm4 = vcmp.gt.f32.partialorder %v7237_v37, 0.0 }
 0x65e   :  { %v7575_v45 = vpop.eup %7574  ;;  %v5042_v20 = vmul.f32 1.442695, %v5011_v38  ;;  %v5066_v5 = vsel %vm4986_vm1, %v9158_v27, %v6147_v28 }
 0x65f   :  { %v7577_v23 = vpop.eup %7576  ;;  %v5040_v39 = vmul.f32 1.442695, %v5010_v30  ;;  %7029 = vmatprep.mubr.msk.f32.mxu1 %vm63_vm0, %v5066_v5  ;;  %v6150_v31 = vadd.f32 -1.0, %v7575_v45  ;;  %v9273_v45 = vpop.permute.xlu1 %5409 }
 0x660   :  { %7586 = vpow2.f32 %v5042_v20  ;;  %7030 = vmatmul.mubr.msk.f32.gmra.mrb[54].mxu1 %vm63_vm0, %v5067_v36  ;;  %v6149_v50 = vadd.f32 -1.0, %v7577_v23 }
 0x661   :  { %7588 = vpow2.f32 %v5040_v39  ;;  %v5069_v42 = vsel %vm4989_vm5, %v9163_v15, %v6150_v31 }
 0x662   :  { %v7579_v24 = vpop.eup %7578  ;;  %v5068_v35 = vsel %vm4988_vm3, %v9166_v19, %v6149_v50 }
 0x663   :  { %v7581_v27 = vpop.eup %7580  ;;  %7032 = vmatprep.mubr.msk.f32.mxu1 %vm63_vm0, %v5068_v35  ;;  %v6152_v21 = vadd.f32 -1.0, %v7579_v24  ;;  %v9281_v24 = vpop.permute.xlu0 %5414 }
 0x664   :  { %7033 = vmatmul.mubr.msk.f32.gmra.mrb[56].mxu1 %vm63_vm0, %v5069_v42  ;;  %v6151_v48 = vadd.f32 -1.0, %v7581_v27 }
 0x665   :  { %v5071_v19 = vsel %vm4991_vm7, %v9171_v1, %v6152_v21 }
 0x666   :  { %v7583_v51 = vpop.eup %7582  ;;  %v5070_v52 = vsel %vm4990_vm6, %v9174_v8, %v6151_v48 }
 0x667   :  { %v7585_v22 = vpop.eup %7584  ;;  %7035 = vmatprep.mubr.msk.f32.mxu1 %vm63_vm0, %v5070_v52  ;;  %v6154_v53 = vadd.f32 -1.0, %v7583_v51 }
 0x668   :  { %7036 = vmatmul.mubr.msk.f32.gmra.mrb[58].mxu1 %vm63_vm0, %v5071_v19  ;;  %v6153_v15 = vadd.f32 -1.0, %v7585_v22 }
 0x669   :  { %v5073_v0 = vsel %vm4993_vm9, %v9182_v16, %v6154_v53 }
 0x66a   :  { %v7587_v55 = vpop.eup %7586  ;;  %v5072_v57 = vsel %vm4992_vm8, %v9187_v54, %v6153_v15 }
 0x66b   :  { %v7589_v2 = vpop.eup %7588  ;;  %7038 = vmatprep.mubr.msk.f32.mxu1 %vm63_vm0, %v5072_v57  ;;  %v6156_v10 = vadd.f32 -1.0, %v7587_v55 }
 0x66c   :  { %7039 = vmatmul.mubr.msk.f32.gmra.mrb[60].mxu1 %vm63_vm0, %v5073_v0  ;;  %v6155_v1 = vadd.f32 -1.0, %v7589_v2 }
 0x66d   :  { %v5075_v12 = vsel %vm4995_vm10, %v9196_v49, %v6156_v10 }
 0x66e   :  { %v5074_v32 = vsel %vm4994_vm4, %v7237_v37, %v6155_v1  ;;  %v9301_v1 = vpop.permute.xlu1 %5419 }
 0x66f   :  { %7041 = vmatprep.mubr.msk.f32.mxu1 %vm63_vm0, %v5074_v32 }
 0x670   :  { %7042 = vmatmul.mubr.msk.f32.gmra.mrb[62].mxu1 %vm63_vm0, %v5075_v12  ;;  %vm5488_vm0 = vcmask 15360  }
 0x727   :  { %v7022_v3 = vpop.f32.mrb[48].mxu1 }
 0x728   :  { %v5207_v7 = vadd.f32 %v7022_v3, %v9236_v46  ;;  %v5201_v8 = vpop.f32.mrb[49].mxu1 }
 0x729   :  { %v9240_v60 = vadd.f32 %v9236_v46, %v5201_v8 }
 0x72a   :  { %v5297_v62 = vmin.f32 %v5207_v7, 0.0  ;;  %vm5281_vm11 = vcmp.gt.f32.partialorder %v5207_v7, 0.0 }
 0x72b   :  { %v5296_v6 = vmin.f32 %v9240_v60, 0.0  ;;  %v7025_v59 = vpop.f32.mrb[50].mxu1  ;;  %vm5280_vm12 = vcmp.gt.f32.partialorder %v9240_v60, 0.0 }
 0x72c   :  { %v5314_v61 = vmul.f32 1.442695, %v5297_v62  ;;  %v9244_v9 = vadd.f32 %v7025_v59, %v9236_v46  ;;  %v5211_v26 = vpop.f32.mrb[51].mxu1  ;;  %v9308_v62 = vpop.permute.xlu0 %5424 }
 0x72d   :  { %v5312_v16 = vmul.f32 1.442695, %v5296_v6  ;;  %v9247_v41 = vadd.f32 %v9236_v46, %v5211_v26 }
 0x72e   :  { %7590 = vpow2.f32 %v5314_v61  ;;  %v5299_v56 = vmin.f32 %v9244_v9, 0.0  ;;  %vm5283_vm13 = vcmp.gt.f32.partialorder %v9244_v9, 0.0 }
 0x72f   :  { %7592 = vpow2.f32 %v5312_v16  ;;  %v5298_v43 = vmin.f32 %v9247_v41, 0.0  ;;  %v7028_v54 = vpop.f32.mrb[52].mxu1  ;;  %vm5282_vm14 = vcmp.gt.f32.partialorder %v9247_v41, 0.0 }
 0x730   :  { %v5318_v63 = vmul.f32 1.442695, %v5299_v56  ;;  %v9254_v29 = vadd.f32 %v7028_v54, %v9236_v46  ;;  %v5221_v11 = vpop.f32.mrb[53].mxu1 }
 0x731   :  { %v5316_v13 = vmul.f32 1.442695, %v5298_v43  ;;  %v9257_v4 = vadd.f32 %v9236_v46, %v5221_v11 }
 0x732   :  { %7594 = vpow2.f32 %v5318_v63  ;;  %v5301_v34 = vmin.f32 %v9254_v29, 0.0  ;;  %vm5285_vm15 = vcmp.gt.f32.partialorder %v9254_v29, 0.0 }
 0x733   :  { %7596 = vpow2.f32 %v5316_v13  ;;  %v5300_v44 = vmin.f32 %v9257_v4, 0.0  ;;  %v7031_v49 = vpop.f32.mrb[54].mxu1  ;;  %vm5284_vm1 = vcmp.gt.f32.partialorder %v9257_v4, 0.0 }
 0x734   :  { %v5322_v40 = vmul.f32 1.442695, %v5301_v34  ;;  %v9266_v14 = vadd.f32 %v7031_v49, %v9236_v46  ;;  %v5231_v47 = vpop.f32.mrb[55].mxu1 }
 0x735   :  { %v5320_v37 = vmul.f32 1.442695, %v5300_v44  ;;  %v9269_v17 = vadd.f32 %v9236_v46, %v5231_v47 }
 0x736   :  { %7598 = vpow2.f32 %v5322_v40  ;;  %v5303_v33 = vmin.f32 %v9266_v14, 0.0  ;;  %vm5287_vm2 = vcmp.gt.f32.partialorder %v9266_v14, 0.0 }
 0x737   :  { %7600 = vpow2.f32 %v5320_v37  ;;  %v5302_v38 = vmin.f32 %v9269_v17, 0.0  ;;  %v7034_v28 = vpop.f32.mrb[56].mxu1  ;;  %vm5286_vm3 = vcmp.gt.f32.partialorder %v9269_v17, 0.0 }
 0x738   :  { %v7591_v30 = vpop.eup %7590  ;;  %v5326_v20 = vmul.f32 1.442695, %v5303_v33  ;;  %v9276_v5 = vadd.f32 %v7034_v28, %v9236_v46  ;;  %v5241_v23 = vpop.f32.mrb[57].mxu1 }
 0x739   :  { %v7593_v39 = vpop.eup %7592  ;;  %v5324_v36 = vmul.f32 1.442695, %v5302_v38  ;;  %v9279_v31 = vadd.f32 %v9236_v46, %v5241_v23  ;;  %v6175_v50 = vadd.f32 -1.0, %v7591_v30 }
 0x73a   :  { %7602 = vpow2.f32 %v5326_v20  ;;  %v5305_v35 = vmin.f32 %v9276_v5, 0.0  ;;  %v6174_v27 = vadd.f32 -1.0, %v7593_v39  ;;  %v9340_v39 = vpop.permute.xlu0 %5434  ;;  %vm5289_vm5 = vcmp.gt.f32.partialorder %v9276_v5, 0.0 }
 0x73b   :  { %7604 = vpow2.f32 %v5324_v36  ;;  %v5304_v42 = vmin.f32 %v9279_v31, 0.0  ;;  %v7037_v21 = vpop.f32.mrb[58].mxu1  ;;  %v9286_v48 = vsel %vm5281_vm11, %v5207_v7, %v6175_v50  ;;  %vm5288_vm6 = vcmp.gt.f32.partialorder %v9279_v31, 0.0 }
 0x73c   :  { %v7595_v51 = vpop.eup %7594  ;;  %v5330_v52 = vmul.f32 1.442695, %v5305_v35  ;;  %v9289_v22 = vadd.f32 %v7037_v21, %v9236_v46  ;;  %v5251_v19 = vpop.f32.mrb[59].mxu1  ;;  %v5473_v53 = vmul.f32 %v9263_v18, %v9286_v48  ;;  %v9294_v15 = vsel %vm5280_vm12, %v9240_v60, %v6174_v27 }
 0x73d   :  { %v7597_v55 = vpop.eup %7596  ;;  %v5328_v57 = vmul.f32 1.442695, %v5304_v42  ;;  %v9297_v2 = vadd.f32 %v9236_v46, %v5251_v19  ;;  %v5472_v0 = vmul.f32 %v9249_v58, %v9294_v15  ;;  %v6177_v10 = vadd.f32 -1.0, %v7595_v51 }
 0x73e   :  { %7606 = vpow2.f32 %v5330_v52  ;;  %v5307_v32 = vmin.f32 %v9289_v22, 0.0  ;;  %v5492_v12 = vsel %vm5488_vm0, %v5473_v53, 0.0  ;;  %v6176_v26 = vadd.f32 -1.0, %v7597_v55 }
 0x73f   :  { %7608 = vpow2.f32 %v5328_v57  ;;  %v5306_v3 = vmin.f32 %v9297_v2, 0.0  ;;  %5493 = vadd.xlane.f32.xlu1 %v5492_v12  ;;  %v7040_v7 = vpop.f32.mrb[60].mxu1  ;;  %v5489_v8 = vsel %vm5488_vm0, %v5472_v0, 0.0  ;;  %v9318_v54 = vsel %vm5283_vm13, %v9244_v9, %v6177_v10  ;;  %v9329_v9 = vpop.permute.xlu1 %5429 }
 0x740   :  { %v7599_v60 = vpop.eup %7598  ;;  %v5334_v6 = vmul.f32 1.442695, %v5307_v32  ;;  %v9311_v59 = vadd.f32 %v7040_v7, %v9236_v46  ;;  %5490 = vadd.xlane.f32.xlu0 %v5489_v8  ;;  %v5261_v61 = vpop.f32.mrb[61].mxu1  ;;  %v9322_v11 = vsel %vm5282_vm14, %v9247_v41, %v6176_v26  ;;  %v5475_v23 = vmul.f32 %v9273_v45, %v9318_v54 }
 0x741   :  { %v7601_v16 = vpop.eup %7600  ;;  %v5332_v56 = vmul.f32 1.442695, %v5306_v3  ;;  %v9315_v43 = vadd.f32 %v9236_v46, %v5261_v61  ;;  %v6179_v13 = vadd.f32 -1.0, %v7599_v60  ;;  %v5474_v49 = vmul.f32 %v9259_v25, %v9322_v11  ;;  %v9372_v8 = vpop.permute.xlu0 %5444 }
 0x742   :  { %7610 = vpow2.f32 %v5334_v6  ;;  %v5309_v63 = vmin.f32 %v9311_v59, 0.0  ;;  %v6178_v33 = vadd.f32 -1.0, %v7601_v16  ;;  %v5498_v53 = vsel %vm5488_vm0, %v5475_v23, 0.0 }
 0x743   :  { %7612 = vpow2.f32 %v5332_v56  ;;  %v5308_v34 = vmin.f32 %v9315_v43, 0.0  ;;  %v7043_v44 = vpop.f32.mrb[62].mxu1  ;;  %v5495_v30 = vsel %vm5488_vm0, %v5474_v49, 0.0  ;;  %v9349_v35 = vsel %vm5285_vm15, %v9254_v29, %v6179_v13  ;;  %v9360_v57 = vpop.permute.xlu1 %5439 }
 0x744   :  { %v7603_v40 = vpop.eup %7602  ;;  %v5338_v47 = vmul.f32 1.442695, %v5309_v63  ;;  %v9332_v37 = vadd.f32 %v7043_v44, %v9236_v46  ;;  %v5271_v41 = vpop.f32.mrb[63].mxu1  ;;  %5496 = vadd.xlane.f32.xlu0 %v5495_v30  ;;  %v9344_v50 = vsel %vm5284_vm1, %v9257_v4, %v6178_v33  ;;  %v5477_v55 = vmul.f32 %v9301_v1, %v9349_v35 }
 0x745   :  { %v7605_v38 = vpop.eup %7604  ;;  %v5336_v28 = vmul.f32 1.442695, %v5308_v34  ;;  %v9336_v20 = vadd.f32 %v9236_v46, %v5271_v41  ;;  %v5476_v27 = vmul.f32 %v9281_v24, %v9344_v50  ;;  %v6181_v4 = vadd.f32 -1.0, %v7603_v40  ;;  %v9401_v41 = vpop.permute.xlu0 %5454 }
 0x746   :  { %7614 = vpow2.f32 %v5338_v47  ;;  %v5311_v36 = vmin.f32 %v9332_v37, 0.0  ;;  %v6180_v51 = vadd.f32 -1.0, %v7605_v38  ;;  %v5504_v60 = vsel %vm5488_vm0, %v5477_v55, 0.0 }
 0x747   :  { %7616 = vpow2.f32 %v5336_v28  ;;  %v5310_v46 = vmin.f32 %v9336_v20, 0.0  ;;  %v5501_v29 = vsel %vm5488_vm0, %v5476_v27, 0.0  ;;  %v9368_v10 = vsel %vm5287_vm2, %v9266_v14, %v6181_v4  ;;  %v9389_v34 = vpop.permute.xlu1 %5449 }
 0x748   :  { %v7607_v42 = vpop.eup %7606  ;;  %v5342_v21 = vmul.f32 1.442695, %v5311_v36  ;;  %5499 = vadd.xlane.f32.xlu0 %v5498_v53  ;;  %5502 = vadd.xlane.f32.xlu1 %v5501_v29  ;;  %v9363_v0 = vsel %vm5286_vm3, %v9269_v17, %v6180_v51  ;;  %v5479_v14 = vmul.f32 %v9329_v9, %v9368_v10  ;;  %vm5290_vm7 = vcmp.gt.f32.partialorder %v9297_v2, 0.0 }
 0x749   :  { %v7609_v52 = vpop.eup %7608  ;;  %v5340_v19 = vmul.f32 1.442695, %v5310_v46  ;;  %v6183_v32 = vadd.f32 -1.0, %v7607_v42  ;;  %v5478_v12 = vmul.f32 %v9308_v62, %v9363_v0  ;;  %vm5291_vm8 = vcmp.gt.f32.partialorder %v9289_v22, 0.0 }
 0x74a   :  { %7618 = vpow2.f32 %v5342_v21  ;;  %v6182_v3 = vadd.f32 -1.0, %v7609_v52  ;;  %v5510_v40 = vsel %vm5488_vm0, %v5479_v14, 0.0  ;;  %vm5292_vm9 = vcmp.gt.f32.partialorder %v9315_v43, 0.0  ;;  %v9424_v52 = vpop.permute.xlu0 %5464 }
 0x74b   :  { %7620 = vpow2.f32 %v5340_v19  ;;  %v5507_v6 = vsel %vm5488_vm0, %v5478_v12, 0.0  ;;  %v9386_v16 = vsel %vm5289_vm5, %v9276_v5, %v6183_v32  ;;  %vm5293_vm4 = vcmp.gt.f32.partialorder %v9311_v59, 0.0  ;;  %v9417_v42 = vpop.permute.xlu1 %5459 }
 0x74c   :  { %v7611_v7 = vpop.eup %7610  ;;  %v9381_v61 = vsel %vm5288_vm6, %v9279_v31, %v6182_v3  ;;  %5505 = vadd.xlane.f32.xlu0 %v5504_v60  ;;  %5508 = vadd.xlane.f32.xlu1 %v5507_v6  ;;  %v5481_v5 = vmul.f32 %v9360_v57, %v9386_v16  ;;  %vm5294_vm10 = vcmp.gt.f32.partialorder %v9336_v20, 0.0  ;;  %vm5295_vm11 = vcmp.gt.f32.partialorder %v9332_v37, 0.0 }
 0x74d   :  { %v7613_v17 = vpop.eup %7612  ;;  %v5480_v26 = vmul.f32 %v9340_v39, %v9381_v61  ;;  %v6185_v63 = vadd.f32 -1.0, %v7611_v7 }
 0x74e   :  { %v6184_v56 = vadd.f32 -1.0, %v7613_v17  ;;  %v5516_v46 = vsel %vm5488_vm0, %v5481_v5, 0.0 }
 0x74f   :  { %v5513_v44 = vsel %vm5488_vm0, %v5480_v26, 0.0  ;;  %v9404_v33 = vsel %vm5291_vm8, %v9289_v22, %v6185_v63  ;;  %v9439_v12 = vpop.permute.xlu1 %5469 }
 0x750   :  { %v7615_v13 = vpop.eup %7614  ;;  %v9393_v31 = vsel %vm5290_vm7, %v9297_v2, %v6184_v56  ;;  %5511 = vadd.xlane.f32.xlu0 %v5510_v40  ;;  %5514 = vadd.xlane.f32.xlu1 %v5513_v44  ;;  %v5483_v27 = vmul.f32 %v9389_v34, %v9404_v33 }
 0x751   :  { %v7617_v49 = vpop.eup %7616  ;;  %v5482_v47 = vmul.f32 %v9372_v8, %v9393_v31  ;;  %v6187_v38 = vadd.f32 -1.0, %v7615_v13 }
 0x752   :  { %v6186_v2 = vadd.f32 -1.0, %v7617_v49  ;;  %v5522_v53 = vsel %vm5488_vm0, %v5483_v27, 0.0 }
 0x753   :  { %v5519_v28 = vsel %vm5488_vm0, %v5482_v47, 0.0  ;;  %v9420_v21 = vsel %vm5293_vm4, %v9311_v59, %v6187_v38 }
 0x754   :  { %v7619_v30 = vpop.eup %7618  ;;  %v9409_v23 = vsel %vm5292_vm9, %v9315_v43, %v6186_v2  ;;  %5517 = vadd.xlane.f32.xlu0 %v5516_v46  ;;  %5520 = vadd.xlane.f32.xlu1 %v5519_v28  ;;  %v5485_v29 = vmul.f32 %v9417_v42, %v9420_v21 }
 0x755   :  { %v7621_v36 = vpop.eup %7620  ;;  %v5484_v22 = vmul.f32 %v9401_v41, %v9409_v23  ;;  %v6189_v51 = vadd.f32 -1.0, %v7619_v30 }
 0x756   :  { %v6188_v43 = vadd.f32 -1.0, %v7621_v36 }
 0x757   :  { %v5525_v4 = vsel %vm5488_vm0, %v5484_v22, 0.0  ;;  %v9436_v55 = vsel %vm5295_vm11, %v9332_v37, %v6189_v51 }
 0x758   :  { %v9427_v19 = vsel %vm5294_vm10, %v9336_v20, %v6188_v43  ;;  %5523 = vadd.xlane.f32.xlu0 %v5522_v53  ;;  %5526 = vadd.xlane.f32.xlu1 %v5525_v4  ;;  %v5528_v20 = vsel %vm5488_vm0, %v5485_v29, 0.0  ;;  %v5487_v3 = vmul.f32 %v9439_v12, %v9436_v55 }
 0x759   :  { %v5486_v59 = vmul.f32 %v9424_v52, %v9427_v19 }
 0x75a   :  { %v5534_v7 = vsel %vm5488_vm0, %v5487_v3, 0.0 }
 0x75b   :  { %v5531_v32 = vsel %vm5488_vm0, %v5486_v59, 0.0 }
 0x75c   :  { %5529 = vadd.xlane.f32.xlu0 %v5528_v20  ;;  %5532 = vadd.xlane.f32.xlu1 %v5531_v32 }
 0x760   :  { %5535 = vadd.xlane.f32.xlu0 %v5534_v7 }
 0x7cc   :  { %v5494_v60 = vpop.xlane.xlu1 %5493 }
 0x7cd   :  { %v5491_v17 = vpop.xlane.xlu0 %5490 }
 0x7ce   :  { %v5537_v14 = vadd.f32 %v5494_v60, %v5491_v17 }
 0x7d1   :  { %v5497_v6 = vpop.xlane.xlu0 %5496 }
 0x7d2   :  { %v5538_v37 = vadd.f32 %v5537_v14, %v5497_v6 }
 0x7d5   :  { %v5500_v26 = vpop.xlane.xlu0 %5499  ;;  %v5503_v56 = vpop.xlane.xlu1 %5502 }
 0x7d6   :  { %v5539_v63 = vadd.f32 %v5538_v37, %v5500_v26 }
 0x7d8   :  { %v5540_v13 = vadd.f32 %v5539_v63, %v5503_v56 }
 0x7d9   :  { %v5506_v44 = vpop.xlane.xlu0 %5505  ;;  %v5509_v49 = vpop.xlane.xlu1 %5508 }
 0x7da   :  { %v5541_v40 = vadd.f32 %v5540_v13, %v5506_v44 }
 0x7dc   :  { %v5542_v5 = vadd.f32 %v5541_v40, %v5509_v49 }
 0x7dd   :  { %v5512_v47 = vpop.xlane.xlu0 %5511  ;;  %v5515_v2 = vpop.xlane.xlu1 %5514 }
 0x7de   :  { %v5543_v38 = vadd.f32 %v5542_v5, %v5512_v47 }
 0x7e0   :  { %v5544_v28 = vadd.f32 %v5543_v38, %v5515_v2 }
 0x7e1   :  { %v5518_v30 = vpop.xlane.xlu0 %5517  ;;  %v5521_v36 = vpop.xlane.xlu1 %5520 }
 0x7e2   :  { %v5545_v46 = vadd.f32 %v5544_v28, %v5518_v30 }
 0x7e4   :  { %v5546_v27 = vadd.f32 %v5545_v46, %v5521_v36 }
 0x7e5   :  { %v5524_v22 = vpop.xlane.xlu0 %5523  ;;  %v5527_v43 = vpop.xlane.xlu1 %5526 }
 0x7e6   :  { %v5547_v51 = vadd.f32 %v5546_v27, %v5524_v22 }
 0x7e8   :  { %v5548_v4 = vadd.f32 %v5547_v51, %v5527_v43 }
 0x7e9   :  { %v5530_v53 = vpop.xlane.xlu0 %5529  ;;  %v5533_v59 = vpop.xlane.xlu1 %5532 }
 0x7ea   :  { %v5549_v29 = vadd.f32 %v5548_v4, %v5530_v53 }
 0x7ec   :  { %v5550_v32 = vadd.f32 %v5549_v29, %v5533_v59 }
 0x7ed   :  { %v5536_v20 = vpop.xlane.xlu0 %5535 }
 0x7ee   :  { %v5551_v3 = vadd.f32 %v5550_v32, %v5536_v20 }
 0x7f0   :  { %v5552_v7 = vrot.slane %v5551_v3, 4 }
 0x7f2   :  { %v5553_v17 = vadd.f32 %v5552_v7, %v5551_v3 }
 0x7f4   :  { %v5554_v60 = vrot.slane %v5553_v17, 2 }
 0x7f6   :  { %v5555_v6 = vadd.f32 %v5554_v60, %v5553_v17 }
 0x7f8   :  { %v5556_v14 = vrot.slane %v5555_v6, 1 }
 0x7fa   :  { %v5557_v37 = vadd.f32 %v5556_v14, %v5555_v6 }
 0x7fc   :  { %v5559_v26 = vmul.f32 0.015625, %v5557_v37 }
 0x7fe   :  { %v9446_v56 = vsub.f32 %v9286_v48, %v5559_v26  ;;  %v9449_v63 = vsub.f32 %v9294_v15, %v5559_v26  ;;  %v9452_v13 = vsub.f32 %v9318_v54, %v5559_v26  ;;  %v9455_v44 = vsub.f32 %v9322_v11, %v5559_v26 }
 0x7ff   :  { %v9458_v49 = vsub.f32 %v9349_v35, %v5559_v26  ;;  %v9461_v40 = vsub.f32 %v9344_v50, %v5559_v26  ;;  %v9476_v2 = vsub.f32 %v9368_v10, %v5559_v26  ;;  %v9490_v36 = vsub.f32 %v9386_v16, %v5559_v26 }
 0x800   :  { %v5577_v5 = vmul.f32 %v9446_v56, %v9263_v18  ;;  %v5576_v48 = vmul.f32 %v9449_v63, %v9249_v58  ;;  %v5579_v15 = vmul.f32 %v9452_v13, %v9273_v45  ;;  %v5578_v54 = vmul.f32 %v9455_v44, %v9259_v25 }
 0x801   :  { %v5581_v35 = vmul.f32 %v9458_v49, %v9301_v1  ;;  %v5580_v50 = vmul.f32 %v9461_v40, %v9281_v24  ;;  %v9479_v18 = vsub.f32 %v9363_v0, %v5559_v26  ;;  %v5583_v1 = vmul.f32 %v9476_v2, %v9329_v9 }
 0x802   :  { %v5593_v11 = vmul.f32 %v5577_v5, %v5577_v5  ;;  %v5592_v47 = vmul.f32 %v5576_v48, %v5576_v48  ;;  %v5595_v38 = vmul.f32 %v5579_v15, %v5579_v15  ;;  %v5594_v25 = vmul.f32 %v5578_v54, %v5578_v54 }
 0x803   :  { %v5597_v28 = vmul.f32 %v5581_v35, %v5581_v35  ;;  %v5596_v30 = vmul.f32 %v5580_v50, %v5580_v50  ;;  %v5582_v24 = vmul.f32 %v9479_v18, %v9308_v62  ;;  %v9493_v46 = vsub.f32 %v9381_v61, %v5559_v26 }
 0x804   :  { %v5611_v58 = vsel %vm5488_vm0, %v5593_v11, 0.0  ;;  %v5608_v45 = vsel %vm5488_vm0, %v5592_v47, 0.0  ;;  %v5617_v10 = vsel %vm5488_vm0, %v5595_v38, 0.0  ;;  %v5614_v0 = vsel %vm5488_vm0, %v5594_v25, 0.0 }
 0x805   :  { %5612 = vadd.xlane.f32.xlu0 %v5611_v58  ;;  %5609 = vadd.xlane.f32.xlu1 %v5608_v45  ;;  %v5623_v27 = vsel %vm5488_vm0, %v5597_v28, 0.0  ;;  %v5620_v22 = vsel %vm5488_vm0, %v5596_v30, 0.0  ;;  %v5599_v9 = vmul.f32 %v5583_v1, %v5583_v1  ;;  %v5598_v43 = vmul.f32 %v5582_v24, %v5582_v24 }
 0x806   :  { %v5585_v62 = vmul.f32 %v9490_v36, %v9360_v57  ;;  %v5584_v51 = vmul.f32 %v9493_v46, %v9340_v39  ;;  %v9502_v16 = vsub.f32 %v9404_v33, %v5559_v26  ;;  %v9505_v61 = vsub.f32 %v9393_v31, %v5559_v26 }
 0x807   :  { %v5629_v4 = vsel %vm5488_vm0, %v5599_v9, 0.0  ;;  %v5626_v53 = vsel %vm5488_vm0, %v5598_v43, 0.0  ;;  %v9510_v29 = vsub.f32 %v9420_v21, %v5559_v26  ;;  %v9513_v57 = vsub.f32 %v9409_v23, %v5559_v26 }
 0x808   :  { %v5601_v59 = vmul.f32 %v5585_v62, %v5585_v62  ;;  %v5600_v39 = vmul.f32 %v5584_v51, %v5584_v51  ;;  %v5587_v33 = vmul.f32 %v9502_v16, %v9389_v34  ;;  %v5586_v31 = vmul.f32 %v9505_v61, %v9372_v8 }
 0x809   :  { %5618 = vadd.xlane.f32.xlu0 %v5617_v10  ;;  %5615 = vadd.xlane.f32.xlu1 %v5614_v0  ;;  %v5589_v32 = vmul.f32 %v9510_v29, %v9417_v42  ;;  %v5588_v21 = vmul.f32 %v9513_v57, %v9401_v41  ;;  %v9524_v20 = vsub.f32 %v9436_v55, %v5559_v26 }
 0x80a   :  { %v9527_v23 = vsub.f32 %v9427_v19, %v5559_v26  ;;  %v5635_v3 = vsel %vm5488_vm0, %v5601_v59, 0.0  ;;  %v5632_v34 = vsel %vm5488_vm0, %v5600_v39, 0.0  ;;  %v5603_v7 = vmul.f32 %v5587_v33, %v5587_v33 }
 0x80b   :  { %v5602_v8 = vmul.f32 %v5586_v31, %v5586_v31  ;;  %v5605_v17 = vmul.f32 %v5589_v32, %v5589_v32  ;;  %v5591_v42 = vmul.f32 %v9524_v20, %v9439_v12  ;;  %v5604_v60 = vmul.f32 %v5588_v21, %v5588_v21 }
 0x80c   :  { %v5641_v41 = vsel %vm5488_vm0, %v5603_v7, 0.0  ;;  %v5590_v19 = vmul.f32 %v9527_v23, %v9424_v52 }
 0x80d   :  { %5624 = vadd.xlane.f32.xlu0 %v5623_v27  ;;  %5621 = vadd.xlane.f32.xlu1 %v5620_v22  ;;  %v5638_v55 = vsel %vm5488_vm0, %v5602_v8, 0.0  ;;  %v5647_v6 = vsel %vm5488_vm0, %v5605_v17, 0.0  ;;  %v5644_v14 = vsel %vm5488_vm0, %v5604_v60, 0.0  ;;  %v5607_v37 = vmul.f32 %v5591_v42, %v5591_v42 }
 0x80e   :  { %v5606_v26 = vmul.f32 %v5590_v19, %v5590_v19 }
 0x80f   :  { %v5653_v12 = vsel %vm5488_vm0, %v5607_v37, 0.0 }
 0x810   :  { %v5650_v5 = vsel %vm5488_vm0, %v5606_v26, 0.0 }
 0x811   :  { %5630 = vadd.xlane.f32.xlu0 %v5629_v4  ;;  %5627 = vadd.xlane.f32.xlu1 %v5626_v53 }
 0x815   :  { %5636 = vadd.xlane.f32.xlu0 %v5635_v3  ;;  %5633 = vadd.xlane.f32.xlu1 %v5632_v34 }
 0x819   :  { %5642 = vadd.xlane.f32.xlu0 %v5641_v41  ;;  %5639 = vadd.xlane.f32.xlu1 %v5638_v55 }
 0x81d   :  { %5648 = vadd.xlane.f32.xlu0 %v5647_v6  ;;  %5645 = vadd.xlane.f32.xlu1 %v5644_v14 }
 0x821   :  { %5654 = vadd.xlane.f32.xlu0 %v5653_v12  ;;  %5651 = vadd.xlane.f32.xlu1 %v5650_v5 }
 0x892   :  { %v5613_v48 = vpop.xlane.xlu0 %5612  ;;  %v5610_v15 = vpop.xlane.xlu1 %5609 }
 0x893   :  { %v5656_v54 = vadd.f32 %v5613_v48, %v5610_v15 }
 0x896   :  { %v5619_v52 = vpop.xlane.xlu0 %5618  ;;  %v5616_v11 = vpop.xlane.xlu1 %5615 }
 0x897   :  { %v5657_v47 = vadd.f32 %v5656_v54, %v5616_v11 }
 0x899   :  { %v5658_v35 = vadd.f32 %v5657_v47, %v5619_v52 }
 0x89a   :  { %v5625_v50 = vpop.xlane.xlu0 %5624  ;;  %v5622_v58 = vpop.xlane.xlu1 %5621 }
 0x89b   :  { %v5659_v45 = vadd.f32 %v5658_v35, %v5622_v58 }
 0x89d   :  { %v5660_v38 = vadd.f32 %v5659_v45, %v5625_v50 }
 0x89e   :  { %v5631_v25 = vpop.xlane.xlu0 %5630  ;;  %v5628_v28 = vpop.xlane.xlu1 %5627 }
 0x89f   :  { %v5661_v30 = vadd.f32 %v5660_v38, %v5628_v28 }
 0x8a1   :  { %v5662_v1 = vadd.f32 %v5661_v30, %v5631_v25 }
 0x8a2   :  { %v5637_v24 = vpop.xlane.xlu0 %5636  ;;  %v5634_v10 = vpop.xlane.xlu1 %5633 }
 0x8a3   :  { %v5663_v0 = vadd.f32 %v5662_v1, %v5634_v10 }
 0x8a5   :  { %v5664_v27 = vadd.f32 %v5663_v0, %v5637_v24 }
 0x8a6   :  { %v5643_v22 = vpop.xlane.xlu0 %5642  ;;  %v5640_v9 = vpop.xlane.xlu1 %5639 }
 0x8a7   :  { %v5665_v43 = vadd.f32 %v5664_v27, %v5640_v9 }
 0x8a9   :  { %v5666_v62 = vadd.f32 %v5665_v43, %v5643_v22 }
 0x8aa   :  { %v5649_v51 = vpop.xlane.xlu0 %5648  ;;  %v5646_v4 = vpop.xlane.xlu1 %5645 }
 0x8ab   :  { %v5667_v53 = vadd.f32 %v5666_v62, %v5646_v4 }
 0x8ad   :  { %v5668_v59 = vadd.f32 %v5667_v53, %v5649_v51 }
 0x8ae   :  { %v5652_v39 = vpop.xlane.xlu1 %5651  ;;  %v5655_v31 = vpop.xlane.xlu0 %5654 }
 0x8af   :  { %v5669_v33 = vadd.f32 %v5668_v59, %v5652_v39 }
 0x8b1   :  { %v5670_v32 = vadd.f32 %v5669_v33, %v5655_v31 }
 0x8b3   :  { %v5671_v21 = vrot.slane %v5670_v32, 4 }
 0x8b5   :  { %v5672_v3 = vadd.f32 %v5671_v21, %v5670_v32 }
 0x8b7   :  { %v5673_v34 = vrot.slane %v5672_v3, 2 }
 0x8b9   :  { %v5674_v7 = vadd.f32 %v5673_v34, %v5672_v3 }
 0x8bb   :  { %v5675_v8 = vrot.slane %v5674_v7, 1 }
 0x8bd   :  { %v5676_v17 = vadd.f32 %v5675_v8, %v5674_v7 }
 0x8bf   :  { %v5678_v42 = vmul.f32 0.015873017, %v5676_v17 }
 0x8c1   :  { %7622 = vrsqrt.f32 %v5678_v42 }
 0x8cb   :  { %v7623_v41 = vpop.eup %7622 }
 0x8cc   :  { %v5680_v55 = vmul.f32 %v7623_v41, %v9449_v63  ;;  %v5681_v60 = vmul.f32 %v7623_v41, %v9446_v56  ;;  %v5682_v19 = vmul.f32 %v7623_v41, %v9455_v44  ;;  %v5683_v6 = vmul.f32 %v7623_v41, %v9452_v13 }
 0x8cd   :  { %v5684_v14 = vmul.f32 %v7623_v41, %v9461_v40  ;;  %v5685_v37 = vmul.f32 %v7623_v41, %v9458_v49  ;;  %v5686_v26 = vmul.f32 %v7623_v41, %v9479_v18  ;;  %v5687_v12 = vmul.f32 %v7623_v41, %v9476_v2 }
 0x8ce   :  { %v5688_v5 = vmul.f32 %v7623_v41, %v9493_v46  ;;  %v5689_v48 = vmul.f32 %v7623_v41, %v9490_v36  ;;  %v5690_v63 = vmul.f32 %v7623_v41, %v9505_v61  ;;  %v5691_v56 = vmul.f32 %v7623_v41, %v9502_v16  ;;  %5696 = vst.msk [vmem:[%s9636_s15] sm:$0xff] %vm5488_vm0, %v5680_v55 }
 0x8cf   :  { %5697 = vst.msk [vmem:[%s9636_s15 + $0x8] sm:$0xff] %vm5488_vm0, %v5681_v60  ;;  %5698 = vst.msk [vmem:[%s9636_s15 + $0x10] sm:$0xff] %vm5488_vm0, %v5682_v19  ;;  %v5692_v13 = vmul.f32 %v7623_v41, %v9513_v57  ;;  %v5693_v44 = vmul.f32 %v7623_v41, %v9510_v29  ;;  %v5694_v49 = vmul.f32 %v7623_v41, %v9527_v23 }
 0x8d0   :  { %5699 = vst.msk [vmem:[%s9636_s15 + $0x18] sm:$0xff] %vm5488_vm0, %v5683_v6  ;;  %v5695_v40 = vmul.f32 %v7623_v41, %v9524_v20  ;;  %5700 = vst.msk [vmem:[%s9636_s15 + $0x20] sm:$0xff] %vm5488_vm0, %v5684_v14 }
 0x8d1   :  { %5701 = vst.msk [vmem:[%s9636_s15 + $0x28] sm:$0xff] %vm5488_vm0, %v5685_v37  ;;  %5702 = vst.msk [vmem:[%s9636_s15 + $0x30] sm:$0xff] %vm5488_vm0, %v5686_v26 }
 0x8d2   :  { %5703 = vst.msk [vmem:[%s9636_s15 + $0x38] sm:$0xff] %vm5488_vm0, %v5687_v12  ;;  %5704 = vst.msk [vmem:[%s9636_s15 + $0x40] sm:$0xff] %vm5488_vm0, %v5688_v5 }
 0x8d3   :  { %5705 = vst.msk [vmem:[%s9636_s15 + $0x48] sm:$0xff] %vm5488_vm0, %v5689_v48  ;;  %5706 = vst.msk [vmem:[%s9636_s15 + $0x50] sm:$0xff] %vm5488_vm0, %v5690_v63 }
 0x8d4   :  { %5707 = vst.msk [vmem:[%s9636_s15 + $0x58] sm:$0xff] %vm5488_vm0, %v5691_v56  ;;  %5708 = vst.msk [vmem:[%s9636_s15 + $0x60] sm:$0xff] %vm5488_vm0, %v5692_v13 }
 0x8d5   :  { %5709 = vst.msk [vmem:[%s9636_s15 + $0x68] sm:$0xff] %vm5488_vm0, %v5693_v44  ;;  %5710 = vst.msk [vmem:[%s9636_s15 + $0x70] sm:$0xff] %vm5488_vm0, %v5694_v49 }
 0x8d6   :  { %5711 = vst.msk [vmem:[%s9636_s15 + $0x78] sm:$0xff] %vm5488_vm0, %v5695_v40 }
 0x8d7   :  { %5716 = vsyncpa [#allocation5], 1 }

</bundles_post_ra>
